<compile_context>
chip_gen: v5e
topology: v5e:2x2
jax: 0.10.0
libtpu: 0.0.40
codegen_flags: <defaults>
</compile_context>

<pallas_src>
import functools

import jax
import jax.numpy as jnp
from jax.experimental import pallas as pl
from jax.experimental.pallas import tpu as pltpu


def _pick_row_tile(H, W, max_rows=128):
    """Largest row tile dividing H whose im2col slab has <= max_rows rows."""
    th = 1
    for cand in range(1, H + 1):
        if H % cand == 0 and cand * W <= max_rows:
            th = cand
    return th


def _build_kernel(H, W, Cp, TH):
    n_tiles = H // TH
    M = TH * W

    def kernel(xpad_ref, w1_ref, b1_ref, w2_ref, b2_ref, o_ref,
               mid_ref, col_ref):
        # ---- zero only the 1-px halo frame of the mid-activation scratch ----
        zero_row = jnp.zeros((1, W + 2, Cp), jnp.float32)
        zero_col = jnp.zeros((H + 2, 1, Cp), jnp.float32)
        mid_ref[0:1, :, :] = zero_row
        mid_ref[H + 1:H + 2, :, :] = zero_row
        mid_ref[:, 0:1, :] = zero_col
        mid_ref[:, W + 1:W + 2, :] = zero_col

        def im2col(read_win):
            # Gather the 9 taps once per row tile into a (M, 9*Cp) slab so the
            # conv becomes a single K=9*Cp MXU matmul.
            for dy in range(3):
                for dx in range(3):
                    tap = dy * 3 + dx
                    win = read_win(dy, dx)                      # (TH, W, Cp)
                    col_ref[:, tap * Cp:(tap + 1) * Cp] = win.reshape(M, Cp)

        # ---- pass 1: conv1 + folded BN1 + ReLU -> mid_ref interior ----------
        for t in range(n_tiles):
            r0 = t * TH
            im2col(lambda dy, dx: xpad_ref[0, r0 + dy:r0 + dy + TH,
                                           dx:dx + W, :])
            h = jnp.dot(col_ref[...], w1_ref[...],
                        preferred_element_type=jnp.float32)
            h = jnp.maximum(h + b1_ref[...], 0.0)
            mid_ref[r0 + 1:r0 + 1 + TH, 1:W + 1, :] = h.reshape(TH, W, Cp)

        # ---- pass 2: conv2 + folded BN2 + residual + ReLU -> output ---------
        for t in range(n_tiles):
            r0 = t * TH
            im2col(lambda dy, dx: mid_ref[r0 + dy:r0 + dy + TH, dx:dx + W, :])
            h = jnp.dot(col_ref[...], w2_ref[...],
                        preferred_element_type=jnp.float32)
            res = xpad_ref[0, r0 + 1:r0 + 1 + TH, 1:W + 1, :].reshape(M, Cp)
            out = jnp.maximum(h + b2_ref[...] + res, 0.0)
            o_ref[0, r0:r0 + TH, :, :] = (
                out.reshape(TH, W, Cp).astype(o_ref.dtype))

    return kernel


def resblock_forward_nhwc(x_nhwc, params, eps=1e-5):
    """NHWC ResBlock forward. x_nhwc: (N, H, W, C) float32."""
    N, H, W, C = x_nhwc.shape
    Cp = ((C + 127) // 128) * 128              # lane-dense channel padding
    TH = _pick_row_tile(H, W)

    # Fold eval-mode BN into the conv weights (per-output-channel scale) and a
    # bias; reshape weights for the fused K=9*Cp im2col matmul.
    def fold(w_oihw, gamma, beta, mean, var):
        scale = gamma / jnp.sqrt(var + eps)
        bias = beta - mean * scale
        w_hwio = jnp.transpose(w_oihw, (2, 3, 1, 0)) * scale   # (3,3,Cin,Cout)
        w_hwio = jnp.pad(w_hwio, ((0, 0), (0, 0), (0, Cp - C), (0, Cp - C)))
        bias = jnp.pad(bias, (0, Cp - C))
        return (w_hwio.reshape(9 * Cp, Cp).astype(jnp.float32),
                bias.reshape(1, Cp).astype(jnp.float32))

    w1_2d, b1 = fold(params["w1"], params["gamma1"], params["beta1"],
                     params["mean1"], params["var1"])
    w2_2d, b2 = fold(params["w2"], params["gamma2"], params["beta2"],
                     params["mean2"], params["var2"])

    # Spatial pre-padding (conv padding=1) + zero channel padding done once in
    # the wrapper, so no full-scratch zeroing inside the kernel.
    xpad = jnp.pad(x_nhwc.astype(jnp.float32),
                   ((0, 0), (1, 1), (1, 1), (0, Cp - C)))

    kernel = _build_kernel(H, W, Cp, TH)

    # --- VMEM budget (double-buffered blocks + persistent scratch) ----------
    b4 = 4
    blk_in = (H + 2) * (W + 2) * Cp * b4
    blk_out = H * W * Cp * b4
    blk_w = 9 * Cp * Cp * b4
    blk_b = Cp * b4
    scratch_bytes = (H + 2) * (W + 2) * Cp * b4 + TH * W * 9 * Cp * b4
    est = 2 * (blk_in + blk_out + 2 * blk_w + 2 * blk_b) + scratch_bytes
    vmem_limit = min(max(2 * est + (2 << 20), 32 << 20), 64 << 20)

    flops = 2 * 2 * N * H * W * 9 * Cp * Cp
    bytes_accessed = (N * (H + 2) * (W + 2) * Cp + N * H * W * Cp
                      + 2 * 9 * Cp * Cp + 2 * Cp) * b4

    out = pl.pallas_call(
        kernel,
        out_shape=jax.ShapeDtypeStruct((N, H, W, Cp), jnp.float32),
        grid_spec=pltpu.PrefetchScalarGridSpec(
            num_scalar_prefetch=0,
            grid=(N,),
            in_specs=[
                pl.BlockSpec((1, H + 2, W + 2, Cp), lambda n: (n, 0, 0, 0)),
                pl.BlockSpec((9 * Cp, Cp), lambda n: (0, 0)),
                pl.BlockSpec((1, Cp), lambda n: (0, 0)),
                pl.BlockSpec((9 * Cp, Cp), lambda n: (0, 0)),
                pl.BlockSpec((1, Cp), lambda n: (0, 0)),
            ],
            out_specs=pl.BlockSpec((1, H, W, Cp), lambda n: (n, 0, 0, 0)),
            scratch_shapes=[
                pltpu.VMEM((H + 2, W + 2, Cp), jnp.float32),   # padded mid act
                pltpu.VMEM((TH * W, 9 * Cp), jnp.float32),     # im2col slab
            ]),
        compiler_params=pltpu.CompilerParams(
            dimension_semantics=("parallel",),
            vmem_limit_bytes=vmem_limit),
        cost_estimate=pl.CostEstimate(flops=flops, transcendentals=0,
                                      bytes_accessed=bytes_accessed),
    )(xpad, w1_2d, b1, w2_2d, b2)

    return out[..., :C]


def resblock_forward(x_nchw, params, eps=1e-5):
    """NCHW public entry point matching PyTorch nn.Conv2d layout."""
    x = jnp.transpose(x_nchw, (0, 2, 3, 1))                   # NCHW -> NHWC
    out = resblock_forward_nhwc(x, params, eps)
    return jnp.transpose(out, (0, 3, 1, 2))                   # NHWC -> NCHW


def _reference_forward(x, params, eps=1e-5):
    """Pure-JAX reference (NCHW), mirrors the PyTorch module in eval mode."""
    def conv(x, w):
        return jax.lax.conv_general_dilated(
            x, w, window_strides=(1, 1), padding=((1, 1), (1, 1)),
            dimension_numbers=("NCHW", "OIHW", "NCHW"))

    def bn(x, g, b, m, v):
        g = g.reshape(1, -1, 1, 1); b = b.reshape(1, -1, 1, 1)
        m = m.reshape(1, -1, 1, 1); v = v.reshape(1, -1, 1, 1)
        return (x - m) / jnp.sqrt(v + eps) * g + b

    h = conv(x, params["w1"])
    h = jax.nn.relu(bn(h, params["gamma1"], params["beta1"],
                       params["mean1"], params["var1"]))
    h = conv(h, params["w2"])
    h = bn(h, params["gamma2"], params["beta2"], params["mean2"], params["var2"])
    return jax.nn.relu(h + x)


def make_params(channel_num, key):
    ks = jax.random.split(key, 6)
    std = (2.0 / (9 * channel_num)) ** 0.5                    # kaiming-ish
    c = channel_num
    return {
        "w1": std * jax.random.normal(ks[0], (c, c, 3, 3), jnp.float32),
        "w2": std * jax.random.normal(ks[1], (c, c, 3, 3), jnp.float32),
        "gamma1": 1.0 + 0.1 * jax.random.normal(ks[2], (c,), jnp.float32),
        "beta1": 0.05 * jax.random.normal(ks[3], (c,), jnp.float32),
        "mean1": 0.1 * jnp.arange(c, dtype=jnp.float32),
        "var1": 1.0 + 0.05 * jnp.arange(c, dtype=jnp.float32),
        "gamma2": 1.0 + 0.1 * jax.random.normal(ks[4], (c,), jnp.float32),
        "beta2": 0.05 * jax.random.normal(ks[5], (c,), jnp.float32),
        "mean2": -0.1 * jnp.arange(c, dtype=jnp.float32),
        "var2": 1.0 + 0.03 * jnp.arange(c, dtype=jnp.float32),
    }


if __name__ == "__main__":
    key = jax.random.PRNGKey(0)
    k_x, k_p = jax.random.split(key)

    N, C, H, W = 2, 4, 16, 16
    x = jax.random.normal(k_x, (N, C, H, W), jnp.float32)
    params = make_params(C, k_p)

    out = resblock_forward(x, params)
    out = jax.block_until_ready(out)

    ref = _reference_forward(x, params)
    assert out.shape == (N, C, H, W), out.shape
    assert jnp.allclose(out, ref, atol=5e-2, rtol=5e-2), (
        float(jnp.max(jnp.abs(out - ref))))

    print("KERNEL_OK")
</pallas_src>

<mosaic_0001>
module attributes {stable_mosaic.version = 11 : i64} {
  func.func @kernel(%arg0: i32, %arg1: memref<1x18x18x128xf32, #tpu.memory_space<vmem>>, %arg2: memref<1152x128xf32, #tpu.memory_space<vmem>>, %arg3: memref<1x128xf32, #tpu.memory_space<vmem>>, %arg4: memref<1152x128xf32, #tpu.memory_space<vmem>>, %arg5: memref<1x128xf32, #tpu.memory_space<vmem>>, %arg6: memref<1x16x16x128xf32, #tpu.memory_space<vmem>>, %arg7: memref<18x18x128xf32, #tpu.memory_space<vmem>>, %arg8: memref<128x1152xf32, #tpu.memory_space<vmem>>) attributes {dimension_semantics = [#tpu.dimension_semantics<parallel>], iteration_bounds = array<i64: 2>, scalar_prefetch = 0 : i64, scratch_operands = 2 : i64, tpu.core_type = #tpu.core_type<tc>, window_params = [{transform_indices = @transform_0, window_bounds = array<i64: 1, 18, 18, 128>}, {pipeline_mode = #tpu.pipeline_mode<synchronous>, transform_indices = @transform_1, window_bounds = array<i64: 1152, 128>}, {pipeline_mode = #tpu.pipeline_mode<synchronous>, transform_indices = @transform_2, window_bounds = array<i64: 1, 128>}, {pipeline_mode = #tpu.pipeline_mode<synchronous>, transform_indices = @transform_3, window_bounds = array<i64: 1152, 128>}, {pipeline_mode = #tpu.pipeline_mode<synchronous>, transform_indices = @transform_4, window_bounds = array<i64: 1, 128>}, {transform_indices = @transform_5, window_bounds = array<i64: 1, 16, 16, 128>}]} {
    %cst = arith.constant 0.000000e+00 : f32
    %0 = vector.broadcast %cst : f32 to vector<1x18x128xf32>
    %cst_0 = arith.constant 0.000000e+00 : f32
    %1 = vector.broadcast %cst_0 : f32 to vector<18x1x128xf32>
    %c0 = arith.constant 0 : index
    %c0_1 = arith.constant 0 : index
    %c0_2 = arith.constant 0 : index
    %2 = vector.load %arg7[%c0, %c0_1, %c0_2] : memref<18x18x128xf32, #tpu.memory_space<vmem>>, vector<1x18x128xf32>
    tpu.vector_store %arg7[%c0, %c0_1, %c0_2], %0 {strides = array<i32>} : memref<18x18x128xf32, #tpu.memory_space<vmem>>, vector<1x18x128xf32>,
    %c17 = arith.constant 17 : index
    %c0_3 = arith.constant 0 : index
    %c0_4 = arith.constant 0 : index
    %3 = vector.load %arg7[%c17, %c0_3, %c0_4] : memref<18x18x128xf32, #tpu.memory_space<vmem>>, vector<1x18x128xf32>
    tpu.vector_store %arg7[%c17, %c0_3, %c0_4], %0 {strides = array<i32>} : memref<18x18x128xf32, #tpu.memory_space<vmem>>, vector<1x18x128xf32>,
    %c0_5 = arith.constant 0 : index
    %c0_6 = arith.constant 0 : index
    %c0_7 = arith.constant 0 : index
    %4 = vector.load %arg7[%c0_5, %c0_6, %c0_7] : memref<18x18x128xf32, #tpu.memory_space<vmem>>, vector<18x1x128xf32>
    tpu.vector_store %arg7[%c0_5, %c0_6, %c0_7], %1 {strides = array<i32>} : memref<18x18x128xf32, #tpu.memory_space<vmem>>, vector<18x1x128xf32>,
    %c0_8 = arith.constant 0 : index
    %c17_9 = arith.constant 17 : index
    %c0_10 = arith.constant 0 : index
    %5 = vector.load %arg7[%c0_8, %c17_9, %c0_10] : memref<18x18x128xf32, #tpu.memory_space<vmem>>, vector<18x1x128xf32>
    tpu.vector_store %arg7[%c0_8, %c17_9, %c0_10], %1 {strides = array<i32>} : memref<18x18x128xf32, #tpu.memory_space<vmem>>, vector<18x1x128xf32>,
    %c0_11 = arith.constant 0 : index
    %c0_12 = arith.constant 0 : index
    %c0_13 = arith.constant 0 : index
    %c0_14 = arith.constant 0 : index
    %6 = vector.load %arg1[%c0_11, %c0_12, %c0_13, %c0_14] : memref<1x18x18x128xf32, #tpu.memory_space<vmem>>, vector<1x8x16x128xf32>
    %7 = vector.shape_cast %6 : vector<1x8x16x128xf32> to vector<8x16x128xf32>
    %8 = vector.shape_cast %7 : vector<8x16x128xf32> to vector<128x128xf32>
    %c0_15 = arith.constant 0 : index
    %c0_16 = arith.constant 0 : index
    %9 = vector.load %arg8[%c0_15, %c0_16] : memref<128x1152xf32, #tpu.memory_space<vmem>>, vector<128x128xf32>
    tpu.vector_store %arg8[%c0_15, %c0_16], %8 {strides = array<i32>} : memref<128x1152xf32, #tpu.memory_space<vmem>>, vector<128x128xf32>,
    %c0_17 = arith.constant 0 : index
    %c0_18 = arith.constant 0 : index
    %c1 = arith.constant 1 : index
    %c0_19 = arith.constant 0 : index
    %10 = vector.load %arg1[%c0_17, %c0_18, %c1, %c0_19] : memref<1x18x18x128xf32, #tpu.memory_space<vmem>>, vector<1x8x16x128xf32>
    %11 = vector.shape_cast %10 : vector<1x8x16x128xf32> to vector<8x16x128xf32>
    %12 = vector.shape_cast %11 : vector<8x16x128xf32> to vector<128x128xf32>
    %c0_20 = arith.constant 0 : index
    %c128 = arith.constant 128 : index
    %13 = vector.load %arg8[%c0_20, %c128] : memref<128x1152xf32, #tpu.memory_space<vmem>>, vector<128x128xf32>
    tpu.vector_store %arg8[%c0_20, %c128], %12 {strides = array<i32>} : memref<128x1152xf32, #tpu.memory_space<vmem>>, vector<128x128xf32>,
    %c0_21 = arith.constant 0 : index
    %c0_22 = arith.constant 0 : index
    %c2 = arith.constant 2 : index
    %c0_23 = arith.constant 0 : index
    %14 = vector.load %arg1[%c0_21, %c0_22, %c2, %c0_23] : memref<1x18x18x128xf32, #tpu.memory_space<vmem>>, vector<1x8x16x128xf32>
    %15 = vector.shape_cast %14 : vector<1x8x16x128xf32> to vector<8x16x128xf32>
    %16 = vector.shape_cast %15 : vector<8x16x128xf32> to vector<128x128xf32>
    %c0_24 = arith.constant 0 : index
    %c256 = arith.constant 256 : index
    %17 = vector.load %arg8[%c0_24, %c256] : memref<128x1152xf32, #tpu.memory_space<vmem>>, vector<128x128xf32>
    tpu.vector_store %arg8[%c0_24, %c256], %16 {strides = array<i32>} : memref<128x1152xf32, #tpu.memory_space<vmem>>, vector<128x128xf32>,
    %c0_25 = arith.constant 0 : index
    %c1_26 = arith.constant 1 : index
    %c0_27 = arith.constant 0 : index
    %c0_28 = arith.constant 0 : index
    %18 = vector.load %arg1[%c0_25, %c1_26, %c0_27, %c0_28] : memref<1x18x18x128xf32, #tpu.memory_space<vmem>>, vector<1x8x16x128xf32>
    %19 = vector.shape_cast %18 : vector<1x8x16x128xf32> to vector<8x16x128xf32>
    %20 = vector.shape_cast %19 : vector<8x16x128xf32> to vector<128x128xf32>
    %c0_29 = arith.constant 0 : index
    %c384 = arith.constant 384 : index
    %21 = vector.load %arg8[%c0_29, %c384] : memref<128x1152xf32, #tpu.memory_space<vmem>>, vector<128x128xf32>
    tpu.vector_store %arg8[%c0_29, %c384], %20 {strides = array<i32>} : memref<128x1152xf32, #tpu.memory_space<vmem>>, vector<128x128xf32>,
    %c0_30 = arith.constant 0 : index
    %c1_31 = arith.constant 1 : index
    %c1_32 = arith.constant 1 : index
    %c0_33 = arith.constant 0 : index
    %22 = vector.load %arg1[%c0_30, %c1_31, %c1_32, %c0_33] : memref<1x18x18x128xf32, #tpu.memory_space<vmem>>, vector<1x8x16x128xf32>
    %23 = vector.shape_cast %22 : vector<1x8x16x128xf32> to vector<8x16x128xf32>
    %24 = vector.shape_cast %23 : vector<8x16x128xf32> to vector<128x128xf32>
    %c0_34 = arith.constant 0 : index
    %c512 = arith.constant 512 : index
    %25 = vector.load %arg8[%c0_34, %c512] : memref<128x1152xf32, #tpu.memory_space<vmem>>, vector<128x128xf32>
    tpu.vector_store %arg8[%c0_34, %c512], %24 {strides = array<i32>} : memref<128x1152xf32, #tpu.memory_space<vmem>>, vector<128x128xf32>,
    %c0_35 = arith.constant 0 : index
    %c1_36 = arith.constant 1 : index
    %c2_37 = arith.constant 2 : index
    %c0_38 = arith.constant 0 : index
    %26 = vector.load %arg1[%c0_35, %c1_36, %c2_37, %c0_38] : memref<1x18x18x128xf32, #tpu.memory_space<vmem>>, vector<1x8x16x128xf32>
    %27 = vector.shape_cast %26 : vector<1x8x16x128xf32> to vector<8x16x128xf32>
    %28 = vector.shape_cast %27 : vector<8x16x128xf32> to vector<128x128xf32>
    %c0_39 = arith.constant 0 : index
    %c640 = arith.constant 640 : index
    %29 = vector.load %arg8[%c0_39, %c640] : memref<128x1152xf32, #tpu.memory_space<vmem>>, vector<128x128xf32>
    tpu.vector_store %arg8[%c0_39, %c640], %28 {strides = array<i32>} : memref<128x1152xf32, #tpu.memory_space<vmem>>, vector<128x128xf32>,
    %c0_40 = arith.constant 0 : index
    %c2_41 = arith.constant 2 : index
    %c0_42 = arith.constant 0 : index
    %c0_43 = arith.constant 0 : index
    %30 = vector.load %arg1[%c0_40, %c2_41, %c0_42, %c0_43] : memref<1x18x18x128xf32, #tpu.memory_space<vmem>>, vector<1x8x16x128xf32>
    %31 = vector.shape_cast %30 : vector<1x8x16x128xf32> to vector<8x16x128xf32>
    %32 = vector.shape_cast %31 : vector<8x16x128xf32> to vector<128x128xf32>
    %c0_44 = arith.constant 0 : index
    %c768 = arith.constant 768 : index
    %33 = vector.load %arg8[%c0_44, %c768] : memref<128x1152xf32, #tpu.memory_space<vmem>>, vector<128x128xf32>
    tpu.vector_store %arg8[%c0_44, %c768], %32 {strides = array<i32>} : memref<128x1152xf32, #tpu.memory_space<vmem>>, vector<128x128xf32>,
    %c0_45 = arith.constant 0 : index
    %c2_46 = arith.constant 2 : index
    %c1_47 = arith.constant 1 : index
    %c0_48 = arith.constant 0 : index
    %34 = vector.load %arg1[%c0_45, %c2_46, %c1_47, %c0_48] : memref<1x18x18x128xf32, #tpu.memory_space<vmem>>, vector<1x8x16x128xf32>
    %35 = vector.shape_cast %34 : vector<1x8x16x128xf32> to vector<8x16x128xf32>
    %36 = vector.shape_cast %35 : vector<8x16x128xf32> to vector<128x128xf32>
    %c0_49 = arith.constant 0 : index
    %c896 = arith.constant 896 : index
    %37 = vector.load %arg8[%c0_49, %c896] : memref<128x1152xf32, #tpu.memory_space<vmem>>, vector<128x128xf32>
    tpu.vector_store %arg8[%c0_49, %c896], %36 {strides = array<i32>} : memref<128x1152xf32, #tpu.memory_space<vmem>>, vector<128x128xf32>,
    %c0_50 = arith.constant 0 : index
    %c2_51 = arith.constant 2 : index
    %c2_52 = arith.constant 2 : index
    %c0_53 = arith.constant 0 : index
    %38 = vector.load %arg1[%c0_50, %c2_51, %c2_52, %c0_53] : memref<1x18x18x128xf32, #tpu.memory_space<vmem>>, vector<1x8x16x128xf32>
    %39 = vector.shape_cast %38 : vector<1x8x16x128xf32> to vector<8x16x128xf32>
    %40 = vector.shape_cast %39 : vector<8x16x128xf32> to vector<128x128xf32>
    %c0_54 = arith.constant 0 : index
    %c1024 = arith.constant 1024 : index
    %41 = vector.load %arg8[%c0_54, %c1024] : memref<128x1152xf32, #tpu.memory_space<vmem>>, vector<128x128xf32>
    tpu.vector_store %arg8[%c0_54, %c1024], %40 {strides = array<i32>} : memref<128x1152xf32, #tpu.memory_space<vmem>>, vector<128x128xf32>,
    %c0_55 = arith.constant 0 : index
    %c0_56 = arith.constant 0 : index
    %42 = vector.load %arg8[%c0_55, %c0_56] : memref<128x1152xf32, #tpu.memory_space<vmem>>, vector<128x1152xf32>
    %c0_57 = arith.constant 0 : index
    %c0_58 = arith.constant 0 : index
    %43 = vector.load %arg2[%c0_57, %c0_58] : memref<1152x128xf32, #tpu.memory_space<vmem>>, vector<1152x128xf32>
    %cst_59 = arith.constant dense<0.000000e+00> : vector<128x128xf32>
    %44 = tpu.matmul %42, %43, %cst_59 {dimension_numbers = #tpu.dot_dimension_numbers<[1], [0], [0], [1], [0, 0, 1, 1], [], []>} : vector<128x1152xf32>, vector<1152x128xf32>, vector<128x128xf32> -> vector<128x128xf32>
    %c0_60 = arith.constant 0 : index
    %c0_61 = arith.constant 0 : index
    %45 = vector.load %arg3[%c0_60, %c0_61] : memref<1x128xf32, #tpu.memory_space<vmem>>, vector<1x128xf32>
    %46 = vector.broadcast %45 : vector<1x128xf32> to vector<128x128xf32>
    %47 = arith.addf %44, %46 : vector<128x128xf32>
    %cst_62 = arith.constant 0.000000e+00 : f32
    %48 = vector.broadcast %cst_62 : f32 to vector<128x128xf32>
    %49 = arith.maximumf %47, %48 : vector<128x128xf32>
    %50 = vector.shape_cast %49 : vector<128x128xf32> to vector<8x16x128xf32>
    %c1_63 = arith.constant 1 : index
    %c1_64 = arith.constant 1 : index
    %c0_65 = arith.constant 0 : index
    %51 = vector.load %arg7[%c1_63, %c1_64, %c0_65] : memref<18x18x128xf32, #tpu.memory_space<vmem>>, vector<8x16x128xf32>
    tpu.vector_store %arg7[%c1_63, %c1_64, %c0_65], %50 {strides = array<i32>} : memref<18x18x128xf32, #tpu.memory_space<vmem>>, vector<8x16x128xf32>,
    %c0_66 = arith.constant 0 : index
    %c8 = arith.constant 8 : index
    %c0_67 = arith.constant 0 : index
    %c0_68 = arith.constant 0 : index
    %52 = vector.load %arg1[%c0_66, %c8, %c0_67, %c0_68] : memref<1x18x18x128xf32, #tpu.memory_space<vmem>>, vector<1x8x16x128xf32>
    %53 = vector.shape_cast %52 : vector<1x8x16x128xf32> to vector<8x16x128xf32>
    %54 = vector.shape_cast %53 : vector<8x16x128xf32> to vector<128x128xf32>
    %c0_69 = arith.constant 0 : index
    %c0_70 = arith.constant 0 : index
    %55 = vector.load %arg8[%c0_69, %c0_70] : memref<128x1152xf32, #tpu.memory_space<vmem>>, vector<128x128xf32>
    tpu.vector_store %arg8[%c0_69, %c0_70], %54 {strides = array<i32>} : memref<128x1152xf32, #tpu.memory_space<vmem>>, vector<128x128xf32>,
    %c0_71 = arith.constant 0 : index
    %c8_72 = arith.constant 8 : index
    %c1_73 = arith.constant 1 : index
    %c0_74 = arith.constant 0 : index
    %56 = vector.load %arg1[%c0_71, %c8_72, %c1_73, %c0_74] : memref<1x18x18x128xf32, #tpu.memory_space<vmem>>, vector<1x8x16x128xf32>
    %57 = vector.shape_cast %56 : vector<1x8x16x128xf32> to vector<8x16x128xf32>
    %58 = vector.shape_cast %57 : vector<8x16x128xf32> to vector<128x128xf32>
    %c0_75 = arith.constant 0 : index
    %c128_76 = arith.constant 128 : index
    %59 = vector.load %arg8[%c0_75, %c128_76] : memref<128x1152xf32, #tpu.memory_space<vmem>>, vector<128x128xf32>
    tpu.vector_store %arg8[%c0_75, %c128_76], %58 {strides = array<i32>} : memref<128x1152xf32, #tpu.memory_space<vmem>>, vector<128x128xf32>,
    %c0_77 = arith.constant 0 : index
    %c8_78 = arith.constant 8 : index
    %c2_79 = arith.constant 2 : index
    %c0_80 = arith.constant 0 : index
    %60 = vector.load %arg1[%c0_77, %c8_78, %c2_79, %c0_80] : memref<1x18x18x128xf32, #tpu.memory_space<vmem>>, vector<1x8x16x128xf32>
    %61 = vector.shape_cast %60 : vector<1x8x16x128xf32> to vector<8x16x128xf32>
    %62 = vector.shape_cast %61 : vector<8x16x128xf32> to vector<128x128xf32>
    %c0_81 = arith.constant 0 : index
    %c256_82 = arith.constant 256 : index
    %63 = vector.load %arg8[%c0_81, %c256_82] : memref<128x1152xf32, #tpu.memory_space<vmem>>, vector<128x128xf32>
    tpu.vector_store %arg8[%c0_81, %c256_82], %62 {strides = array<i32>} : memref<128x1152xf32, #tpu.memory_space<vmem>>, vector<128x128xf32>,
    %c0_83 = arith.constant 0 : index
    %c9 = arith.constant 9 : index
    %c0_84 = arith.constant 0 : index
    %c0_85 = arith.constant 0 : index
    %64 = vector.load %arg1[%c0_83, %c9, %c0_84, %c0_85] : memref<1x18x18x128xf32, #tpu.memory_space<vmem>>, vector<1x8x16x128xf32>
    %65 = vector.shape_cast %64 : vector<1x8x16x128xf32> to vector<8x16x128xf32>
    %66 = vector.shape_cast %65 : vector<8x16x128xf32> to vector<128x128xf32>
    %c0_86 = arith.constant 0 : index
    %c384_87 = arith.constant 384 : index
    %67 = vector.load %arg8[%c0_86, %c384_87] : memref<128x1152xf32, #tpu.memory_space<vmem>>, vector<128x128xf32>
    tpu.vector_store %arg8[%c0_86, %c384_87], %66 {strides = array<i32>} : memref<128x1152xf32, #tpu.memory_space<vmem>>, vector<128x128xf32>,
    %c0_88 = arith.constant 0 : index
    %c9_89 = arith.constant 9 : index
    %c1_90 = arith.constant 1 : index
    %c0_91 = arith.constant 0 : index
    %68 = vector.load %arg1[%c0_88, %c9_89, %c1_90, %c0_91] : memref<1x18x18x128xf32, #tpu.memory_space<vmem>>, vector<1x8x16x128xf32>
    %69 = vector.shape_cast %68 : vector<1x8x16x128xf32> to vector<8x16x128xf32>
    %70 = vector.shape_cast %69 : vector<8x16x128xf32> to vector<128x128xf32>
    %c0_92 = arith.constant 0 : index
    %c512_93 = arith.constant 512 : index
    %71 = vector.load %arg8[%c0_92, %c512_93] : memref<128x1152xf32, #tpu.memory_space<vmem>>, vector<128x128xf32>
    tpu.vector_store %arg8[%c0_92, %c512_93], %70 {strides = array<i32>} : memref<128x1152xf32, #tpu.memory_space<vmem>>, vector<128x128xf32>,
    %c0_94 = arith.constant 0 : index
    %c9_95 = arith.constant 9 : index
    %c2_96 = arith.constant 2 : index
    %c0_97 = arith.constant 0 : index
    %72 = vector.load %arg1[%c0_94, %c9_95, %c2_96, %c0_97] : memref<1x18x18x128xf32, #tpu.memory_space<vmem>>, vector<1x8x16x128xf32>
    %73 = vector.shape_cast %72 : vector<1x8x16x128xf32> to vector<8x16x128xf32>
    %74 = vector.shape_cast %73 : vector<8x16x128xf32> to vector<128x128xf32>
    %c0_98 = arith.constant 0 : index
    %c640_99 = arith.constant 640 : index
    %75 = vector.load %arg8[%c0_98, %c640_99] : memref<128x1152xf32, #tpu.memory_space<vmem>>, vector<128x128xf32>
    tpu.vector_store %arg8[%c0_98, %c640_99], %74 {strides = array<i32>} : memref<128x1152xf32, #tpu.memory_space<vmem>>, vector<128x128xf32>,
    %c0_100 = arith.constant 0 : index
    %c10 = arith.constant 10 : index
    %c0_101 = arith.constant 0 : index
    %c0_102 = arith.constant 0 : index
    %76 = vector.load %arg1[%c0_100, %c10, %c0_101, %c0_102] : memref<1x18x18x128xf32, #tpu.memory_space<vmem>>, vector<1x8x16x128xf32>
    %77 = vector.shape_cast %76 : vector<1x8x16x128xf32> to vector<8x16x128xf32>
    %78 = vector.shape_cast %77 : vector<8x16x128xf32> to vector<128x128xf32>
    %c0_103 = arith.constant 0 : index
    %c768_104 = arith.constant 768 : index
    %79 = vector.load %arg8[%c0_103, %c768_104] : memref<128x1152xf32, #tpu.memory_space<vmem>>, vector<128x128xf32>
    tpu.vector_store %arg8[%c0_103, %c768_104], %78 {strides = array<i32>} : memref<128x1152xf32, #tpu.memory_space<vmem>>, vector<128x128xf32>,
    %c0_105 = arith.constant 0 : index
    %c10_106 = arith.constant 10 : index
    %c1_107 = arith.constant 1 : index
    %c0_108 = arith.constant 0 : index
    %80 = vector.load %arg1[%c0_105, %c10_106, %c1_107, %c0_108] : memref<1x18x18x128xf32, #tpu.memory_space<vmem>>, vector<1x8x16x128xf32>
    %81 = vector.shape_cast %80 : vector<1x8x16x128xf32> to vector<8x16x128xf32>
    %82 = vector.shape_cast %81 : vector<8x16x128xf32> to vector<128x128xf32>
    %c0_109 = arith.constant 0 : index
    %c896_110 = arith.constant 896 : index
    %83 = vector.load %arg8[%c0_109, %c896_110] : memref<128x1152xf32, #tpu.memory_space<vmem>>, vector<128x128xf32>
    tpu.vector_store %arg8[%c0_109, %c896_110], %82 {strides = array<i32>} : memref<128x1152xf32, #tpu.memory_space<vmem>>, vector<128x128xf32>,
    %c0_111 = arith.constant 0 : index
    %c10_112 = arith.constant 10 : index
    %c2_113 = arith.constant 2 : index
    %c0_114 = arith.constant 0 : index
    %84 = vector.load %arg1[%c0_111, %c10_112, %c2_113, %c0_114] : memref<1x18x18x128xf32, #tpu.memory_space<vmem>>, vector<1x8x16x128xf32>
    %85 = vector.shape_cast %84 : vector<1x8x16x128xf32> to vector<8x16x128xf32>
    %86 = vector.shape_cast %85 : vector<8x16x128xf32> to vector<128x128xf32>
    %c0_115 = arith.constant 0 : index
    %c1024_116 = arith.constant 1024 : index
    %87 = vector.load %arg8[%c0_115, %c1024_116] : memref<128x1152xf32, #tpu.memory_space<vmem>>, vector<128x128xf32>
    tpu.vector_store %arg8[%c0_115, %c1024_116], %86 {strides = array<i32>} : memref<128x1152xf32, #tpu.memory_space<vmem>>, vector<128x128xf32>,
    %c0_117 = arith.constant 0 : index
    %c0_118 = arith.constant 0 : index
    %88 = vector.load %arg8[%c0_117, %c0_118] : memref<128x1152xf32, #tpu.memory_space<vmem>>, vector<128x1152xf32>
    %c0_119 = arith.constant 0 : index
    %c0_120 = arith.constant 0 : index
    %89 = vector.load %arg2[%c0_119, %c0_120] : memref<1152x128xf32, #tpu.memory_space<vmem>>, vector<1152x128xf32>
    %cst_121 = arith.constant dense<0.000000e+00> : vector<128x128xf32>
    %90 = tpu.matmul %88, %89, %cst_121 {dimension_numbers = #tpu.dot_dimension_numbers<[1], [0], [0], [1], [0, 0, 1, 1], [], []>} : vector<128x1152xf32>, vector<1152x128xf32>, vector<128x128xf32> -> vector<128x128xf32>
    %c0_122 = arith.constant 0 : index
    %c0_123 = arith.constant 0 : index
    %91 = vector.load %arg3[%c0_122, %c0_123] : memref<1x128xf32, #tpu.memory_space<vmem>>, vector<1x128xf32>
    %92 = vector.broadcast %91 : vector<1x128xf32> to vector<128x128xf32>
    %93 = arith.addf %90, %92 : vector<128x128xf32>
    %cst_124 = arith.constant 0.000000e+00 : f32
    %94 = vector.broadcast %cst_124 : f32 to vector<128x128xf32>
    %95 = arith.maximumf %93, %94 : vector<128x128xf32>
    %96 = vector.shape_cast %95 : vector<128x128xf32> to vector<8x16x128xf32>
    %c9_125 = arith.constant 9 : index
    %c1_126 = arith.constant 1 : index
    %c0_127 = arith.constant 0 : index
    %97 = vector.load %arg7[%c9_125, %c1_126, %c0_127] : memref<18x18x128xf32, #tpu.memory_space<vmem>>, vector<8x16x128xf32>
    tpu.vector_store %arg7[%c9_125, %c1_126, %c0_127], %96 {strides = array<i32>} : memref<18x18x128xf32, #tpu.memory_space<vmem>>, vector<8x16x128xf32>,
    %c0_128 = arith.constant 0 : index
    %c0_129 = arith.constant 0 : index
    %c0_130 = arith.constant 0 : index
    %98 = vector.load %arg7[%c0_128, %c0_129, %c0_130] : memref<18x18x128xf32, #tpu.memory_space<vmem>>, vector<8x16x128xf32>
    %99 = vector.shape_cast %98 : vector<8x16x128xf32> to vector<128x128xf32>
    %c0_131 = arith.constant 0 : index
    %c0_132 = arith.constant 0 : index
    %100 = vector.load %arg8[%c0_131, %c0_132] : memref<128x1152xf32, #tpu.memory_space<vmem>>, vector<128x128xf32>
    tpu.vector_store %arg8[%c0_131, %c0_132], %99 {strides = array<i32>} : memref<128x1152xf32, #tpu.memory_space<vmem>>, vector<128x128xf32>,
    %c0_133 = arith.constant 0 : index
    %c1_134 = arith.constant 1 : index
    %c0_135 = arith.constant 0 : index
    %101 = vector.load %arg7[%c0_133, %c1_134, %c0_135] : memref<18x18x128xf32, #tpu.memory_space<vmem>>, vector<8x16x128xf32>
    %102 = vector.shape_cast %101 : vector<8x16x128xf32> to vector<128x128xf32>
    %c0_136 = arith.constant 0 : index
    %c128_137 = arith.constant 128 : index
    %103 = vector.load %arg8[%c0_136, %c128_137] : memref<128x1152xf32, #tpu.memory_space<vmem>>, vector<128x128xf32>
    tpu.vector_store %arg8[%c0_136, %c128_137], %102 {strides = array<i32>} : memref<128x1152xf32, #tpu.memory_space<vmem>>, vector<128x128xf32>,
    %c0_138 = arith.constant 0 : index
    %c2_139 = arith.constant 2 : index
    %c0_140 = arith.constant 0 : index
    %104 = vector.load %arg7[%c0_138, %c2_139, %c0_140] : memref<18x18x128xf32, #tpu.memory_space<vmem>>, vector<8x16x128xf32>
    %105 = vector.shape_cast %104 : vector<8x16x128xf32> to vector<128x128xf32>
    %c0_141 = arith.constant 0 : index
    %c256_142 = arith.constant 256 : index
    %106 = vector.load %arg8[%c0_141, %c256_142] : memref<128x1152xf32, #tpu.memory_space<vmem>>, vector<128x128xf32>
    tpu.vector_store %arg8[%c0_141, %c256_142], %105 {strides = array<i32>} : memref<128x1152xf32, #tpu.memory_space<vmem>>, vector<128x128xf32>,
    %c1_143 = arith.constant 1 : index
    %c0_144 = arith.constant 0 : index
    %c0_145 = arith.constant 0 : index
    %107 = vector.load %arg7[%c1_143, %c0_144, %c0_145] : memref<18x18x128xf32, #tpu.memory_space<vmem>>, vector<8x16x128xf32>
    %108 = vector.shape_cast %107 : vector<8x16x128xf32> to vector<128x128xf32>
    %c0_146 = arith.constant 0 : index
    %c384_147 = arith.constant 384 : index
    %109 = vector.load %arg8[%c0_146, %c384_147] : memref<128x1152xf32, #tpu.memory_space<vmem>>, vector<128x128xf32>
    tpu.vector_store %arg8[%c0_146, %c384_147], %108 {strides = array<i32>} : memref<128x1152xf32, #tpu.memory_space<vmem>>, vector<128x128xf32>,
    %c1_148 = arith.constant 1 : index
    %c1_149 = arith.constant 1 : index
    %c0_150 = arith.constant 0 : index
    %110 = vector.load %arg7[%c1_148, %c1_149, %c0_150] : memref<18x18x128xf32, #tpu.memory_space<vmem>>, vector<8x16x128xf32>
    %111 = vector.shape_cast %110 : vector<8x16x128xf32> to vector<128x128xf32>
    %c0_151 = arith.constant 0 : index
    %c512_152 = arith.constant 512 : index
    %112 = vector.load %arg8[%c0_151, %c512_152] : memref<128x1152xf32, #tpu.memory_space<vmem>>, vector<128x128xf32>
    tpu.vector_store %arg8[%c0_151, %c512_152], %111 {strides = array<i32>} : memref<128x1152xf32, #tpu.memory_space<vmem>>, vector<128x128xf32>,
    %c1_153 = arith.constant 1 : index
    %c2_154 = arith.constant 2 : index
    %c0_155 = arith.constant 0 : index
    %113 = vector.load %arg7[%c1_153, %c2_154, %c0_155] : memref<18x18x128xf32, #tpu.memory_space<vmem>>, vector<8x16x128xf32>
    %114 = vector.shape_cast %113 : vector<8x16x128xf32> to vector<128x128xf32>
    %c0_156 = arith.constant 0 : index
    %c640_157 = arith.constant 640 : index
    %115 = vector.load %arg8[%c0_156, %c640_157] : memref<128x1152xf32, #tpu.memory_space<vmem>>, vector<128x128xf32>
    tpu.vector_store %arg8[%c0_156, %c640_157], %114 {strides = array<i32>} : memref<128x1152xf32, #tpu.memory_space<vmem>>, vector<128x128xf32>,
    %c2_158 = arith.constant 2 : index
    %c0_159 = arith.constant 0 : index
    %c0_160 = arith.constant 0 : index
    %116 = vector.load %arg7[%c2_158, %c0_159, %c0_160] : memref<18x18x128xf32, #tpu.memory_space<vmem>>, vector<8x16x128xf32>
    %117 = vector.shape_cast %116 : vector<8x16x128xf32> to vector<128x128xf32>
    %c0_161 = arith.constant 0 : index
    %c768_162 = arith.constant 768 : index
    %118 = vector.load %arg8[%c0_161, %c768_162] : memref<128x1152xf32, #tpu.memory_space<vmem>>, vector<128x128xf32>
    tpu.vector_store %arg8[%c0_161, %c768_162], %117 {strides = array<i32>} : memref<128x1152xf32, #tpu.memory_space<vmem>>, vector<128x128xf32>,
    %c2_163 = arith.constant 2 : index
    %c1_164 = arith.constant 1 : index
    %c0_165 = arith.constant 0 : index
    %119 = vector.load %arg7[%c2_163, %c1_164, %c0_165] : memref<18x18x128xf32, #tpu.memory_space<vmem>>, vector<8x16x128xf32>
    %120 = vector.shape_cast %119 : vector<8x16x128xf32> to vector<128x128xf32>
    %c0_166 = arith.constant 0 : index
    %c896_167 = arith.constant 896 : index
    %121 = vector.load %arg8[%c0_166, %c896_167] : memref<128x1152xf32, #tpu.memory_space<vmem>>, vector<128x128xf32>
    tpu.vector_store %arg8[%c0_166, %c896_167], %120 {strides = array<i32>} : memref<128x1152xf32, #tpu.memory_space<vmem>>, vector<128x128xf32>,
    %c2_168 = arith.constant 2 : index
    %c2_169 = arith.constant 2 : index
    %c0_170 = arith.constant 0 : index
    %122 = vector.load %arg7[%c2_168, %c2_169, %c0_170] : memref<18x18x128xf32, #tpu.memory_space<vmem>>, vector<8x16x128xf32>
    %123 = vector.shape_cast %122 : vector<8x16x128xf32> to vector<128x128xf32>
    %c0_171 = arith.constant 0 : index
    %c1024_172 = arith.constant 1024 : index
    %124 = vector.load %arg8[%c0_171, %c1024_172] : memref<128x1152xf32, #tpu.memory_space<vmem>>, vector<128x128xf32>
    tpu.vector_store %arg8[%c0_171, %c1024_172], %123 {strides = array<i32>} : memref<128x1152xf32, #tpu.memory_space<vmem>>, vector<128x128xf32>,
    %c0_173 = arith.constant 0 : index
    %c0_174 = arith.constant 0 : index
    %125 = vector.load %arg8[%c0_173, %c0_174] : memref<128x1152xf32, #tpu.memory_space<vmem>>, vector<128x1152xf32>
    %c0_175 = arith.constant 0 : index
    %c0_176 = arith.constant 0 : index
    %126 = vector.load %arg4[%c0_175, %c0_176] : memref<1152x128xf32, #tpu.memory_space<vmem>>, vector<1152x128xf32>
    %cst_177 = arith.constant dense<0.000000e+00> : vector<128x128xf32>
    %127 = tpu.matmul %125, %126, %cst_177 {dimension_numbers = #tpu.dot_dimension_numbers<[1], [0], [0], [1], [0, 0, 1, 1], [], []>} : vector<128x1152xf32>, vector<1152x128xf32>, vector<128x128xf32> -> vector<128x128xf32>
    %c0_178 = arith.constant 0 : index
    %c1_179 = arith.constant 1 : index
    %c1_180 = arith.constant 1 : index
    %c0_181 = arith.constant 0 : index
    %128 = vector.load %arg1[%c0_178, %c1_179, %c1_180, %c0_181] : memref<1x18x18x128xf32, #tpu.memory_space<vmem>>, vector<1x8x16x128xf32>
    %129 = vector.shape_cast %128 : vector<1x8x16x128xf32> to vector<8x16x128xf32>
    %130 = vector.shape_cast %129 : vector<8x16x128xf32> to vector<128x128xf32>
    %c0_182 = arith.constant 0 : index
    %c0_183 = arith.constant 0 : index
    %131 = vector.load %arg5[%c0_182, %c0_183] : memref<1x128xf32, #tpu.memory_space<vmem>>, vector<1x128xf32>
    %132 = vector.broadcast %131 : vector<1x128xf32> to vector<128x128xf32>
    %133 = arith.addf %127, %132 : vector<128x128xf32>
    %134 = arith.addf %133, %130 : vector<128x128xf32>
    %cst_184 = arith.constant 0.000000e+00 : f32
    %135 = vector.broadcast %cst_184 : f32 to vector<128x128xf32>
    %136 = arith.maximumf %134, %135 : vector<128x128xf32>
    %137 = vector.shape_cast %136 : vector<128x128xf32> to vector<8x16x128xf32>
    %c0_185 = arith.constant 0 : index
    %c0_186 = arith.constant 0 : index
    %c0_187 = arith.constant 0 : index
    %c0_188 = arith.constant 0 : index
    %138 = vector.load %arg6[%c0_185, %c0_186, %c0_187, %c0_188] : memref<1x16x16x128xf32, #tpu.memory_space<vmem>>, vector<1x8x16x128xf32>
    %139 = vector.shape_cast %138 : vector<1x8x16x128xf32> to vector<8x16x128xf32>
    %140 = vector.shape_cast %137 : vector<8x16x128xf32> to vector<1x8x16x128xf32>
    tpu.vector_store %arg6[%c0_185, %c0_186, %c0_187, %c0_188], %140 {strides = array<i32>} : memref<1x16x16x128xf32, #tpu.memory_space<vmem>>, vector<1x8x16x128xf32>,
    %c8_189 = arith.constant 8 : index
    %c0_190 = arith.constant 0 : index
    %c0_191 = arith.constant 0 : index
    %141 = vector.load %arg7[%c8_189, %c0_190, %c0_191] : memref<18x18x128xf32, #tpu.memory_space<vmem>>, vector<8x16x128xf32>
    %142 = vector.shape_cast %141 : vector<8x16x128xf32> to vector<128x128xf32>
    %c0_192 = arith.constant 0 : index
    %c0_193 = arith.constant 0 : index
    %143 = vector.load %arg8[%c0_192, %c0_193] : memref<128x1152xf32, #tpu.memory_space<vmem>>, vector<128x128xf32>
    tpu.vector_store %arg8[%c0_192, %c0_193], %142 {strides = array<i32>} : memref<128x1152xf32, #tpu.memory_space<vmem>>, vector<128x128xf32>,
    %c8_194 = arith.constant 8 : index
    %c1_195 = arith.constant 1 : index
    %c0_196 = arith.constant 0 : index
    %144 = vector.load %arg7[%c8_194, %c1_195, %c0_196] : memref<18x18x128xf32, #tpu.memory_space<vmem>>, vector<8x16x128xf32>
    %145 = vector.shape_cast %144 : vector<8x16x128xf32> to vector<128x128xf32>
    %c0_197 = arith.constant 0 : index
    %c128_198 = arith.constant 128 : index
    %146 = vector.load %arg8[%c0_197, %c128_198] : memref<128x1152xf32, #tpu.memory_space<vmem>>, vector<128x128xf32>
    tpu.vector_store %arg8[%c0_197, %c128_198], %145 {strides = array<i32>} : memref<128x1152xf32, #tpu.memory_space<vmem>>, vector<128x128xf32>,
    %c8_199 = arith.constant 8 : index
    %c2_200 = arith.constant 2 : index
    %c0_201 = arith.constant 0 : index
    %147 = vector.load %arg7[%c8_199, %c2_200, %c0_201] : memref<18x18x128xf32, #tpu.memory_space<vmem>>, vector<8x16x128xf32>
    %148 = vector.shape_cast %147 : vector<8x16x128xf32> to vector<128x128xf32>
    %c0_202 = arith.constant 0 : index
    %c256_203 = arith.constant 256 : index
    %149 = vector.load %arg8[%c0_202, %c256_203] : memref<128x1152xf32, #tpu.memory_space<vmem>>, vector<128x128xf32>
    tpu.vector_store %arg8[%c0_202, %c256_203], %148 {strides = array<i32>} : memref<128x1152xf32, #tpu.memory_space<vmem>>, vector<128x128xf32>,
    %c9_204 = arith.constant 9 : index
    %c0_205 = arith.constant 0 : index
    %c0_206 = arith.constant 0 : index
    %150 = vector.load %arg7[%c9_204, %c0_205, %c0_206] : memref<18x18x128xf32, #tpu.memory_space<vmem>>, vector<8x16x128xf32>
    %151 = vector.shape_cast %150 : vector<8x16x128xf32> to vector<128x128xf32>
    %c0_207 = arith.constant 0 : index
    %c384_208 = arith.constant 384 : index
    %152 = vector.load %arg8[%c0_207, %c384_208] : memref<128x1152xf32, #tpu.memory_space<vmem>>, vector<128x128xf32>
    tpu.vector_store %arg8[%c0_207, %c384_208], %151 {strides = array<i32>} : memref<128x1152xf32, #tpu.memory_space<vmem>>, vector<128x128xf32>,
    %c9_209 = arith.constant 9 : index
    %c1_210 = arith.constant 1 : index
    %c0_211 = arith.constant 0 : index
    %153 = vector.load %arg7[%c9_209, %c1_210, %c0_211] : memref<18x18x128xf32, #tpu.memory_space<vmem>>, vector<8x16x128xf32>
    %154 = vector.shape_cast %153 : vector<8x16x128xf32> to vector<128x128xf32>
    %c0_212 = arith.constant 0 : index
    %c512_213 = arith.constant 512 : index
    %155 = vector.load %arg8[%c0_212, %c512_213] : memref<128x1152xf32, #tpu.memory_space<vmem>>, vector<128x128xf32>
    tpu.vector_store %arg8[%c0_212, %c512_213], %154 {strides = array<i32>} : memref<128x1152xf32, #tpu.memory_space<vmem>>, vector<128x128xf32>,
    %c9_214 = arith.constant 9 : index
    %c2_215 = arith.constant 2 : index
    %c0_216 = arith.constant 0 : index
    %156 = vector.load %arg7[%c9_214, %c2_215, %c0_216] : memref<18x18x128xf32, #tpu.memory_space<vmem>>, vector<8x16x128xf32>
    %157 = vector.shape_cast %156 : vector<8x16x128xf32> to vector<128x128xf32>
    %c0_217 = arith.constant 0 : index
    %c640_218 = arith.constant 640 : index
    %158 = vector.load %arg8[%c0_217, %c640_218] : memref<128x1152xf32, #tpu.memory_space<vmem>>, vector<128x128xf32>
    tpu.vector_store %arg8[%c0_217, %c640_218], %157 {strides = array<i32>} : memref<128x1152xf32, #tpu.memory_space<vmem>>, vector<128x128xf32>,
    %c10_219 = arith.constant 10 : index
    %c0_220 = arith.constant 0 : index
    %c0_221 = arith.constant 0 : index
    %159 = vector.load %arg7[%c10_219, %c0_220, %c0_221] : memref<18x18x128xf32, #tpu.memory_space<vmem>>, vector<8x16x128xf32>
    %160 = vector.shape_cast %159 : vector<8x16x128xf32> to vector<128x128xf32>
    %c0_222 = arith.constant 0 : index
    %c768_223 = arith.constant 768 : index
    %161 = vector.load %arg8[%c0_222, %c768_223] : memref<128x1152xf32, #tpu.memory_space<vmem>>, vector<128x128xf32>
    tpu.vector_store %arg8[%c0_222, %c768_223], %160 {strides = array<i32>} : memref<128x1152xf32, #tpu.memory_space<vmem>>, vector<128x128xf32>,
    %c10_224 = arith.constant 10 : index
    %c1_225 = arith.constant 1 : index
    %c0_226 = arith.constant 0 : index
    %162 = vector.load %arg7[%c10_224, %c1_225, %c0_226] : memref<18x18x128xf32, #tpu.memory_space<vmem>>, vector<8x16x128xf32>
    %163 = vector.shape_cast %162 : vector<8x16x128xf32> to vector<128x128xf32>
    %c0_227 = arith.constant 0 : index
    %c896_228 = arith.constant 896 : index
    %164 = vector.load %arg8[%c0_227, %c896_228] : memref<128x1152xf32, #tpu.memory_space<vmem>>, vector<128x128xf32>
    tpu.vector_store %arg8[%c0_227, %c896_228], %163 {strides = array<i32>} : memref<128x1152xf32, #tpu.memory_space<vmem>>, vector<128x128xf32>,
    %c10_229 = arith.constant 10 : index
    %c2_230 = arith.constant 2 : index
    %c0_231 = arith.constant 0 : index
    %165 = vector.load %arg7[%c10_229, %c2_230, %c0_231] : memref<18x18x128xf32, #tpu.memory_space<vmem>>, vector<8x16x128xf32>
    %166 = vector.shape_cast %165 : vector<8x16x128xf32> to vector<128x128xf32>
    %c0_232 = arith.constant 0 : index
    %c1024_233 = arith.constant 1024 : index
    %167 = vector.load %arg8[%c0_232, %c1024_233] : memref<128x1152xf32, #tpu.memory_space<vmem>>, vector<128x128xf32>
    tpu.vector_store %arg8[%c0_232, %c1024_233], %166 {strides = array<i32>} : memref<128x1152xf32, #tpu.memory_space<vmem>>, vector<128x128xf32>,
    %c0_234 = arith.constant 0 : index
    %c0_235 = arith.constant 0 : index
    %168 = vector.load %arg8[%c0_234, %c0_235] : memref<128x1152xf32, #tpu.memory_space<vmem>>, vector<128x1152xf32>
    %c0_236 = arith.constant 0 : index
    %c0_237 = arith.constant 0 : index
    %169 = vector.load %arg4[%c0_236, %c0_237] : memref<1152x128xf32, #tpu.memory_space<vmem>>, vector<1152x128xf32>
    %cst_238 = arith.constant dense<0.000000e+00> : vector<128x128xf32>
    %170 = tpu.matmul %168, %169, %cst_238 {dimension_numbers = #tpu.dot_dimension_numbers<[1], [0], [0], [1], [0, 0, 1, 1], [], []>} : vector<128x1152xf32>, vector<1152x128xf32>, vector<128x128xf32> -> vector<128x128xf32>
    %c0_239 = arith.constant 0 : index
    %c9_240 = arith.constant 9 : index
    %c1_241 = arith.constant 1 : index
    %c0_242 = arith.constant 0 : index
    %171 = vector.load %arg1[%c0_239, %c9_240, %c1_241, %c0_242] : memref<1x18x18x128xf32, #tpu.memory_space<vmem>>, vector<1x8x16x128xf32>
    %172 = vector.shape_cast %171 : vector<1x8x16x128xf32> to vector<8x16x128xf32>
    %173 = vector.shape_cast %172 : vector<8x16x128xf32> to vector<128x128xf32>
    %c0_243 = arith.constant 0 : index
    %c0_244 = arith.constant 0 : index
    %174 = vector.load %arg5[%c0_243, %c0_244] : memref<1x128xf32, #tpu.memory_space<vmem>>, vector<1x128xf32>
    %175 = vector.broadcast %174 : vector<1x128xf32> to vector<128x128xf32>
    %176 = arith.addf %170, %175 : vector<128x128xf32>
    %177 = arith.addf %176, %173 : vector<128x128xf32>
    %cst_245 = arith.constant 0.000000e+00 : f32
    %178 = vector.broadcast %cst_245 : f32 to vector<128x128xf32>
    %179 = arith.maximumf %177, %178 : vector<128x128xf32>
    %180 = vector.shape_cast %179 : vector<128x128xf32> to vector<8x16x128xf32>
    %c0_246 = arith.constant 0 : index
    %c8_247 = arith.constant 8 : index
    %c0_248 = arith.constant 0 : index
    %c0_249 = arith.constant 0 : index
    %181 = vector.load %arg6[%c0_246, %c8_247, %c0_248, %c0_249] : memref<1x16x16x128xf32, #tpu.memory_space<vmem>>, vector<1x8x16x128xf32>
    %182 = vector.shape_cast %181 : vector<1x8x16x128xf32> to vector<8x16x128xf32>
    %183 = vector.shape_cast %180 : vector<8x16x128xf32> to vector<1x8x16x128xf32>
    tpu.vector_store %arg6[%c0_246, %c8_247, %c0_248, %c0_249], %183 {strides = array<i32>} : memref<1x16x16x128xf32, #tpu.memory_space<vmem>>, vector<1x8x16x128xf32>,
    return
  }
  func.func @transform_0(%arg0: i32) -> (i32, i32, i32, i32) {
    %c0_i32 = arith.constant 0 : i32
    %c0_i32_0 = arith.constant 0 : i32
    %c0_i32_1 = arith.constant 0 : i32
    %c0_i32_2 = arith.constant 0 : i32
    return %arg0, %c0_i32, %c0_i32_0, %c0_i32_1 : i32, i32, i32, i32
  }
  func.func @transform_1(%arg0: i32) -> (i32, i32) {
    %c0_i32 = arith.constant 0 : i32
    %c0_i32_0 = arith.constant 0 : i32
    %c0_i32_1 = arith.constant 0 : i32
    return %c0_i32, %c0_i32_0 : i32, i32
  }
  func.func @transform_2(%arg0: i32) -> (i32, i32) {
    %c0_i32 = arith.constant 0 : i32
    %c0_i32_0 = arith.constant 0 : i32
    %c0_i32_1 = arith.constant 0 : i32
    return %c0_i32, %c0_i32_0 : i32, i32
  }
  func.func @transform_3(%arg0: i32) -> (i32, i32) {
    %c0_i32 = arith.constant 0 : i32
    %c0_i32_0 = arith.constant 0 : i32
    %c0_i32_1 = arith.constant 0 : i32
    return %c0_i32, %c0_i32_0 : i32, i32
  }
  func.func @transform_4(%arg0: i32) -> (i32, i32) {
    %c0_i32 = arith.constant 0 : i32
    %c0_i32_0 = arith.constant 0 : i32
    %c0_i32_1 = arith.constant 0 : i32
    return %c0_i32, %c0_i32_0 : i32, i32
  }
  func.func @transform_5(%arg0: i32) -> (i32, i32, i32, i32) {
    %c0_i32 = arith.constant 0 : i32
    %c0_i32_0 = arith.constant 0 : i32
    %c0_i32_1 = arith.constant 0 : i32
    %c0_i32_2 = arith.constant 0 : i32
    return %arg0, %c0_i32, %c0_i32_0, %c0_i32_1 : i32, i32, i32, i32
  }
}

</mosaic_0001>

<bundles_post_ra>
// kernel: tpu_custom_call.1
= control target key start
LH: loop header
LB: loop body
LE: loop exit
PB: predicated region body
PF: predicated region fallthrough
CT: control target
= control target key end

     0   :  { %10 = vsyncpa [#allocation5], 0  ;;  %s8370_s0 = inlined_call_operand.vmem [shape: f32[2,18,18,128], index: 0, kind: input, shape index: {}]   ;;  %s8371_s1 = inlined_call_operand.vmem [shape: f32[1152,128], index: 1, kind: input, shape index: {}]   ;;  %s8372_s2 = inlined_call_operand.vmem [shape: f32[1,128], index: 2, kind: input, shape index: {}]   ;;  %s8373_s3 = inlined_call_operand.hbm [shape: f32[1152,128], index: 3, kind: input, shape index: {}]   ;;  %s8374_s4 = inlined_call_operand.vmem [shape: f32[1,128], index: 4, kind: input, shape index: {}]   ;;  %s8375_s5 = inlined_call_operand.hbm [shape: f32[2,16,16,128], index: 5, kind: output, shape index: {}]  }
   0x1   :  { %11 = vsyncpa [#allocation6], 0 }
   0x2   :  { %13 = vsyncpa [#allocation6 + $0x1], 0  ;;  %s5733_s18 = smov 0   ;;  %s5735_s19 = smov 0  }
   0x3   :  { %s5737_s20 = smov 0   ;;  %s5739_s21 = smov 0  }
   0x4 LB: > { %s5754_s22 = sadd.s32 4294967295, %s5695_s21   ;;  %s5236_s23 = sadd.s32 4294967294, %s5695_s21   ;;  %s5695_s21 = sphi %s5739_s21, %s8393_s21   ;;  %s5691_s20 = sphi %s5737_s20, %s8392_s20   ;;  %s5687_s19 = sphi %s5735_s19, %s8391_s19   ;;  %s5683_s18 = sphi %s5733_s18, %s8390_s18  }
   0x5   : > { %s5758_s24 = sadd.s32 1, %s5695_s21   ;;  %s136_s25 = sadd.s32 1, %s5691_s20 }
   0x6   : > { %s133_s26 = ssub.s32 %s5695_s21, %s5758_s24  ;;  %p146_p0 = scmp.ne.s32.totalorder %s5691_s20, %s5687_s19 }
   0x7   : > { %p134_p1 = scmp.eq.s32.totalorder %s133_s26, 0  ;;  %p147_p2 = scmp.eq.s32.totalorder %s5754_s22, 1 }
   0x8   : > { %p152_p3 = scmp.ne.s32.totalorder %s5687_s19, %s5683_s18  ;;  %p153_p4 = scmp.eq.s32.totalorder %s5236_s23, 1 }
   0x9   : > { %s5769_s27 = scalar_select %p134_p1, %s5691_s20, %s136_s25  }
   0xa   : > { %p5771_p5 = por %p147_p2, %p146_p0  ;;  %p5775_p6 = por %p153_p4, %p152_p3 }
   0xb   : > { %p5237_p7 = scmp.ge.s32.totalorder %s5695_s21, 1  ;;  %p160_p8 = scmp.lt.s32.totalorder %s5695_s21, 3 }
   0xc   : > { %p5553_p9 = scmp.eq.s32.totalorder %s5754_s22, 0  ;;  %s177_s7 = sshll.u32 %s8373_s3, 4  ;;  %s178_s7 = int_to_ptr.hbm [resolvable:$true] %s177_s7 }
   0xd   : > { %p161_p10 = pnand %p5237_p7, %p160_p8  ;;  %s5697_s8 = smov [#allocation4]  }
   0xe   : > { %s179_s9 = sshll.u32 %s5697_s8, 4  ;;  %s5698_s10 = smov 128   ;;  %s180_s9 = int_to_ptr.vmem [resolvable:$true] %s179_s9 }
   0xf   : > { %p5545_p11 = pneg %p161_p10  ;;  %s5699_s11 = smov 8  }
  0x10   : > { %206 = sbr.rel (%p161_p10) target bundleno = 1345 (0x541), region = 40 }
  0x11   : > { %p5546_p12 = pnand %p5553_p9, %p5545_p11 }
  0x13   : > { %5548 = dma.hbm_to_vmem [thread:$0]  (!%p5546_p12), %s178_s7, 18432, %s180_s9, [#allocation5], %s5698_s10, %s5698_s10, %s5699_s11  }
  0x15   : > { %5674 = dma.done.wait (%p5553_p9), [#allocation5], 18432  }
  0x16   : > { %5676 = vsyncadd (%p5553_p9), [#allocation5], 4294948864  ;;  %v5794_v0 = vld [vmem:[%s8371_s1 + $0x78] sm:$0xff]  ;;  %v5814_v4 = vld [vmem:[%s8371_s1 + $0x70] sm:$0xff]  ;;  %p235_p13 = scmp.lt.s32.totalorder %s5754_s22, 1  ;;  %s232_s9 = sand.u32 1, %s5687_s19  }
  0x17   : > { %v5799_v1 = vld [vmem:[%s8371_s1 + $0xf8] sm:$0xff]  ;;  %865 = vmatpush.msra.mxu0 %v5794_v0  ;;  %v5819_v5 = vld [vmem:[%s8371_s1 + $0xf0] sm:$0xff]  ;;  %v5833_v8 = vld [vmem:[%s8371_s1 + $0x68] sm:$0xff]  ;;  %s5242_s10 = sshll.u32 %s232_s9, 8  ;;  %s5537_s12 = sshll.u32 %s5754_s22, 8 }
  0x18   : > { %v5804_v2 = vld [vmem:[%s8371_s1 + $0x178] sm:$0xff]  ;;  %930 = vmatpush.msra.mxu1 %v5799_v1  ;;  %v5825_v6 = vld [vmem:[%s8371_s1 + $0x170] sm:$0xff]  ;;  %v5840_v9 = vld [vmem:[%s8371_s1 + $0xe8] sm:$0xff]  ;;  %s5987_s16 = scalar_select %p235_p13, %s5754_s22, 1 }
  0x19   : > { %v780_v3 = vld [vmem:[%s8371_s1 + $0x1f8] sm:$0xff]  ;;  %995 = vmatpush.msra.mxu2 %v5804_v2  ;;  %v779_v7 = vld [vmem:[%s8371_s1 + $0x1f0] sm:$0xff]  ;;  %866 = vmatpush.msra.mxu0 %v5814_v4  ;;  %v5845_v10 = vld [vmem:[%s8371_s1 + $0x168] sm:$0xff]  ;;  %s5158_s15 = scalar_lea.hbm %s8375_s5, %s5537_s12  ;;  %s5147_s22 = scalar_lea.sflag [#allocation6], %s232_s9 }
  0x1a   : > { %1060 = vmatpush.msra.mxu3 %v780_v3  ;;  %931 = vmatpush.msra.mxu1 %v5819_v5  ;;  %v778_v11 = vld [vmem:[%s8371_s1 + $0x1e8] sm:$0xff]  ;;  %v5854_v12 = vld [vmem:[%s8371_s1 + $0x60] sm:$0xff]  ;;  %v5875_v16 = vld [vmem:[%s8371_s1 + $0x58] sm:$0xff]  ;;  %s5538_s23 = smul.u32 432, %s5987_s16  ;;  %s7988_s16 = scalar_lea.vmem [#allocation7], %s5242_s10 }
  0x1b   : > { %996 = vmatpush.msra.mxu2 %v5825_v6  ;;  %v5859_v13 = vld [vmem:[%s8371_s1 + $0xe0] sm:$0xff]  ;;  %867 = vmatpush.msra.mxu0 %v5833_v8  ;;  %v5880_v17 = vld [vmem:[%s8371_s1 + $0xd8] sm:$0xff]  ;;  %v5896_v20 = vld [vmem:[%s8371_s1 + $0x50] sm:$0xff]  ;;  %s5159_s17 = sshll.u32 %s7988_s16, 4  ;;  %s5161_s25 = sshll.u32 %s5158_s15, 4  ;;  %s5160_s17 = int_to_ptr.vmem [resolvable:$true] %s5159_s17  ;;  %s5162_s25 = int_to_ptr.hbm [resolvable:$true] %s5161_s25 }
  0x1c   : > { %1061 = vmatpush.msra.mxu3 %v779_v7  ;;  %932 = vmatpush.msra.mxu1 %v5840_v9  ;;  %v5866_v14 = vld [vmem:[%s8371_s1 + $0x160] sm:$0xff]  ;;  %v5887_v18 = vld [vmem:[%s8371_s1 + $0x158] sm:$0xff]  ;;  %v5901_v21 = vld [vmem:[%s8371_s1 + $0xd0] sm:$0xff]  ;;  %s6041_s6 = scalar_lea.vmem %s8370_s0, %s5538_s23  ;;  %s5643_s26 = sshra.s32 %s5162_s25, 4  ;;  %s5644_s26 = int_to_ptr.hbm [resolvable:$true] %s5643_s26 }
  0x1d   : > { %v777_v15 = vld [vmem:[%s8371_s1 + $0x1e0] sm:$0xff]  ;;  %997 = vmatpush.msra.mxu2 %v5845_v10  ;;  %868 = vmatpush.msra.mxu0 %v5854_v12  ;;  %v776_v19 = vld [vmem:[%s8371_s1 + $0x1d8] sm:$0xff]  ;;  %v5908_v22 = vld [vmem:[%s8371_s1 + $0x150] sm:$0xff]  ;;  %s5645_s30 = scalar_lea.hbm %s5644_s26, 256  ;;  %p5650_p3 = scmp.lt.s32.totalorder %s5644_s26, %s8375_s5 }
  0x1e   : > { %1062 = vmatpush.msra.mxu3 %v778_v11  ;;  %933 = vmatpush.msra.mxu1 %v5859_v13  ;;  %v775_v23 = vld [vmem:[%s8371_s1 + $0x1d0] sm:$0xff]  ;;  %v5917_v24 = vld [vmem:[%s8371_s1 + $0x48] sm:$0xff]  ;;  %v725_v28 = vld [vmem:[%s8371_s1 + $0x40] sm:$0xff]  ;;  %p5646_p0 = scmp.ne.s32.totalorder %s5644_s26, %s5645_s30 }
  0x1f   : > { %998 = vmatpush.msra.mxu2 %v5866_v14  ;;  %869 = vmatpush.msra.mxu0 %v5875_v16  ;;  %v5922_v25 = vld [vmem:[%s8371_s1 + $0xc8] sm:$0xff]  ;;  %v5941_v29 = vld [vmem:[%s8371_s1 + $0xc0] sm:$0xff]  ;;  %v724_v32 = vld [vmem:[%s8371_s1 + $0x38] sm:$0xff] }
  0x20   : > { %1063 = vmatpush.msra.mxu3 %v777_v15  ;;  %934 = vmatpush.msra.mxu1 %v5880_v17  ;;  %v5929_v26 = vld [vmem:[%s8371_s1 + $0x148] sm:$0xff]  ;;  %v757_v30 = vld [vmem:[%s8371_s1 + $0x140] sm:$0xff]  ;;  %v740_v33 = vld [vmem:[%s8371_s1 + $0xb8] sm:$0xff]  ;;  %p5647_p1 = pnand %p5646_p0, %p5771_p5 }
  0x21   : > { %999 = vmatpush.msra.mxu2 %v5887_v18  ;;  %870 = vmatpush.msra.mxu0 %v5896_v20  ;;  %v774_v27 = vld [vmem:[%s8371_s1 + $0x1c8] sm:$0xff]  ;;  %v773_v31 = vld [vmem:[%s8371_s1 + $0x1c0] sm:$0xff]  ;;  %v756_v34 = vld [vmem:[%s8371_s1 + $0x138] sm:$0xff] }
  0x22   : > { %1064 = vmatpush.msra.mxu3 %v776_v19  ;;  %935 = vmatpush.msra.mxu1 %v5901_v21  ;;  %v772_v35 = vld [vmem:[%s8371_s1 + $0x1b8] sm:$0xff]  ;;  %v723_v36 = vld [vmem:[%s8371_s1 + $0x30] sm:$0xff]  ;;  %v722_v40 = vld [vmem:[%s8371_s1 + $0x28] sm:$0xff]  ;;  %p5648_p2 = pneg %p5647_p1 }
  0x23   : > { %1000 = vmatpush.msra.mxu2 %v5908_v22  ;;  %871 = vmatpush.msra.mxu0 %v5917_v24  ;;  %v739_v37 = vld [vmem:[%s8371_s1 + $0xb0] sm:$0xff]  ;;  %v738_v41 = vld [vmem:[%s8371_s1 + $0xa8] sm:$0xff]  ;;  %v721_v44 = vld [vmem:[%s8371_s1 + $0x20] sm:$0xff] }
  0x24   : > { %1065 = vmatpush.msra.mxu3 %v775_v23  ;;  %936 = vmatpush.msra.mxu1 %v5922_v25  ;;  %v755_v38 = vld [vmem:[%s8371_s1 + $0x130] sm:$0xff]  ;;  %v754_v42 = vld [vmem:[%s8371_s1 + $0x128] sm:$0xff]  ;;  %v737_v45 = vld [vmem:[%s8371_s1 + $0xa0] sm:$0xff] }
  0x25   : > { %1001 = vmatpush.msra.mxu2 %v5929_v26  ;;  %872 = vmatpush.msra.mxu0 %v725_v28  ;;  %v771_v39 = vld [vmem:[%s8371_s1 + $0x1b0] sm:$0xff]  ;;  %v770_v43 = vld [vmem:[%s8371_s1 + $0x1a8] sm:$0xff]  ;;  %v753_v46 = vld [vmem:[%s8371_s1 + $0x120] sm:$0xff] }
  0x26   : > { %1066 = vmatpush.msra.mxu3 %v774_v27  ;;  %937 = vmatpush.msra.mxu1 %v5941_v29  ;;  %v769_v47 = vld [vmem:[%s8371_s1 + $0x1a0] sm:$0xff]  ;;  %v720_v48 = vld [vmem:[%s8371_s1 + $0x18] sm:$0xff]  ;;  %v719_v52 = vld [vmem:[%s8371_s1 + $0x10] sm:$0xff] }
  0x27   : > { %1002 = vmatpush.msra.mxu2 %v757_v30  ;;  %873 = vmatpush.msra.mxu0 %v724_v32  ;;  %v736_v49 = vld [vmem:[%s8371_s1 + $0x98] sm:$0xff]  ;;  %v735_v53 = vld [vmem:[%s8371_s1 + $0x90] sm:$0xff]  ;;  %v718_v56 = vld [vmem:[%s8371_s1 + $0x8] sm:$0xff] }
  0x28   : > { %1067 = vmatpush.msra.mxu3 %v773_v31  ;;  %938 = vmatpush.msra.mxu1 %v740_v33  ;;  %v752_v50 = vld [vmem:[%s8371_s1 + $0x118] sm:$0xff]  ;;  %v751_v54 = vld [vmem:[%s8371_s1 + $0x110] sm:$0xff]  ;;  %v734_v57 = vld [vmem:[%s8371_s1 + $0x88] sm:$0xff] }
  0x29   : > { %1003 = vmatpush.msra.mxu2 %v756_v34  ;;  %874 = vmatpush.msra.mxu0 %v723_v36  ;;  %v768_v51 = vld [vmem:[%s8371_s1 + $0x198] sm:$0xff]  ;;  %v767_v55 = vld [vmem:[%s8371_s1 + $0x190] sm:$0xff]  ;;  %v750_v58 = vld [vmem:[%s8371_s1 + $0x108] sm:$0xff] }
  0x2a   : > { %1068 = vmatpush.msra.mxu3 %v772_v35  ;;  %939 = vmatpush.msra.mxu1 %v739_v37  ;;  %v766_v59 = vld [vmem:[%s8371_s1 + $0x188] sm:$0xff]  ;;  %v717_v60 = vld [vmem:[%s8371_s1] sm:$0xff]  ;;  %v6065_v15 = vld [vmem:[%s6041_s6 + $0x18] sm:$0xff] }
  0x2b   : > { %1004 = vmatpush.msra.mxu2 %v755_v38  ;;  %875 = vmatpush.msra.mxu0 %v722_v40  ;;  %v733_v61 = vld [vmem:[%s8371_s1 + $0x80] sm:$0xff]  ;;  %v828_v19 = vld [vmem:[%s8371_s1 + $0x378] sm:$0xff]  ;;  %v827_v30 = vld [vmem:[%s8371_s1 + $0x370] sm:$0xff] }
  0x2c   : > { %1069 = vmatpush.msra.mxu3 %v771_v39  ;;  %940 = vmatpush.msra.mxu1 %v738_v41  ;;  %v749_v62 = vld [vmem:[%s8371_s1 + $0x100] sm:$0xff]  ;;  %v796_v23 = vld [vmem:[%s8371_s1 + $0x278] sm:$0xff]  ;;  %v795_v31 = vld [vmem:[%s8371_s1 + $0x270] sm:$0xff] }
  0x2d   : > { %1005 = vmatpush.msra.mxu2 %v754_v42  ;;  %876 = vmatpush.msra.mxu0 %v721_v44  ;;  %v765_v63 = vld [vmem:[%s8371_s1 + $0x180] sm:$0xff]  ;;  %v844_v27 = vld [vmem:[%s8371_s1 + $0x3f8] sm:$0xff]  ;;  %v843_v32 = vld [vmem:[%s8371_s1 + $0x3f0] sm:$0xff] }
  0x2e   : > { %1070 = vmatpush.msra.mxu3 %v770_v43  ;;  %941 = vmatpush.msra.mxu1 %v737_v45  ;;  %v283_v3 = vld [vmem:[%s6041_s6] sm:$0xff]  ;;  %v812_v28 = vld [vmem:[%s8371_s1 + $0x2f8] sm:$0xff]  ;;  %v811_v33 = vld [vmem:[%s8371_s1 + $0x2f0] sm:$0xff] }
  0x2f   : > { %1006 = vmatpush.msra.mxu2 %v753_v46  ;;  %877 = vmatpush.msra.mxu0 %v720_v48  ;;  %v315_v7 = vld [vmem:[%s6041_s6 + $0x1] sm:$0xff]  ;;  %v316_v39 = vld [vmem:[%s6041_s6 + $0x9] sm:$0xff]  ;;  %v824_v46 = vld [vmem:[%s8371_s1 + $0x358] sm:$0xff] }
  0x30   : > { %1071 = vmatpush.msra.mxu3 %v769_v47  ;;  %942 = vmatpush.msra.mxu1 %v736_v49  ;;  %v347_v11 = vld [vmem:[%s6041_s6 + $0x2] sm:$0xff]  ;;  %v348_v40 = vld [vmem:[%s6041_s6 + $0xa] sm:$0xff]  ;;  %v792_v47 = vld [vmem:[%s8371_s1 + $0x258] sm:$0xff] }
  0x31   : > { %1007 = vmatpush.msra.mxu2 %v752_v50  ;;  %878 = vmatpush.msra.mxu0 %v719_v52  ;;  %v826_v34 = vld [vmem:[%s8371_s1 + $0x368] sm:$0xff]  ;;  %v5245_v41 = vld [vmem:[%s6041_s6 + $0x20] sm:$0xff]  ;;  %v840_v48 = vld [vmem:[%s8371_s1 + $0x3d8] sm:$0xff] }
  0x32   : > { %1072 = vmatpush.msra.mxu3 %v768_v51  ;;  %943 = vmatpush.msra.mxu1 %v735_v53  ;;  %v794_v35 = vld [vmem:[%s8371_s1 + $0x268] sm:$0xff]  ;;  %v825_v42 = vld [vmem:[%s8371_s1 + $0x360] sm:$0xff]  ;;  %v808_v49 = vld [vmem:[%s8371_s1 + $0x2d8] sm:$0xff] }
  0x33   : > { %1008 = vmatpush.msra.mxu2 %v751_v54  ;;  %879 = vmatpush.msra.mxu0 %v718_v56  ;;  %v842_v36 = vld [vmem:[%s8371_s1 + $0x3e8] sm:$0xff]  ;;  %v793_v43 = vld [vmem:[%s8371_s1 + $0x260] sm:$0xff]  ;;  %v823_v50 = vld [vmem:[%s8371_s1 + $0x350] sm:$0xff] }
  0x34   : > { %1073 = vmatpush.msra.mxu3 %v767_v55  ;;  %944 = vmatpush.msra.mxu1 %v734_v57  ;;  %v810_v37 = vld [vmem:[%s8371_s1 + $0x2e8] sm:$0xff]  ;;  %v841_v44 = vld [vmem:[%s8371_s1 + $0x3e0] sm:$0xff]  ;;  %v791_v51 = vld [vmem:[%s8371_s1 + $0x250] sm:$0xff] }
  0x35   : > { %1009 = vmatpush.msra.mxu2 %v750_v58  ;;  %880 = vmatpush.msra.mxu0 %v717_v60  ;;  %v284_v38 = vld [vmem:[%s6041_s6 + $0x8] sm:$0xff]  ;;  %v809_v45 = vld [vmem:[%s8371_s1 + $0x2e0] sm:$0xff]  ;;  %v839_v52 = vld [vmem:[%s8371_s1 + $0x3d0] sm:$0xff] }
  0x36   : > { %1074 = vmatpush.msra.mxu3 %v766_v59  ;;  %945 = vmatpush.msra.mxu1 %v733_v61  ;;  %v807_v53 = vld [vmem:[%s8371_s1 + $0x2d0] sm:$0xff]  ;;  %v6145_v54 = vld [vmem:[%s6041_s6 + $0x19] sm:$0xff]  ;;  %v822_v57 = vld [vmem:[%s8371_s1 + $0x348] sm:$0xff] }
  0x37   : > { %1010 = vmatpush.msra.mxu2 %v749_v62  ;;  %881 = vmatmul.f32.vlgmr.msra.gmra.mxu0 %v283_v3  ;;  %v6148_v55 = vld [vmem:[%s6041_s6 + $0x1a] sm:$0xff]  ;;  %v6151_v56 = vld [vmem:[%s6041_s6 + $0x30] sm:$0xff]  ;;  %v790_v58 = vld [vmem:[%s8371_s1 + $0x248] sm:$0xff] }
  0x38   : > { %1075 = vmatpush.msra.mxu3 %v765_v63  ;;  %946 = vmatmul.f32.vlgmr.msra.gmra.mxu1 %v315_v7  ;;  %v838_v59 = vld [vmem:[%s8371_s1 + $0x3c8] sm:$0xff]  ;;  %v6176_v63 = vld [vmem:[%s6041_s6 + $0x38] sm:$0xff]  ;;  %v821_v3 = vld [vmem:[%s8371_s1 + $0x340] sm:$0xff] }
  0x39   : > { %1011 = vmatmul.f32.vlgmr.msra.gmra.mxu2 %v347_v11  ;;  %1076 = vmatmul.f32.vlgmr.msra.gmra.mxu3 %v6065_v15  ;;  %v806_v60 = vld [vmem:[%s8371_s1 + $0x2c8] sm:$0xff]  ;;  %v789_v7 = vld [vmem:[%s8371_s1 + $0x240] sm:$0xff] }
  0x3a   : > { %1255 = vmatpush.msrb.mxu2 %v828_v19  ;;  %1125 = vmatpush.msrb.mxu0 %v796_v23  ;;  %v6170_v61 = vld [vmem:[%s6041_s6 + $0x21] sm:$0xff]  ;;  %v6194_v19 = vld [vmem:[%s6041_s6 + $0x31] sm:$0xff] }
  0x3b   : > { %1320 = vmatpush.msrb.mxu3 %v844_v27  ;;  %1190 = vmatpush.msrb.mxu1 %v812_v28  ;;  %v6173_v62 = vld [vmem:[%s6041_s6 + $0x22] sm:$0xff]  ;;  %v6197_v23 = vld [vmem:[%s6041_s6 + $0x32] sm:$0xff] }
  0x3c   : > { %1256 = vmatpush.msrb.mxu2 %v827_v30  ;;  %1126 = vmatpush.msrb.mxu0 %v795_v31  ;;  %v837_v11 = vld [vmem:[%s8371_s1 + $0x3c0] sm:$0xff]  ;;  %v6200_v27 = vld [vmem:[%s6041_s6 + $0x48] sm:$0xff]  ;;  %v820_v28 = vld [vmem:[%s8371_s1 + $0x338] sm:$0xff] }
  0x3d   : > { %1321 = vmatpush.msrb.mxu3 %v843_v32  ;;  %1191 = vmatpush.msrb.mxu1 %v811_v33  ;;  %v788_v30 = vld [vmem:[%s8371_s1 + $0x238] sm:$0xff] }
  0x3e   : > { %1257 = vmatpush.msrb.mxu2 %v826_v34  ;;  %1127 = vmatpush.msrb.mxu0 %v794_v35  ;;  %v836_v31 = vld [vmem:[%s8371_s1 + $0x3b8] sm:$0xff]  ;;  %v6225_v35 = vld [vmem:[%s6041_s6 + $0x50] sm:$0xff] }
  0x3f   : > { %1322 = vmatpush.msrb.mxu3 %v842_v36  ;;  %1192 = vmatpush.msrb.mxu1 %v810_v37  ;;  %v804_v32 = vld [vmem:[%s8371_s1 + $0x2b8] sm:$0xff]  ;;  %v819_v36 = vld [vmem:[%s8371_s1 + $0x330] sm:$0xff] }
  0x40   : > { %884 = vmatmul.f32.gmra.mxu0 %v284_v38  ;;  %949 = vmatmul.f32.gmra.mxu1 %v316_v39  ;;  %v6219_v33 = vld [vmem:[%s6041_s6 + $0x39] sm:$0xff]  ;;  %v787_v37 = vld [vmem:[%s8371_s1 + $0x230] sm:$0xff] }
  0x41   : > { %1014 = vmatmul.f32.gmra.mxu2 %v348_v40  ;;  %1079 = vmatmul.f32.gmra.mxu3 %v5245_v41  ;;  %v6222_v34 = vld [vmem:[%s6041_s6 + $0x3a] sm:$0xff]  ;;  %v835_v38 = vld [vmem:[%s8371_s1 + $0x3b0] sm:$0xff] }
  0x42   : > { %1258 = vmatpush.msrb.mxu2 %v825_v42  ;;  %1128 = vmatpush.msrb.mxu0 %v793_v43  ;;  %v803_v39 = vld [vmem:[%s8371_s1 + $0x2b0] sm:$0xff]  ;;  %v6250_v42 = vld [vmem:[%s6041_s6 + $0x60] sm:$0xff]  ;;  %v818_v43 = vld [vmem:[%s8371_s1 + $0x328] sm:$0xff] }
  0x43   : > { %1323 = vmatpush.msrb.mxu3 %v841_v44  ;;  %1193 = vmatpush.msrb.mxu1 %v809_v45  ;;  %v6244_v40 = vld [vmem:[%s6041_s6 + $0x49] sm:$0xff] }
  0x44   : > { %1259 = vmatpush.msrb.mxu2 %v824_v46  ;;  %1129 = vmatpush.msrb.mxu0 %v792_v47  ;;  %v786_v44 = vld [vmem:[%s8371_s1 + $0x228] sm:$0xff]  ;;  %v6269_v47 = vld [vmem:[%s6041_s6 + $0x51] sm:$0xff] }
  0x45   : > { %1324 = vmatpush.msrb.mxu3 %v840_v48  ;;  %1194 = vmatpush.msrb.mxu1 %v808_v49  ;;  %v834_v45 = vld [vmem:[%s8371_s1 + $0x3a8] sm:$0xff]  ;;  %v6272_v48 = vld [vmem:[%s6041_s6 + $0x52] sm:$0xff] }
  0x46   : > { %1260 = vmatpush.msrb.mxu2 %v823_v50  ;;  %1130 = vmatpush.msrb.mxu0 %v791_v51  ;;  %v802_v46 = vld [vmem:[%s8371_s1 + $0x2a8] sm:$0xff]  ;;  %v817_v50 = vld [vmem:[%s8371_s1 + $0x320] sm:$0xff] }
  0x47   : > { %1325 = vmatpush.msrb.mxu3 %v839_v52  ;;  %1195 = vmatpush.msrb.mxu1 %v807_v53  ;;  %v6275_v49 = vld [vmem:[%s6041_s6 + $0x68] sm:$0xff]  ;;  %v785_v51 = vld [vmem:[%s8371_s1 + $0x220] sm:$0xff] }
  0x48   : > { %887 = vmatmul.f32.gmra.mxu0 %v6065_v15  ;;  %952 = vmatmul.f32.gmra.mxu1 %v6145_v54  ;;  %v805_v15 = vld [vmem:[%s8371_s1 + $0x2c0] sm:$0xff] }
  0x49   : > { %1017 = vmatmul.f32.gmra.mxu2 %v6148_v55  ;;  %1082 = vmatmul.f32.gmra.mxu3 %v6151_v56  ;;  %v833_v52 = vld [vmem:[%s8371_s1 + $0x3a0] sm:$0xff] }
  0x4a   : > { %1261 = vmatpush.msrb.mxu2 %v822_v57  ;;  %1131 = vmatpush.msrb.mxu0 %v790_v58  ;;  %v801_v53 = vld [vmem:[%s8371_s1 + $0x2a0] sm:$0xff] }
  0x4b   : > { %1326 = vmatpush.msrb.mxu3 %v838_v59  ;;  %1196 = vmatpush.msrb.mxu1 %v806_v60  ;;  %v6294_v57 = vld [vmem:[%s6041_s6 + $0x61] sm:$0xff]  ;;  %v6300_v59 = vld [vmem:[%s6041_s6 + $0x78] sm:$0xff] }
  0x4c   : > { %1262 = vmatpush.msrb.mxu2 %v821_v3  ;;  %1132 = vmatpush.msrb.mxu0 %v789_v7  ;;  %v6297_v58 = vld [vmem:[%s6041_s6 + $0x62] sm:$0xff]  ;;  %v816_v60 = vld [vmem:[%s8371_s1 + $0x318] sm:$0xff] }
  0x4d   : > { %1327 = vmatpush.msrb.mxu3 %v837_v11  ;;  %1197 = vmatpush.msrb.mxu1 %v805_v15  ;;  %v784_v3 = vld [vmem:[%s8371_s1 + $0x218] sm:$0xff]  ;;  %v6319_v15 = vld [vmem:[%s6041_s6 + $0x69] sm:$0xff] }
  0x4e   : > { %1263 = vmatpush.msrb.mxu2 %v820_v28  ;;  %1133 = vmatpush.msrb.mxu0 %v788_v30  ;;  %v832_v7 = vld [vmem:[%s8371_s1 + $0x398] sm:$0xff]  ;;  %v6322_v28 = vld [vmem:[%s6041_s6 + $0x6a] sm:$0xff]  ;;  %v6325_v30 = vld [vmem:[%s6041_s6 + $0x80] sm:$0xff] }
  0x4f   : > { %1328 = vmatpush.msrb.mxu3 %v836_v31  ;;  %1198 = vmatpush.msrb.mxu1 %v804_v32  ;;  %v800_v11 = vld [vmem:[%s8371_s1 + $0x298] sm:$0xff]  ;;  %v815_v31 = vld [vmem:[%s8371_s1 + $0x310] sm:$0xff] }
  0x50   : > { %890 = vmatmul.f32.gmra.mxu0 %v5245_v41  ;;  %955 = vmatmul.f32.gmra.mxu1 %v6170_v61  ;;  %v6247_v41 = vld [vmem:[%s6041_s6 + $0x4a] sm:$0xff] }
  0x51   : > { %1020 = vmatmul.f32.gmra.mxu2 %v6173_v62  ;;  %1085 = vmatmul.f32.gmra.mxu3 %v6176_v63  ;;  %v783_v32 = vld [vmem:[%s8371_s1 + $0x210] sm:$0xff] }
  0x52   : > { %1264 = vmatpush.msrb.mxu2 %v819_v36  ;;  %1134 = vmatpush.msrb.mxu0 %v787_v37  ;;  %v831_v36 = vld [vmem:[%s8371_s1 + $0x390] sm:$0xff] }
  0x53   : > { %1329 = vmatpush.msrb.mxu3 %v835_v38  ;;  %1199 = vmatpush.msrb.mxu1 %v803_v39  ;;  %v799_v37 = vld [vmem:[%s8371_s1 + $0x290] sm:$0xff]  ;;  %v6344_v38 = vld [vmem:[%s6041_s6 + $0x79] sm:$0xff] }
  0x54   : > { %1265 = vmatpush.msrb.mxu2 %v818_v43  ;;  %1135 = vmatpush.msrb.mxu0 %v786_v44  ;;  %v6347_v39 = vld [vmem:[%s6041_s6 + $0x7a] sm:$0xff]  ;;  %v6350_v43 = vld [vmem:[%s6041_s6 + $0x90] sm:$0xff]  ;;  %v814_v44 = vld [vmem:[%s8371_s1 + $0x308] sm:$0xff] }
  0x55   : > { %1330 = vmatpush.msrb.mxu3 %v834_v45  ;;  %1200 = vmatpush.msrb.mxu1 %v802_v46  ;;  %v782_v45 = vld [vmem:[%s8371_s1 + $0x208] sm:$0xff] }
  0x56   : > { %1266 = vmatpush.msrb.mxu2 %v817_v50  ;;  %1136 = vmatpush.msrb.mxu0 %v785_v51  ;;  %v830_v46 = vld [vmem:[%s8371_s1 + $0x388] sm:$0xff] }
  0x57   : > { %1331 = vmatpush.msrb.mxu3 %v833_v52  ;;  %1201 = vmatpush.msrb.mxu1 %v801_v53  ;;  %v798_v50 = vld [vmem:[%s8371_s1 + $0x288] sm:$0xff]  ;;  %v6375_v53 = vld [vmem:[%s6041_s6 + $0x98] sm:$0xff] }
  0x58   : > { %893 = vmatmul.f32.gmra.mxu0 %v6151_v56  ;;  %958 = vmatmul.f32.gmra.mxu1 %v6194_v19  ;;  %v6369_v51 = vld [vmem:[%s6041_s6 + $0x81] sm:$0xff] }
  0x59   : > { %1023 = vmatmul.f32.gmra.mxu2 %v6197_v23  ;;  %1088 = vmatmul.f32.gmra.mxu3 %v6200_v27  ;;  %v6372_v52 = vld [vmem:[%s6041_s6 + $0x82] sm:$0xff] }
  0x5a   : > { %1267 = vmatpush.msrb.mxu2 %v816_v60  ;;  %1137 = vmatpush.msrb.mxu0 %v784_v3  ;;  %v813_v60 = vld [vmem:[%s8371_s1 + $0x300] sm:$0xff] }
  0x5b   : > { %1332 = vmatpush.msrb.mxu3 %v832_v7  ;;  %1202 = vmatpush.msrb.mxu1 %v800_v11  ;;  %v781_v3 = vld [vmem:[%s8371_s1 + $0x200] sm:$0xff] }
  0x5c   : > { %1268 = vmatpush.msrb.mxu2 %v815_v31  ;;  %1138 = vmatpush.msrb.mxu0 %v783_v32  ;;  %v829_v7 = vld [vmem:[%s8371_s1 + $0x380] sm:$0xff]  ;;  %v6396_v31 = vld [vmem:[%s6041_s6 + $0x91] sm:$0xff] }
  0x5d   : > { %1333 = vmatpush.msrb.mxu3 %v831_v36  ;;  %1203 = vmatpush.msrb.mxu1 %v799_v37  ;;  %v797_v11 = vld [vmem:[%s8371_s1 + $0x280] sm:$0xff]  ;;  %v6400_v32 = vld [vmem:[%s6041_s6 + $0x92] sm:$0xff]  ;;  %v6403_v36 = vld [vmem:[%s6041_s6 + $0xa8] sm:$0xff] }
  0x5e   : > { %1269 = vmatpush.msrb.mxu2 %v814_v44  ;;  %1139 = vmatpush.msrb.mxu0 %v782_v45 }
  0x5f   : > { %1334 = vmatpush.msrb.mxu3 %v830_v46  ;;  %1204 = vmatpush.msrb.mxu1 %v798_v50 }
  0x60   : > { %896 = vmatmul.f32.gmra.mxu0 %v6176_v63  ;;  %961 = vmatmul.f32.gmra.mxu1 %v6219_v33 }
  0x61   : > { %1026 = vmatmul.f32.gmra.mxu2 %v6222_v34  ;;  %1091 = vmatmul.f32.gmra.mxu3 %v6225_v35 }
  0x62   : > { %1270 = vmatpush.msrb.mxu2 %v813_v60  ;;  %1140 = vmatpush.msrb.mxu0 %v781_v3 }
  0x63   : > { %1335 = vmatpush.msrb.mxu3 %v829_v7  ;;  %1205 = vmatpush.msrb.mxu1 %v797_v11 }
  0x64   : > { %2131 = vmatpush.msra.mxu2 %v5799_v1  ;;  %v6420_v1 = vld [vmem:[%s6041_s6 + $0x99] sm:$0xff] }
  0x65   : > { %2196 = vmatpush.msra.mxu3 %v5804_v2  ;;  %2066 = vmatpush.msra.mxu1 %v5794_v0  ;;  %v860_v0 = vld [vmem:[%s8371_s1 + $0x478] sm:$0xff] }
  0x66   : > { %2132 = vmatpush.msra.mxu2 %v5819_v5  ;;  %1385 = vmatpush.msra.mxu0 %v860_v0  ;;  %v6425_v2 = vld [vmem:[%s6041_s6 + $0x9a] sm:$0xff]  ;;  %v859_v5 = vld [vmem:[%s8371_s1 + $0x470] sm:$0xff] }
  0x67   : > { %2197 = vmatpush.msra.mxu3 %v5825_v6  ;;  %2067 = vmatpush.msra.mxu1 %v5814_v4  ;;  %v6428_v4 = vld [vmem:[%s6041_s6 + $0xb0] sm:$0xff] }
  0x68   : > { %899 = vmatmul.f32.gmra.mxu0 %v6200_v27  ;;  %964 = vmatmul.f32.gmra.mxu1 %v6244_v40  ;;  %v6445_v6 = vld [vmem:[%s6041_s6 + $0xa9] sm:$0xff] }
  0x69   : > { %1029 = vmatmul.f32.gmra.mxu2 %v6247_v41  ;;  %1094 = vmatmul.f32.gmra.mxu3 %v6250_v42 }
  0x6a   : > { %2133 = vmatpush.msra.mxu2 %v5840_v9  ;;  %2198 = vmatpush.msra.mxu3 %v5845_v10  ;;  %v6453_v9 = vld [vmem:[%s6041_s6 + $0xc0] sm:$0xff]  ;;  %v858_v10 = vld [vmem:[%s8371_s1 + $0x468] sm:$0xff] }
  0x6b   : > { %2068 = vmatpush.msra.mxu1 %v5833_v8  ;;  %1386 = vmatpush.msra.mxu0 %v859_v5  ;;  %v6450_v8 = vld [vmem:[%s6041_s6 + $0xaa] sm:$0xff] }
  0x6c   : > { %2134 = vmatpush.msra.mxu2 %v5859_v13  ;;  %2199 = vmatpush.msra.mxu3 %v5866_v14  ;;  %v6467_v13 = vld [vmem:[%s6041_s6 + $0xb2] sm:$0xff]  ;;  %v6470_v14 = vld [vmem:[%s6041_s6 + $0xc8] sm:$0xff] }
  0x6d   : > { %2069 = vmatpush.msra.mxu1 %v5854_v12  ;;  %1387 = vmatpush.msra.mxu0 %v858_v10  ;;  %v6464_v12 = vld [vmem:[%s6041_s6 + $0xb1] sm:$0xff] }
  0x6e   : > { %2135 = vmatpush.msra.mxu2 %v5880_v17  ;;  %2200 = vmatpush.msra.mxu3 %v5887_v18  ;;  %v6482_v17 = vld [vmem:[%s8372_s2] ss:$0 sm:$0xff] }
  0x6f   : > { %2070 = vmatpush.msra.mxu1 %v5875_v16  ;;  %v857_v16 = vld [vmem:[%s8371_s1 + $0x460] sm:$0xff] }
  0x70   : > { %902 = vmatmul.f32.gmra.mxu0 %v6225_v35  ;;  %967 = vmatmul.f32.gmra.mxu1 %v6269_v47 }
  0x71   : > { %1032 = vmatmul.f32.gmra.mxu2 %v6272_v48  ;;  %1097 = vmatmul.f32.gmra.mxu3 %v6275_v49 }
  0x72   : > { %2136 = vmatpush.msra.mxu2 %v5901_v21  ;;  %2201 = vmatpush.msra.mxu3 %v5908_v22 }
  0x73   : > { %2071 = vmatpush.msra.mxu1 %v5896_v20  ;;  %1388 = vmatpush.msra.mxu0 %v857_v16 }
  0x74   : > { %2137 = vmatpush.msra.mxu2 %v5922_v25  ;;  %2202 = vmatpush.msra.mxu3 %v5929_v26 }
  0x75   : > { %2072 = vmatpush.msra.mxu1 %v5917_v24  ;;  %v856_v24 = vld [vmem:[%s8371_s1 + $0x458] sm:$0xff] }
  0x76   : > { %2138 = vmatpush.msra.mxu2 %v5941_v29  ;;  %1389 = vmatpush.msra.mxu0 %v856_v24 }
  0x78   : > { %905 = vmatmul.f32.gmra.mxu0 %v6250_v42  ;;  %970 = vmatmul.f32.gmra.mxu1 %v6294_v57 }
  0x79   : > { %1035 = vmatmul.f32.gmra.mxu2 %v6297_v58  ;;  %1100 = vmatmul.f32.gmra.mxu3 %v6300_v59 }
  0x80   : > { %908 = vmatmul.f32.gmra.mxu0 %v6275_v49  ;;  %973 = vmatmul.f32.gmra.mxu1 %v6319_v15 }
  0x81   : > { %1038 = vmatmul.f32.gmra.mxu2 %v6322_v28  ;;  %1103 = vmatmul.f32.gmra.mxu3 %v6325_v30 }
  0x88   : > { %911 = vmatmul.f32.gmra.mxu0 %v6300_v59  ;;  %976 = vmatmul.f32.gmra.mxu1 %v6344_v38 }
  0x89   : > { %1041 = vmatmul.f32.gmra.mxu2 %v6347_v39  ;;  %1106 = vmatmul.f32.gmra.mxu3 %v6350_v43 }
  0x90   : > { %914 = vmatmul.f32.gmra.mxu0 %v6325_v30  ;;  %979 = vmatmul.f32.gmra.mxu1 %v6369_v51 }
  0x91   : > { %1044 = vmatmul.f32.gmra.mxu2 %v6372_v52  ;;  %1109 = vmatmul.f32.gmra.mxu3 %v6375_v53 }
  0x98   : > { %917 = vmatmul.f32.gmra.mxu0 %v6350_v43  ;;  %982 = vmatmul.f32.gmra.mxu1 %v6396_v31 }
  0x99   : > { %1047 = vmatmul.f32.gmra.mxu2 %v6400_v32  ;;  %1112 = vmatmul.f32.gmra.mxu3 %v6403_v36 }
  0xa0   : > { %920 = vmatmul.f32.gmra.mxu0 %v6375_v53  ;;  %985 = vmatmul.f32.gmra.mxu1 %v6420_v1 }
  0xa1   : > { %1050 = vmatmul.f32.gmra.mxu2 %v6425_v2  ;;  %1115 = vmatmul.f32.gmra.mxu3 %v6428_v4 }
  0xa8   : > { %923 = vmatmul.f32.gmra.mxu0 %v6403_v36  ;;  %988 = vmatmul.f32.gmra.mxu1 %v6445_v6 }
  0xa9   : > { %1053 = vmatmul.f32.gmra.mxu2 %v6450_v8  ;;  %1118 = vmatmul.f32.gmra.mxu3 %v6453_v9 }
  0xb0   : > { %926 = vmatmul.f32.gmra.mxu0 %v6428_v4  ;;  %991 = vmatmul.f32.gmra.mxu1 %v6464_v12 }
  0xb1   : > { %1056 = vmatmul.f32.gmra.mxu2 %v6467_v13  ;;  %1121 = vmatmul.f32.gmra.mxu3 %v6470_v14 }
  0xb4   : > { %v882_v18 = vpop.f32.mrf.mxu0 }
  0xb5   : > { %v947_v20 = vpop.f32.mrf.mxu1  ;;  %v883_v21 = vadd.f32 %v6482_v17, %v882_v18 }
  0xb7   : > { %v948_v22 = vadd.f32 %v947_v20, %v883_v21  ;;  %v1958_v21 = vld [vmem:[%s8371_s1 + $0x140] sm:$0xff] }
  0xb8   : > { %1141 = vmatmul.f32.vlgmr.msrb.gmra.mxu0 %v6145_v54  ;;  %1206 = vmatmul.f32.vlgmr.msrb.gmra.mxu1 %v6148_v55 }
  0xb9   : > { %1271 = vmatmul.f32.vlgmr.msrb.gmra.mxu2 %v6151_v56  ;;  %1336 = vmatmul.f32.vlgmr.msrb.gmra.mxu3 %v6194_v19  ;;  %v855_v56 = vld [vmem:[%s8371_s1 + $0x450] sm:$0xff] }
  0xba   : > { %1390 = vmatpush.msra.mxu0 %v855_v56  ;;  %2203 = vmatpush.msra.mxu3 %v1958_v21  ;;  %v1955_v21 = vld [vmem:[%s8371_s1 + $0x128] sm:$0xff] }
  0xbc   : > { %v1012_v25 = vpop.f32.mrf.mxu2  ;;  %v1077_v26 = vpop.f32.mrf.mxu3 }
  0xbd   : > { %v1013_v29 = vadd.f32 %v1012_v25, %v948_v22  ;;  %v885_v37 = vpop.f32.mrf.mxu0  ;;  %v950_v44 = vpop.f32.mrf.mxu1 }
  0xbe   : > { %v886_v45 = vadd.f32 %v6482_v17, %v885_v37 }
  0xbf   : > { %v6493_v54 = vadd.f32 %v1077_v26, %v1013_v29  ;;  %v1926_v29 = vld [vmem:[%s8371_s1 + $0x40] sm:$0xff] }
  0xc0   : > { %1144 = vmatmul.f32.gmra.mxu0 %v6170_v61  ;;  %1209 = vmatmul.f32.gmra.mxu1 %v6173_v62  ;;  %v951_v55 = vadd.f32 %v950_v44, %v886_v45  ;;  %v1941_v44 = vld [vmem:[%s8371_s1 + $0xb8] sm:$0xff] }
  0xc1   : > { %1274 = vmatmul.f32.gmra.mxu2 %v6176_v63  ;;  %1339 = vmatmul.f32.gmra.mxu3 %v6219_v33  ;;  %v854_v63 = vld [vmem:[%s8371_s1 + $0x448] sm:$0xff]  ;;  %v852_v45 = vld [vmem:[%s8371_s1 + $0x438] sm:$0xff] }
  0xc2   : > { %1391 = vmatpush.msra.mxu0 %v854_v63  ;;  %2073 = vmatpush.msra.mxu1 %v1926_v29  ;;  %v1956_v63 = vld [vmem:[%s8371_s1 + $0x130] sm:$0xff]  ;;  %v1938_v29 = vld [vmem:[%s8371_s1 + $0xa0] sm:$0xff] }
  0xc3   : > { %2139 = vmatpush.msra.mxu2 %v1941_v44  ;;  %v1954_v44 = vld [vmem:[%s8371_s1 + $0x120] sm:$0xff] }
  0xc4   : > { %v1015_v46 = vpop.f32.mrf.mxu2  ;;  %v1080_v50 = vpop.f32.mrf.mxu3 }
  0xc5   : > { %v1016_v60 = vadd.f32 %v1015_v46, %v951_v55  ;;  %v888_v3 = vpop.f32.mrf.mxu0  ;;  %v953_v7 = vpop.f32.mrf.mxu1  ;;  %v1957_v55 = vld [vmem:[%s8371_s1 + $0x138] sm:$0xff] }
  0xc6   : > { %v889_v11 = vadd.f32 %v6482_v17, %v888_v3  ;;  %2204 = vmatpush.msra.mxu3 %v1957_v55  ;;  %v1925_v3 = vld [vmem:[%s8371_s1 + $0x38] sm:$0xff] }
  0xc7   : > { %v6503_v61 = vadd.f32 %v1080_v50, %v1016_v60  ;;  %2074 = vmatpush.msra.mxu1 %v1925_v3  ;;  %v1953_v3 = vld [vmem:[%s8371_s1 + $0x118] sm:$0xff] }
  0xc8   : > { %1147 = vmatmul.f32.gmra.mxu0 %v6194_v19  ;;  %1212 = vmatmul.f32.gmra.mxu1 %v6197_v23  ;;  %v954_v62 = vadd.f32 %v953_v7, %v889_v11  ;;  %v1940_v11 = vld [vmem:[%s8371_s1 + $0xb0] sm:$0xff] }
  0xc9   : > { %1277 = vmatmul.f32.gmra.mxu2 %v6200_v27  ;;  %1342 = vmatmul.f32.gmra.mxu3 %v6244_v40  ;;  %v853_v27 = vld [vmem:[%s8371_s1 + $0x440] sm:$0xff] }
  0xca   : > { %1392 = vmatpush.msra.mxu0 %v853_v27  ;;  %2140 = vmatpush.msra.mxu2 %v1940_v11  ;;  %v850_v27 = vld [vmem:[%s8371_s1 + $0x428] sm:$0xff] }
  0xcb   : > { %2205 = vmatpush.msra.mxu3 %v1956_v63 }
  0xcc   : > { %v1018_v0 = vpop.f32.mrf.mxu2  ;;  %v1083_v5 = vpop.f32.mrf.mxu3  ;;  %1393 = vmatpush.msra.mxu0 %v852_v45 }
  0xcd   : > { %v1019_v10 = vadd.f32 %v1018_v0, %v954_v62  ;;  %v891_v16 = vpop.f32.mrf.mxu0  ;;  %v956_v18 = vpop.f32.mrf.mxu1  ;;  %v851_v62 = vld [vmem:[%s8371_s1 + $0x430] sm:$0xff]  ;;  %2206 = vmatpush.msra.mxu3 %v1955_v21 }
  0xce   : > { %v892_v20 = vadd.f32 %v6482_v17, %v891_v16  ;;  %1394 = vmatpush.msra.mxu0 %v851_v62 }
  0xcf   : > { %v6513_v19 = vadd.f32 %v1083_v5, %v1019_v10  ;;  %2207 = vmatpush.msra.mxu3 %v1954_v44  ;;  %v845_v44 = vld [vmem:[%s8371_s1 + $0x400] sm:$0xff] }
  0xd0   : > { %1150 = vmatmul.f32.gmra.mxu0 %v6219_v33  ;;  %1215 = vmatmul.f32.gmra.mxu1 %v6222_v34  ;;  %v957_v23 = vadd.f32 %v956_v18, %v892_v20  ;;  %v1924_v18 = vld [vmem:[%s8371_s1 + $0x30] sm:$0xff] }
  0xd1   : > { %1280 = vmatmul.f32.gmra.mxu2 %v6225_v35  ;;  %1345 = vmatmul.f32.gmra.mxu3 %v6269_v47 }
  0xd2   : > { %2075 = vmatpush.msra.mxu1 %v1924_v18  ;;  %1395 = vmatpush.msra.mxu0 %v850_v27  ;;  %v1920_v27 = vld [vmem:[%s8371_s1 + $0x10] sm:$0xff] }
  0xd3   : > { %2208 = vmatpush.msra.mxu3 %v1953_v3 }
  0xd4   : > { %v1021_v22 = vpop.f32.mrf.mxu2  ;;  %v1086_v24 = vpop.f32.mrf.mxu3 }
  0xd5   : > { %v1022_v33 = vadd.f32 %v1021_v22, %v957_v23  ;;  %v894_v25 = vpop.f32.mrf.mxu0  ;;  %v959_v34 = vpop.f32.mrf.mxu1  ;;  %v1939_v23 = vld [vmem:[%s8371_s1 + $0xa8] sm:$0xff] }
  0xd6   : > { %v895_v26 = vadd.f32 %v6482_v17, %v894_v25  ;;  %2141 = vmatpush.msra.mxu2 %v1939_v23 }
  0xd7   : > { %v6526_v35 = vadd.f32 %v1086_v24, %v1022_v33 }
  0xd8   : > { %1153 = vmatmul.f32.gmra.mxu0 %v6244_v40  ;;  %1218 = vmatmul.f32.gmra.mxu1 %v6247_v41  ;;  %v960_v37 = vadd.f32 %v959_v34, %v895_v26  ;;  %v1923_v34 = vld [vmem:[%s8371_s1 + $0x28] sm:$0xff] }
  0xd9   : > { %1283 = vmatmul.f32.gmra.mxu2 %v6250_v42  ;;  %1348 = vmatmul.f32.gmra.mxu3 %v6294_v57 }
  0xda   : > { %2076 = vmatpush.msra.mxu1 %v1923_v34  ;;  %2142 = vmatpush.msra.mxu2 %v1938_v29 }
  0xdc   : > { %v1024_v40 = vpop.f32.mrf.mxu2  ;;  %v1089_v41 = vpop.f32.mrf.mxu3 }
  0xdd   : > { %v1025_v42 = vadd.f32 %v1024_v40, %v960_v37  ;;  %v897_v56 = vpop.f32.mrf.mxu0  ;;  %v962_v46 = vpop.f32.mrf.mxu1  ;;  %v849_v37 = vld [vmem:[%s8371_s1 + $0x420] sm:$0xff] }
  0xde   : > { %v898_v50 = vadd.f32 %v6482_v17, %v897_v56  ;;  %1396 = vmatpush.msra.mxu0 %v849_v37  ;;  %v1934_v37 = vld [vmem:[%s8371_s1 + $0x80] sm:$0xff] }
  0xdf   : > { %v6545_v60 = vadd.f32 %v1089_v41, %v1025_v42  ;;  %v1922_v42 = vld [vmem:[%s8371_s1 + $0x20] sm:$0xff] }
  0xe0   : > { %1156 = vmatmul.f32.gmra.mxu0 %v6269_v47  ;;  %1221 = vmatmul.f32.gmra.mxu1 %v6272_v48  ;;  %v963_v7 = vadd.f32 %v962_v46, %v898_v50  ;;  %v1937_v46 = vld [vmem:[%s8371_s1 + $0x98] sm:$0xff] }
  0xe1   : > { %1286 = vmatmul.f32.gmra.mxu2 %v6275_v49  ;;  %1351 = vmatmul.f32.gmra.mxu3 %v6319_v15  ;;  %v848_v50 = vld [vmem:[%s8371_s1 + $0x418] sm:$0xff] }
  0xe2   : > { %2077 = vmatpush.msra.mxu1 %v1922_v42  ;;  %2143 = vmatpush.msra.mxu2 %v1937_v46  ;;  %v1918_v42 = vld [vmem:[%s8371_s1] sm:$0xff]  ;;  %v2013_v46 = vld [vmem:[%s8371_s1 + $0x2f8] sm:$0xff] }
  0xe3   : > { %1397 = vmatpush.msra.mxu0 %v848_v50  ;;  %v1981_v50 = vld [vmem:[%s8371_s1 + $0x1f8] sm:$0xff] }
  0xe4   : > { %v1027_v47 = vpop.f32.mrf.mxu2  ;;  %v1092_v48 = vpop.f32.mrf.mxu3 }
  0xe5   : > { %v1028_v49 = vadd.f32 %v1027_v47, %v963_v7  ;;  %v900_v0 = vpop.f32.mrf.mxu0  ;;  %v965_v5 = vpop.f32.mrf.mxu1  ;;  %v1921_v47 = vld [vmem:[%s8371_s1 + $0x18] sm:$0xff] }
  0xe6   : > { %v901_v10 = vadd.f32 %v6482_v17, %v900_v0  ;;  %v847_v0 = vld [vmem:[%s8371_s1 + $0x410] sm:$0xff]  ;;  %2078 = vmatpush.msra.mxu1 %v1921_v47  ;;  %v1997_v47 = vld [vmem:[%s8371_s1 + $0x278] sm:$0xff] }
  0xe7   : > { %v6564_v16 = vadd.f32 %v1092_v48, %v1028_v49  ;;  %v1936_v49 = vld [vmem:[%s8371_s1 + $0x90] sm:$0xff]  ;;  %1398 = vmatpush.msra.mxu0 %v847_v0 }
  0xe8   : > { %1159 = vmatmul.f32.gmra.mxu0 %v6294_v57  ;;  %1224 = vmatmul.f32.gmra.mxu1 %v6297_v58  ;;  %v966_v20 = vadd.f32 %v965_v5, %v901_v10  ;;  %v1952_v5 = vld [vmem:[%s8371_s1 + $0x110] sm:$0xff] }
  0xe9   : > { %1289 = vmatmul.f32.gmra.mxu2 %v6300_v59  ;;  %1354 = vmatmul.f32.gmra.mxu3 %v6344_v38  ;;  %v1980_v0 = vld [vmem:[%s8371_s1 + $0x1f0] sm:$0xff] }
  0xea   : > { %2144 = vmatpush.msra.mxu2 %v1936_v49  ;;  %2209 = vmatpush.msra.mxu3 %v1952_v5  ;;  %v2012_v49 = vld [vmem:[%s8371_s1 + $0x2f0] sm:$0xff] }
  0xeb   : > { %2079 = vmatpush.msra.mxu1 %v1920_v27  ;;  %v6729_v27 = vld [vmem:[%s6041_s6 + $0xd9] sm:$0xff] }
  0xec   : > { %v1030_v57 = vpop.f32.mrf.mxu2  ;;  %v1095_v58 = vpop.f32.mrf.mxu3 }
  0xed   : > { %v1031_v59 = vadd.f32 %v1030_v57, %v966_v20  ;;  %v903_v22 = vpop.f32.mrf.mxu0  ;;  %v968_v24 = vpop.f32.mrf.mxu1  ;;  %v1935_v57 = vld [vmem:[%s8371_s1 + $0x88] sm:$0xff] }
  0xee   : > { %v904_v33 = vadd.f32 %v6482_v17, %v903_v22  ;;  %2145 = vmatpush.msra.mxu2 %v1935_v57  ;;  %v1996_v57 = vld [vmem:[%s8371_s1 + $0x270] sm:$0xff] }
  0xef   : > { %v6583_v25 = vadd.f32 %v1095_v58, %v1031_v59  ;;  %v846_v58 = vld [vmem:[%s8371_s1 + $0x408] sm:$0xff] }
  0xf0   : > { %1162 = vmatmul.f32.gmra.mxu0 %v6319_v15  ;;  %1227 = vmatmul.f32.gmra.mxu1 %v6322_v28  ;;  %v969_v26 = vadd.f32 %v968_v24, %v904_v33  ;;  %v1951_v59 = vld [vmem:[%s8371_s1 + $0x108] sm:$0xff] }
  0xf1   : > { %1292 = vmatmul.f32.gmra.mxu2 %v6325_v30  ;;  %1357 = vmatmul.f32.gmra.mxu3 %v6369_v51 }
  0xf2   : > { %1399 = vmatpush.msra.mxu0 %v846_v58  ;;  %2210 = vmatpush.msra.mxu3 %v1951_v59  ;;  %v2011_v59 = vld [vmem:[%s8371_s1 + $0x2e8] sm:$0xff] }
  0xf3   : > { %2146 = vmatpush.msra.mxu2 %v1934_v37 }
  0xf4   : > { %v1033_v15 = vpop.f32.mrf.mxu2  ;;  %v1098_v28 = vpop.f32.mrf.mxu3  ;;  %1400 = vmatpush.msra.mxu0 %v845_v44  ;;  %v6754_v44 = vld [vmem:[%s6041_s6 + $0xe0] sm:$0xff] }
  0xf5   : > { %v1034_v30 = vadd.f32 %v1033_v15, %v969_v26  ;;  %v906_v45 = vpop.f32.mrf.mxu0  ;;  %v971_v55 = vpop.f32.mrf.mxu1  ;;  %v1919_v26 = vld [vmem:[%s8371_s1 + $0x8] sm:$0xff]  ;;  %2391 = vmatpush.msrb.mxu2 %v2013_v46 }
  0xf6   : > { %v907_v40 = vadd.f32 %v6482_v17, %v906_v45  ;;  %2080 = vmatpush.msra.mxu1 %v1919_v26  ;;  %2261 = vmatpush.msrb.mxu0 %v1981_v50 }
  0xf7   : > { %v6602_v41 = vadd.f32 %v1098_v28, %v1034_v30  ;;  %2392 = vmatpush.msrb.mxu2 %v2012_v49 }
  0xf8   : > { %1165 = vmatmul.f32.gmra.mxu0 %v6344_v38  ;;  %1230 = vmatmul.f32.gmra.mxu1 %v6347_v39  ;;  %v972_v56 = vadd.f32 %v971_v55, %v907_v40  ;;  %v6679_v55 = vld [vmem:[%s6041_s6 + $0xc1] sm:$0xff] }
  0xf9   : > { %1295 = vmatmul.f32.gmra.mxu2 %v6350_v43  ;;  %1360 = vmatmul.f32.gmra.mxu3 %v6396_v31 }
  0xfa   : > { %2081 = vmatpush.msra.mxu1 %v1918_v42  ;;  %2262 = vmatpush.msrb.mxu0 %v1980_v0  ;;  %v5325_v0 = vld [vmem:[%s6041_s6 + $0x3a] sm:$0xff] }
  0xfb   : > { %2393 = vmatpush.msrb.mxu2 %v2011_v59  ;;  %v5326_v59 = vld [vmem:[%s6041_s6 + $0x4a] sm:$0xff] }
  0xfc   : > { %v1036_v38 = vpop.f32.mrf.mxu2  ;;  %v1101_v39 = vpop.f32.mrf.mxu3  ;;  %2326 = vmatpush.msrb.mxu1 %v1997_v47 }
  0xfd   : > { %v1037_v43 = vadd.f32 %v1036_v38, %v972_v56  ;;  %v909_v7 = vpop.f32.mrf.mxu0  ;;  %v974_v11 = vpop.f32.mrf.mxu1 }
  0xfe   : > { %v910_v62 = vadd.f32 %v6482_v17, %v909_v7  ;;  %2327 = vmatpush.msrb.mxu1 %v1996_v57 }
  0xff   : > { %v6621_v63 = vadd.f32 %v1101_v39, %v1037_v43 }
 0x100   : > { %1168 = vmatmul.f32.gmra.mxu0 %v6369_v51  ;;  %1233 = vmatmul.f32.gmra.mxu1 %v6372_v52  ;;  %v975_v48 = vadd.f32 %v974_v11, %v910_v62  ;;  %v6701_v11 = vld [vmem:[%s6041_s6 + $0xc9] sm:$0xff] }
 0x101   : > { %1298 = vmatmul.f32.gmra.mxu2 %v6375_v53  ;;  %1363 = vmatmul.f32.gmra.mxu3 %v6420_v1 }
 0x104   : > { %v1039_v51 = vpop.f32.mrf.mxu2  ;;  %v1104_v52 = vpop.f32.mrf.mxu3 }
 0x105   : > { %v1040_v53 = vadd.f32 %v1039_v51, %v975_v48  ;;  %v912_v10 = vpop.f32.mrf.mxu0  ;;  %v977_v18 = vpop.f32.mrf.mxu1 }
 0x106   : > { %v913_v20 = vadd.f32 %v6482_v17, %v912_v10  ;;  %v6722_v10 = vld [vmem:[%s6041_s6 + $0xc2] sm:$0xff] }
 0x107   : > { %v6640_v23 = vadd.f32 %v1104_v52, %v1040_v53 }
 0x108   : > { %1171 = vmatmul.f32.gmra.mxu0 %v6396_v31  ;;  %1236 = vmatmul.f32.gmra.mxu1 %v6400_v32  ;;  %v978_v21 = vadd.f32 %v977_v18, %v913_v20  ;;  %v6726_v20 = vld [vmem:[%s6041_s6 + $0xd8] sm:$0xff] }
 0x109   : > { %1301 = vmatmul.f32.gmra.mxu2 %v6403_v36  ;;  %1366 = vmatmul.f32.gmra.mxu3 %v6445_v6 }
 0x10c   : > { %v1042_v31 = vpop.f32.mrf.mxu2  ;;  %v1107_v32 = vpop.f32.mrf.mxu3 }
 0x10d   : > { %v1043_v36 = vadd.f32 %v1042_v31, %v978_v21  ;;  %v915_v22 = vpop.f32.mrf.mxu0  ;;  %v980_v24 = vpop.f32.mrf.mxu1  ;;  %v1979_v31 = vld [vmem:[%s8371_s1 + $0x1e8] sm:$0xff] }
 0x10e   : > { %v916_v33 = vadd.f32 %v6482_v17, %v915_v22  ;;  %2263 = vmatpush.msrb.mxu0 %v1979_v31 }
 0x10f   : > { %v6659_v34 = vadd.f32 %v1107_v32, %v1043_v36  ;;  %v2027_v32 = vld [vmem:[%s8371_s1 + $0x368] sm:$0xff] }
 0x110   : > { %1174 = vmatmul.f32.gmra.mxu0 %v6420_v1  ;;  %1239 = vmatmul.f32.gmra.mxu1 %v6425_v2  ;;  %v981_v29 = vadd.f32 %v980_v24, %v916_v33  ;;  %v1950_v1 = vld [vmem:[%s8371_s1 + $0x100] sm:$0xff] }
 0x111   : > { %1304 = vmatmul.f32.gmra.mxu2 %v6428_v4  ;;  %1369 = vmatmul.f32.gmra.mxu3 %v6464_v12 }
 0x112   : > { %2211 = vmatpush.msra.mxu3 %v1950_v1  ;;  %v6757_v1 = vld [vmem:[%s6041_s6 + $0xe1] sm:$0xff] }
 0x114   : > { %v1045_v2 = vpop.f32.mrf.mxu2  ;;  %v1110_v4 = vpop.f32.mrf.mxu3 }
 0x115   : > { %v1046_v15 = vadd.f32 %v1045_v2, %v981_v29  ;;  %v918_v28 = vpop.f32.mrf.mxu0  ;;  %v983_v30 = vpop.f32.mrf.mxu1  ;;  %v6750_v29 = vld [vmem:[%s6041_s6 + $0xca] sm:$0xff] }
 0x116   : > { %v919_v45 = vadd.f32 %v6482_v17, %v918_v28  ;;  %v1978_v28 = vld [vmem:[%s8371_s1 + $0x1e0] sm:$0xff] }
 0x117   : > { %v6681_v40 = vadd.f32 %v1110_v4, %v1046_v15  ;;  %v1995_v4 = vld [vmem:[%s8371_s1 + $0x268] sm:$0xff]  ;;  %2264 = vmatpush.msrb.mxu0 %v1978_v28 }
 0x118   : > { %1177 = vmatmul.f32.gmra.mxu0 %v6445_v6  ;;  %1242 = vmatmul.f32.gmra.mxu1 %v6450_v8  ;;  %v984_v56 = vadd.f32 %v983_v30, %v919_v45  ;;  %v2029_v6 = vld [vmem:[%s8371_s1 + $0x378] sm:$0xff]  ;;  %v2026_v30 = vld [vmem:[%s8371_s1 + $0x360] sm:$0xff] }
 0x119   : > { %1307 = vmatmul.f32.gmra.mxu2 %v6453_v9  ;;  %1372 = vmatmul.f32.gmra.mxu3 %v6679_v55 }
 0x11a   : > { %2456 = vmatpush.msrb.mxu3 %v2029_v6  ;;  %2328 = vmatpush.msrb.mxu1 %v1995_v4  ;;  %v5324_v6 = vld [vmem:[%s6041_s6 + $0x32] sm:$0xff] }
 0x11c   : > { %v1048_v8 = vpop.f32.mrf.mxu2  ;;  %v1113_v3 = vpop.f32.mrf.mxu3 }
 0x11d   : > { %v1049_v38 = vadd.f32 %v1048_v8, %v984_v56  ;;  %v921_v39 = vpop.f32.mrf.mxu0  ;;  %v986_v43 = vpop.f32.mrf.mxu1 }
 0x11e   : > { %v922_v7 = vadd.f32 %v6482_v17, %v921_v39 }
 0x11f   : > { %v6703_v62 = vadd.f32 %v1113_v3, %v1049_v38  ;;  %v1994_v38 = vld [vmem:[%s8371_s1 + $0x260] sm:$0xff] }
 0x120   : > { %1180 = vmatmul.f32.gmra.mxu0 %v6464_v12  ;;  %1245 = vmatmul.f32.gmra.mxu1 %v6467_v13  ;;  %v987_v48 = vadd.f32 %v986_v43, %v922_v7  ;;  %v2028_v12 = vld [vmem:[%s8371_s1 + $0x370] sm:$0xff]  ;;  %v2009_v43 = vld [vmem:[%s8371_s1 + $0x2d8] sm:$0xff] }
 0x121   : > { %1310 = vmatmul.f32.gmra.mxu2 %v6470_v14  ;;  %1375 = vmatmul.f32.gmra.mxu3 %v6701_v11  ;;  %v2025_v7 = vld [vmem:[%s8371_s1 + $0x358] sm:$0xff] }
 0x122   : > { %2457 = vmatpush.msrb.mxu3 %v2028_v12  ;;  %2329 = vmatpush.msrb.mxu1 %v1994_v38 }
 0x124   : > { %v1051_v13 = vpop.f32.mrf.mxu2  ;;  %v1116_v5 = vpop.f32.mrf.mxu3  ;;  %2458 = vmatpush.msrb.mxu3 %v2027_v32  ;;  %v6818_v32 = vld [vmem:[%s6041_s6 + $0xda] sm:$0xff] }
 0x125   : > { %v1052_v51 = vadd.f32 %v1051_v13, %v987_v48  ;;  %v924_v52 = vpop.f32.mrf.mxu0  ;;  %v989_v53 = vpop.f32.mrf.mxu1 }
 0x126   : > { %v925_v18 = vadd.f32 %v6482_v17, %v924_v52  ;;  %2459 = vmatpush.msrb.mxu3 %v2026_v30  ;;  %v1976_v52 = vld [vmem:[%s8371_s1 + $0x1d0] sm:$0xff] }
 0x127   : > { %v6731_v21 = vadd.f32 %v1116_v5, %v1052_v51  ;;  %v1993_v5 = vld [vmem:[%s8371_s1 + $0x258] sm:$0xff] }
 0x128   : > { %1183 = vmatmul.f32.gmra.mxu0 %v6679_v55  ;;  %1248 = vmatmul.f32.gmra.mxu1 %v6722_v10  ;;  %v990_v58 = vadd.f32 %v989_v53, %v925_v18  ;;  %v2024_v53 = vld [vmem:[%s8371_s1 + $0x350] sm:$0xff] }
 0x129   : > { %1313 = vmatmul.f32.gmra.mxu2 %v6726_v20  ;;  %1378 = vmatmul.f32.gmra.mxu3 %v6729_v27  ;;  %v5327_v30 = vld [vmem:[%s6041_s6 + $0x52] sm:$0xff] }
 0x12a   : > { %2460 = vmatpush.msrb.mxu3 %v2025_v7  ;;  %2330 = vmatpush.msrb.mxu1 %v1993_v5 }
 0x12c   : > { %v1054_v36 = vpop.f32.mrf.mxu2  ;;  %v1119_v22 = vpop.f32.mrf.mxu3  ;;  %2461 = vmatpush.msrb.mxu3 %v2024_v53 }
 0x12d   : > { %v1055_v24 = vadd.f32 %v1054_v36, %v990_v58  ;;  %v927_v33 = vpop.f32.mrf.mxu0  ;;  %v992_v26 = vpop.f32.mrf.mxu1 }
 0x12e   : > { %v928_v37 = vadd.f32 %v6482_v17, %v927_v33  ;;  %v2010_v17 = vld [vmem:[%s8371_s1 + $0x2e0] sm:$0xff]  ;;  %v1975_v33 = vld [vmem:[%s8371_s1 + $0x1c8] sm:$0xff] }
 0x12f   : > { %v6759_v2 = vadd.f32 %v1119_v22, %v1055_v24  ;;  %2394 = vmatpush.msrb.mxu2 %v2010_v17  ;;  %v1992_v22 = vld [vmem:[%s8371_s1 + $0x250] sm:$0xff] }
 0x130   : > { %1186 = vmatmul.f32.gmra.mxu0 %v6701_v11  ;;  %1251 = vmatmul.f32.gmra.mxu1 %v6750_v29  ;;  %v993_v15 = vadd.f32 %v992_v26, %v928_v37  ;;  %v2023_v26 = vld [vmem:[%s8371_s1 + $0x348] sm:$0xff] }
 0x131   : > { %1316 = vmatmul.f32.gmra.mxu2 %v6754_v44  ;;  %1381 = vmatmul.f32.gmra.mxu3 %v6757_v1 }
 0x132   : > { %2395 = vmatpush.msrb.mxu2 %v2009_v43  ;;  %2331 = vmatpush.msrb.mxu1 %v1992_v22  ;;  %v6896_v22 = vld [vmem:[%s6041_s6 + $0xfa] sm:$0xff] }
 0x133   : > { %2462 = vmatpush.msrb.mxu3 %v2023_v26  ;;  %v1972_v26 = vld [vmem:[%s8371_s1 + $0x1b0] sm:$0xff] }
 0x134   : > { %v1057_v45 = vpop.f32.mrf.mxu2  ;;  %v1122_v42 = vpop.f32.mrf.mxu3 }
 0x135   : > { %v1058_v56 = vadd.f32 %v1057_v45, %v993_v15  ;;  %v1142_v46 = vpop.f32.mrf.mxu0  ;;  %v1207_v50 = vpop.f32.mrf.mxu1 }
 0x136   : > { %v1143_v8 = vadd.f32 %v1142_v46, %v6493_v54  ;;  %v1977_v54 = vld [vmem:[%s8371_s1 + $0x1d8] sm:$0xff]  ;;  %v1991_v46 = vld [vmem:[%s8371_s1 + $0x248] sm:$0xff] }
 0x137   : > { %v6779_v3 = vadd.f32 %v1122_v42, %v1058_v56  ;;  %2265 = vmatpush.msrb.mxu0 %v1977_v54  ;;  %v6840_v42 = vld [vmem:[%s6041_s6 + $0xe2] sm:$0xff]  ;;  %2332 = vmatpush.msrb.mxu1 %v1991_v46 }
 0x138   : > { %v1208_v39 = vadd.f32 %v1207_v50, %v1143_v8  ;;  %1401 = vmatmul.f32.vlgmr.msra.gmra.mxu0 %v5324_v6  ;;  %2082 = vmatmul.f32.vlgmr.msra.gmra.mxu1 %v6453_v9  ;;  %v1974_v6 = vld [vmem:[%s8371_s1 + $0x1c0] sm:$0xff]  ;;  %v6917_v46 = vld [vmem:[%s6041_s6 + $0x108] sm:$0xff] }
 0x139   : > { %2147 = vmatmul.f32.vlgmr.msra.gmra.mxu2 %v6679_v55  ;;  %2212 = vmatmul.f32.vlgmr.msra.gmra.mxu3 %v6722_v10  ;;  %v2022_v8 = vld [vmem:[%s8371_s1 + $0x340] sm:$0xff] }
 0x13a   : > { %2266 = vmatpush.msrb.mxu0 %v1976_v52  ;;  %2463 = vmatpush.msrb.mxu3 %v2022_v8 }
 0x13c   : > { %v1272_v9 = vpop.f32.mrf.mxu2  ;;  %v1337_v55 = vpop.f32.mrf.mxu3  ;;  %2267 = vmatpush.msrb.mxu0 %v1975_v33 }
 0x13d   : > { %v1273_v47 = vadd.f32 %v1272_v9, %v1208_v39  ;;  %v1145_v48 = vpop.f32.mrf.mxu0  ;;  %v1210_v49 = vpop.f32.mrf.mxu1  ;;  %v5328_v9 = vld [vmem:[%s6041_s6 + $0x62] sm:$0xff] }
 0x13e   : > { %v1146_v12 = vadd.f32 %v1145_v48, %v6503_v61  ;;  %v2008_v61 = vld [vmem:[%s8371_s1 + $0x2d0] sm:$0xff]  ;;  %2268 = vmatpush.msrb.mxu0 %v1974_v6 }
 0x13f   : > { %v6798_v13 = vadd.f32 %v1337_v55, %v1273_v47  ;;  %2396 = vmatpush.msrb.mxu2 %v2008_v61  ;;  %v6861_v55 = vld [vmem:[%s6041_s6 + $0xf0] sm:$0xff]  ;;  %v2021_v61 = vld [vmem:[%s8371_s1 + $0x338] sm:$0xff] }
 0x140   : > { %v1211_v51 = vadd.f32 %v1210_v49, %v1146_v12  ;;  %1404 = vmatmul.f32.gmra.mxu0 %v5325_v0  ;;  %2085 = vmatmul.f32.gmra.mxu1 %v6470_v14  ;;  %v6865_v48 = vld [vmem:[%s6041_s6 + $0xf1] sm:$0xff]  ;;  %v1990_v12 = vld [vmem:[%s8371_s1 + $0x240] sm:$0xff] }
 0x141   : > { %2150 = vmatmul.f32.gmra.mxu2 %v6701_v11  ;;  %2215 = vmatmul.f32.gmra.mxu3 %v6750_v29  ;;  %v6868_v49 = vld [vmem:[%s6041_s6 + $0xf2] sm:$0xff]  ;;  %v6924_v6 = vld [vmem:[%s6041_s6 + $0x10a] sm:$0xff] }
 0x142   : > { %2333 = vmatpush.msrb.mxu1 %v1990_v12  ;;  %2464 = vmatpush.msrb.mxu3 %v2021_v61 }
 0x144   : > { %v1275_v14 = vpop.f32.mrf.mxu2  ;;  %v1340_v11 = vpop.f32.mrf.mxu3 }
 0x145   : > { %v1276_v18 = vadd.f32 %v1275_v14, %v1211_v51  ;;  %v1148_v57 = vpop.f32.mrf.mxu0  ;;  %v1213_v58 = vpop.f32.mrf.mxu1  ;;  %v1973_v51 = vld [vmem:[%s8371_s1 + $0x1b8] sm:$0xff] }
 0x146   : > { %v1149_v31 = vadd.f32 %v1148_v57, %v6513_v19  ;;  %v2007_v19 = vld [vmem:[%s8371_s1 + $0x2c8] sm:$0xff]  ;;  %2269 = vmatpush.msrb.mxu0 %v1973_v51  ;;  %v6945_v51 = vld [vmem:[%s6041_s6 + $0x110] sm:$0xff] }
 0x147   : > { %v6820_v36 = vadd.f32 %v1340_v11, %v1276_v18  ;;  %2397 = vmatpush.msrb.mxu2 %v2007_v19  ;;  %v5329_v57 = vld [vmem:[%s6041_s6 + $0x6a] sm:$0xff]  ;;  %v1989_v19 = vld [vmem:[%s8371_s1 + $0x238] sm:$0xff] }
 0x148   : > { %v1214_v24 = vadd.f32 %v1213_v58, %v1149_v31  ;;  %1407 = vmatmul.f32.gmra.mxu0 %v5326_v59  ;;  %2088 = vmatmul.f32.gmra.mxu1 %v6726_v20  ;;  %v6889_v58 = vld [vmem:[%s6041_s6 + $0xf8] sm:$0xff] }
 0x149   : > { %2153 = vmatmul.f32.gmra.mxu2 %v6729_v27  ;;  %2218 = vmatmul.f32.gmra.mxu3 %v6818_v32  ;;  %v6893_v31 = vld [vmem:[%s6041_s6 + $0xf9] sm:$0xff] }
 0x14a   : > { %2334 = vmatpush.msrb.mxu1 %v1989_v19  ;;  %2270 = vmatpush.msrb.mxu0 %v1972_v26 }
 0x14c   : > { %v1278_v37 = vpop.f32.mrf.mxu2  ;;  %v1343_v4 = vpop.f32.mrf.mxu3 }
 0x14d   : > { %v1279_v15 = vadd.f32 %v1278_v37, %v1214_v24  ;;  %v1151_v17 = vpop.f32.mrf.mxu0  ;;  %v1216_v28 = vpop.f32.mrf.mxu1  ;;  %v2020_v37 = vld [vmem:[%s8371_s1 + $0x330] sm:$0xff] }
 0x14e   : > { %v1152_v45 = vadd.f32 %v1151_v17, %v6526_v35  ;;  %v2006_v35 = vld [vmem:[%s8371_s1 + $0x2c0] sm:$0xff]  ;;  %2465 = vmatpush.msrb.mxu3 %v2020_v37 }
 0x14f   : > { %v6842_v56 = vadd.f32 %v1343_v4, %v1279_v15  ;;  %2398 = vmatpush.msrb.mxu2 %v2006_v35  ;;  %v6921_v35 = vld [vmem:[%s6041_s6 + $0x109] sm:$0xff] }
 0x150   : > { %v1217_v50 = vadd.f32 %v1216_v28, %v1152_v45  ;;  %1410 = vmatmul.f32.gmra.mxu0 %v5327_v30  ;;  %2091 = vmatmul.f32.gmra.mxu1 %v6754_v44  ;;  %v5330_v45 = vld [vmem:[%s6041_s6 + $0x7a] sm:$0xff] }
 0x151   : > { %2156 = vmatmul.f32.gmra.mxu2 %v6757_v1  ;;  %2221 = vmatmul.f32.gmra.mxu3 %v6840_v42 }
 0x154   : > { %v1281_v38 = vpop.f32.mrf.mxu2  ;;  %v1346_v39 = vpop.f32.mrf.mxu3 }
 0x155   : > { %v1282_v43 = vadd.f32 %v1281_v38, %v1217_v50  ;;  %v1154_v54 = vpop.f32.mrf.mxu0  ;;  %v1219_v7 = vpop.f32.mrf.mxu1  ;;  %v1988_v38 = vld [vmem:[%s8371_s1 + $0x230] sm:$0xff] }
 0x156   : > { %v1155_v47 = vadd.f32 %v1154_v54, %v6545_v60  ;;  %v2005_v60 = vld [vmem:[%s8371_s1 + $0x2b8] sm:$0xff]  ;;  %2335 = vmatpush.msrb.mxu1 %v1988_v38  ;;  %v2019_v54 = vld [vmem:[%s8371_s1 + $0x328] sm:$0xff] }
 0x157   : > { %v6870_v0 = vadd.f32 %v1346_v39, %v1282_v43  ;;  %2399 = vmatpush.msrb.mxu2 %v2005_v60  ;;  %v1971_v43 = vld [vmem:[%s8371_s1 + $0x1a8] sm:$0xff]  ;;  %2466 = vmatpush.msrb.mxu3 %v2019_v54 }
 0x158   : > { %v1220_v5 = vadd.f32 %v1219_v7, %v1155_v47  ;;  %1413 = vmatmul.f32.gmra.mxu0 %v5328_v9  ;;  %2094 = vmatmul.f32.gmra.mxu1 %v6861_v55  ;;  %v5331_v60 = vld [vmem:[%s6041_s6 + $0x82] sm:$0xff] }
 0x159   : > { %2159 = vmatmul.f32.gmra.mxu2 %v6865_v48  ;;  %2224 = vmatmul.f32.gmra.mxu3 %v6868_v49 }
 0x15a   : > { %2271 = vmatpush.msrb.mxu0 %v1971_v43 }
 0x15c   : > { %v1284_v52 = vpop.f32.mrf.mxu2  ;;  %v1349_v53 = vpop.f32.mrf.mxu3 }
 0x15d   : > { %v1285_v14 = vadd.f32 %v1284_v52, %v1220_v5  ;;  %v1157_v11 = vpop.f32.mrf.mxu0  ;;  %v1222_v18 = vpop.f32.mrf.mxu1  ;;  %v6949_v52 = vld [vmem:[%s6041_s6 + $0x111] sm:$0xff] }
 0x15e   : > { %v1158_v59 = vadd.f32 %v1157_v11, %v6564_v16  ;;  %v2004_v16 = vld [vmem:[%s8371_s1 + $0x2b0] sm:$0xff]  ;;  %v1987_v11 = vld [vmem:[%s8371_s1 + $0x228] sm:$0xff] }
 0x15f   : > { %v6898_v24 = vadd.f32 %v1349_v53, %v1285_v14  ;;  %2400 = vmatpush.msrb.mxu2 %v2004_v16  ;;  %v6952_v53 = vld [vmem:[%s6041_s6 + $0x112] sm:$0xff]  ;;  %2336 = vmatpush.msrb.mxu1 %v1987_v11  ;;  %v7008_v11 = vld [vmem:[%s6041_s6 + $0x12a] sm:$0xff] }
 0x160   : > { %v1223_v33 = vadd.f32 %v1222_v18, %v1158_v59  ;;  %1416 = vmatmul.f32.gmra.mxu0 %v5329_v57  ;;  %2097 = vmatmul.f32.gmra.mxu1 %v6889_v58  ;;  %v1970_v57 = vld [vmem:[%s8371_s1 + $0x1a0] sm:$0xff] }
 0x161   : > { %2162 = vmatmul.f32.gmra.mxu2 %v6893_v31  ;;  %2227 = vmatmul.f32.gmra.mxu3 %v6896_v22  ;;  %v2018_v59 = vld [vmem:[%s8371_s1 + $0x320] sm:$0xff] }
 0x162   : > { %2272 = vmatpush.msrb.mxu0 %v1970_v57  ;;  %2467 = vmatpush.msrb.mxu3 %v2018_v59  ;;  %v1968_v59 = vld [vmem:[%s8371_s1 + $0x190] sm:$0xff] }
 0x164   : > { %v1287_v4 = vpop.f32.mrf.mxu2  ;;  %v1352_v15 = vpop.f32.mrf.mxu3 }
 0x165   : > { %v1288_v17 = vadd.f32 %v1287_v4, %v1223_v33  ;;  %v1160_v28 = vpop.f32.mrf.mxu0  ;;  %v1225_v30 = vpop.f32.mrf.mxu1  ;;  %v5332_v4 = vld [vmem:[%s6041_s6 + $0x92] sm:$0xff] }
 0x166   : > { %v1161_v50 = vadd.f32 %v1160_v28, %v6583_v25  ;;  %v2003_v25 = vld [vmem:[%s8371_s1 + $0x2a8] sm:$0xff] }
 0x167   : > { %v6926_v8 = vadd.f32 %v1352_v15, %v1288_v17  ;;  %2401 = vmatpush.msrb.mxu2 %v2003_v25  ;;  %v6973_v15 = vld [vmem:[%s6041_s6 + $0x120] sm:$0xff]  ;;  %v2017_v25 = vld [vmem:[%s8371_s1 + $0x318] sm:$0xff] }
 0x168   : > { %v1226_v39 = vadd.f32 %v1225_v30, %v1161_v50  ;;  %1419 = vmatmul.f32.gmra.mxu0 %v5330_v45  ;;  %2100 = vmatmul.f32.gmra.mxu1 %v6917_v46  ;;  %v6977_v28 = vld [vmem:[%s6041_s6 + $0x121] sm:$0xff] }
 0x169   : > { %2165 = vmatmul.f32.gmra.mxu2 %v6921_v35  ;;  %2230 = vmatmul.f32.gmra.mxu3 %v6924_v6  ;;  %v6980_v30 = vld [vmem:[%s6041_s6 + $0x122] sm:$0xff] }
 0x16a   : > { %v1986_v50 = vld [vmem:[%s8371_s1 + $0x220] sm:$0xff]  ;;  %2468 = vmatpush.msrb.mxu3 %v2017_v25 }
 0x16b   : > { %2337 = vmatpush.msrb.mxu1 %v1986_v50  ;;  %v7029_v50 = vld [vmem:[%s6041_s6 + $0x138] sm:$0xff] }
 0x16c   : > { %v1290_v7 = vpop.f32.mrf.mxu2  ;;  %v1355_v9 = vpop.f32.mrf.mxu3 }
 0x16d   : > { %v1291_v47 = vadd.f32 %v1290_v7, %v1226_v39  ;;  %v1163_v12 = vpop.f32.mrf.mxu0  ;;  %v1228_v5 = vpop.f32.mrf.mxu1  ;;  %v1969_v39 = vld [vmem:[%s8371_s1 + $0x198] sm:$0xff] }
 0x16e   : > { %v1164_v61 = vadd.f32 %v1163_v12, %v6602_v41  ;;  %v2002_v41 = vld [vmem:[%s8371_s1 + $0x2a0] sm:$0xff]  ;;  %2273 = vmatpush.msrb.mxu0 %v1969_v39 }
 0x16f   : > { %v6954_v14 = vadd.f32 %v1355_v9, %v1291_v47  ;;  %2402 = vmatpush.msrb.mxu2 %v2002_v41  ;;  %v5333_v12 = vld [vmem:[%s6041_s6 + $0x9a] sm:$0xff] }
 0x170   : > { %v1229_v18 = vadd.f32 %v1228_v5, %v1164_v61  ;;  %1422 = vmatmul.f32.gmra.mxu0 %v5331_v60  ;;  %2103 = vmatmul.f32.gmra.mxu1 %v6945_v51  ;;  %v7001_v5 = vld [vmem:[%s6041_s6 + $0x128] sm:$0xff]  ;;  %v1985_v41 = vld [vmem:[%s8371_s1 + $0x218] sm:$0xff] }
 0x171   : > { %2168 = vmatmul.f32.gmra.mxu2 %v6949_v52  ;;  %2233 = vmatmul.f32.gmra.mxu3 %v6952_v53  ;;  %v7005_v61 = vld [vmem:[%s6041_s6 + $0x129] sm:$0xff]  ;;  %v7036_v39 = vld [vmem:[%s6041_s6 + $0x13a] sm:$0xff] }
 0x172   : > { %2338 = vmatpush.msrb.mxu1 %v1985_v41  ;;  %2274 = vmatpush.msrb.mxu0 %v1968_v59  ;;  %v7057_v59 = vld [vmem:[%s6041_s6 + $0x140] sm:$0xff] }
 0x174   : > { %v1293_v19 = vpop.f32.mrf.mxu2  ;;  %v1358_v33 = vpop.f32.mrf.mxu3 }
 0x175   : > { %v1294_v16 = vadd.f32 %v1293_v19, %v1229_v18  ;;  %v1166_v26 = vpop.f32.mrf.mxu0  ;;  %v1231_v37 = vpop.f32.mrf.mxu1  ;;  %v2016_v19 = vld [vmem:[%s8371_s1 + $0x310] sm:$0xff] }
 0x176   : > { %v1167_v17 = vadd.f32 %v1166_v26, %v6621_v63  ;;  %v2001_v63 = vld [vmem:[%s8371_s1 + $0x298] sm:$0xff]  ;;  %2469 = vmatpush.msrb.mxu3 %v2016_v19 }
 0x177   : > { %v6982_v45 = vadd.f32 %v1358_v33, %v1294_v16  ;;  %2403 = vmatpush.msrb.mxu2 %v2001_v63  ;;  %v7033_v63 = vld [vmem:[%s6041_s6 + $0x139] sm:$0xff] }
 0x178   : > { %v1232_v38 = vadd.f32 %v1231_v37, %v1167_v17  ;;  %1425 = vmatmul.f32.gmra.mxu0 %v5332_v4  ;;  %2106 = vmatmul.f32.gmra.mxu1 %v6973_v15  ;;  %v5334_v17 = vld [vmem:[%s6041_s6 + $0xaa] sm:$0xff] }
 0x179   : > { %2171 = vmatmul.f32.gmra.mxu2 %v6977_v28  ;;  %2236 = vmatmul.f32.gmra.mxu3 %v6980_v30 }
 0x17c   : > { %v1296_v43 = vpop.f32.mrf.mxu2  ;;  %v1361_v54 = vpop.f32.mrf.mxu3 }
 0x17d   : > { %v1297_v7 = vadd.f32 %v1296_v43, %v1232_v38  ;;  %v1169_v9 = vpop.f32.mrf.mxu0  ;;  %v1234_v47 = vpop.f32.mrf.mxu1  ;;  %v1984_v43 = vld [vmem:[%s8371_s1 + $0x210] sm:$0xff] }
 0x17e   : > { %v1170_v60 = vadd.f32 %v1169_v9, %v6640_v23  ;;  %v2000_v23 = vld [vmem:[%s8371_s1 + $0x290] sm:$0xff]  ;;  %v2015_v9 = vld [vmem:[%s8371_s1 + $0x308] sm:$0xff]  ;;  %2339 = vmatpush.msrb.mxu1 %v1984_v43 }
 0x17f   : > { %v7010_v18 = vadd.f32 %v1361_v54, %v1297_v7  ;;  %2404 = vmatpush.msrb.mxu2 %v2000_v23  ;;  %v1967_v7 = vld [vmem:[%s8371_s1 + $0x188] sm:$0xff]  ;;  %2470 = vmatpush.msrb.mxu3 %v2015_v9  ;;  %v5335_v23 = vld [vmem:[%s6041_s6 + $0xb2] sm:$0xff] }
 0x180   : > { %v1235_v57 = vadd.f32 %v1234_v47, %v1170_v60  ;;  %1428 = vmatmul.f32.gmra.mxu0 %v5333_v12  ;;  %2109 = vmatmul.f32.gmra.mxu1 %v7001_v5 }
 0x181   : > { %2174 = vmatmul.f32.gmra.mxu2 %v7005_v61  ;;  %2239 = vmatmul.f32.gmra.mxu3 %v7008_v11 }
 0x182   : > { %2275 = vmatpush.msrb.mxu0 %v1967_v7 }
 0x184   : > { %v1299_v33 = vpop.f32.mrf.mxu2  ;;  %v1364_v16 = vpop.f32.mrf.mxu3 }
 0x185   : > { %v1300_v26 = vadd.f32 %v1299_v33, %v1235_v57  ;;  %v1172_v37 = vpop.f32.mrf.mxu0  ;;  %v1237_v4 = vpop.f32.mrf.mxu1  ;;  %v7061_v33 = vld [vmem:[%s6041_s6 + $0x141] sm:$0xff] }
 0x186   : > { %v1173_v38 = vadd.f32 %v1172_v37, %v6659_v34  ;;  %v1999_v34 = vld [vmem:[%s8371_s1 + $0x288] sm:$0xff] }
 0x187   : > { %v7038_v25 = vadd.f32 %v1364_v16, %v1300_v26  ;;  %2405 = vmatpush.msrb.mxu2 %v1999_v34  ;;  %v7064_v16 = vld [vmem:[%s6041_s6 + $0x142] sm:$0xff] }
 0x188   : > { %v1238_v54 = vadd.f32 %v1237_v4, %v1173_v38  ;;  %1431 = vmatmul.f32.gmra.mxu0 %v5334_v17  ;;  %2112 = vmatmul.f32.gmra.mxu1 %v7029_v50  ;;  %v1983_v37 = vld [vmem:[%s8371_s1 + $0x208] sm:$0xff]  ;;  %v1966_v17 = vld [vmem:[%s8371_s1 + $0x180] sm:$0xff] }
 0x189   : > { %2177 = vmatmul.f32.gmra.mxu2 %v7033_v63  ;;  %2242 = vmatmul.f32.gmra.mxu3 %v7036_v39  ;;  %v2014_v38 = vld [vmem:[%s8371_s1 + $0x300] sm:$0xff] }
 0x18a   : > { %2340 = vmatpush.msrb.mxu1 %v1983_v37  ;;  %2276 = vmatpush.msrb.mxu0 %v1966_v17  ;;  %v2045_v37 = vld [vmem:[%s8371_s1 + $0x3f8] sm:$0xff] }
 0x18b   : > { %2471 = vmatpush.msrb.mxu3 %v2014_v38 }
 0x18c   : > { %v1302_v47 = vpop.f32.mrf.mxu2  ;;  %v1367_v12 = vpop.f32.mrf.mxu3  ;;  %2521 = vmatpush.msra.mxu0 %v2045_v37  ;;  %v2044_v37 = vld [vmem:[%s8371_s1 + $0x3f0] sm:$0xff] }
 0x18d   : > { %v1303_v60 = vadd.f32 %v1302_v47, %v1238_v54  ;;  %v1175_v41 = vpop.f32.mrf.mxu0  ;;  %v1240_v57 = vpop.f32.mrf.mxu1  ;;  %v7084_v47 = vld [vmem:[%s6041_s6 + $0x150] sm:$0xff] }
 0x18e   : > { %v1176_v19 = vadd.f32 %v1175_v41, %v6681_v40  ;;  %v1998_v40 = vld [vmem:[%s8371_s1 + $0x280] sm:$0xff]  ;;  %v7091_v41 = vld [vmem:[%s6041_s6 + $0x152] sm:$0xff]  ;;  %2522 = vmatpush.msra.mxu0 %v2044_v37 }
 0x18f   : > { %v7066_v26 = vadd.f32 %v1367_v12, %v1303_v60  ;;  %2406 = vmatpush.msrb.mxu2 %v1998_v40  ;;  %v7088_v60 = vld [vmem:[%s6041_s6 + $0x151] sm:$0xff]  ;;  %v5700_v40 = vmov 0.0  }
 0x190   : > { %v1241_v4 = vadd.f32 %v1240_v57, %v1176_v19  ;;  %1434 = vmatmul.f32.gmra.mxu0 %v5335_v23  ;;  %2115 = vmatmul.f32.gmra.mxu1 %v7057_v59  ;;  %v1982_v23 = vld [vmem:[%s8371_s1 + $0x200] sm:$0xff]  ;;  %240 = vst [vmem:[#allocation2] sm:$0xff] %v5700_v40 }
 0x191   : > { %2180 = vmatmul.f32.gmra.mxu2 %v7061_v33  ;;  %2245 = vmatmul.f32.gmra.mxu3 %v7064_v16  ;;  %247 = vst [vmem:[#allocation2] sm:$0x1] %v5700_v40 }
 0x192   : > { %2341 = vmatpush.msrb.mxu1 %v1982_v23  ;;  %241 = vst [vmem:[#allocation2 + $0x8] sm:$0xff] %v5700_v40 }
 0x193   : > { %242 = vst [vmem:[#allocation2 + $0x10] sm:$0x3] %v5700_v40 }
 0x194   : > { %v1305_v43 = vpop.f32.mrf.mxu2  ;;  %v1370_v54 = vpop.f32.mrf.mxu3  ;;  %244 = vst [vmem:[#allocation2 + $0x198] sm:$0xff] %v5700_v40 }
 0x195   : > { %v1306_v34 = vadd.f32 %v1305_v43, %v1241_v4  ;;  %v1178_v7 = vpop.f32.mrf.mxu0  ;;  %v1243_v9 = vpop.f32.mrf.mxu1  ;;  %v3148_v4 = vld [vmem:[#allocation4 + $0xf8] sm:$0xff]  ;;  %245 = vst [vmem:[#allocation2 + $0x1a0] sm:$0xff] %v5700_v40 }
 0x196   : > { %v1179_v12 = vadd.f32 %v1178_v7, %v6703_v62  ;;  %v3132_v62 = vld [vmem:[#allocation4 + $0x78] sm:$0xff]  ;;  %3346 = vmatpush.msra.mxu3 %v3148_v4  ;;  %246 = vst [vmem:[#allocation2 + $0x1a8] sm:$0x3] %v5700_v40  ;;  %v3147_v4 = vld [vmem:[#allocation4 + $0xf0] sm:$0xff] }
 0x197   : > { %v7093_v57 = vadd.f32 %v1370_v54, %v1306_v34  ;;  %3281 = vmatpush.msra.mxu2 %v3132_v62  ;;  %v7108_v34 = vld [vmem:[%s6041_s6 + $0x158] sm:$0xff]  ;;  %248 = vst [vmem:[#allocation2 + $0x18] sm:$0x1] %v5700_v40 }
 0x198   : > { %v1244_v19 = vadd.f32 %v1243_v9, %v1179_v12  ;;  %1437 = vmatmul.f32.gmra.mxu0 %v6722_v10  ;;  %2118 = vmatmul.f32.gmra.mxu1 %v7084_v47  ;;  %v7113_v9 = vld [vmem:[%s6041_s6 + $0x159] sm:$0xff]  ;;  %249 = vst [vmem:[#allocation2 + $0x30] sm:$0x1] %v5700_v40 }
 0x199   : > { %2183 = vmatmul.f32.gmra.mxu2 %v7088_v60  ;;  %2248 = vmatmul.f32.gmra.mxu3 %v7091_v41  ;;  %v7116_v12 = vld [vmem:[%s6041_s6 + $0x15a] sm:$0xff]  ;;  %250 = vst [vmem:[#allocation2 + $0x48] sm:$0x1] %v5700_v40 }
 0x19a   : > { %3347 = vmatpush.msra.mxu3 %v3147_v4  ;;  %251 = vst [vmem:[#allocation2 + $0x60] sm:$0x1] %v5700_v40 }
 0x19b   : > { %252 = vst [vmem:[#allocation2 + $0x78] sm:$0x1] %v5700_v40 }
 0x19c   : > { %v1308_v10 = vpop.f32.mrf.mxu2  ;;  %v1373_v17 = vpop.f32.mrf.mxu3  ;;  %253 = vst [vmem:[#allocation2 + $0x90] sm:$0x1] %v5700_v40 }
 0x19d   : > { %v1309_v38 = vadd.f32 %v1308_v10, %v1244_v19  ;;  %v1181_v43 = vpop.f32.mrf.mxu0  ;;  %v1246_v54 = vpop.f32.mrf.mxu1  ;;  %v2061_v19 = vld [vmem:[%s8371_s1 + $0x478] sm:$0xff]  ;;  %254 = vst [vmem:[#allocation2 + $0xa8] sm:$0x1] %v5700_v40 }
 0x19e   : > { %v1182_v7 = vadd.f32 %v1181_v43, %v6731_v21  ;;  %2586 = vmatpush.msra.mxu1 %v2061_v19  ;;  %v3131_v21 = vld [vmem:[#allocation4 + $0x70] sm:$0xff]  ;;  %v7143_v19 = vld [vmem:[%s6041_s6 + $0x169] sm:$0xff]  ;;  %255 = vst [vmem:[#allocation2 + $0xc0] sm:$0x1] %v5700_v40 }
 0x19f   : > { %v7119_v23 = vadd.f32 %v1373_v17, %v1309_v38  ;;  %3282 = vmatpush.msra.mxu2 %v3131_v21  ;;  %8381 = vst [vmem:[#allocation10_spill] sm:$0xff] %v7143_v19  ;;  %v7146_v21 = vld [vmem:[%s6041_s6 + $0x16a] sm:$0xff] }
 0x1a0   : > { %v1247_v62 = vadd.f32 %v1246_v54, %v1182_v7  ;;  %1440 = vmatmul.f32.gmra.mxu0 %v6750_v29  ;;  %2121 = vmatmul.f32.gmra.mxu1 %v7108_v34  ;;  %v7138_v54 = vld [vmem:[%s6041_s6 + $0x168] sm:$0xff]  ;;  %8382 = vst [vmem:[#allocation11_spill] sm:$0xff] %v7146_v21 }
 0x1a1   : > { %2186 = vmatmul.f32.gmra.mxu2 %v7113_v9  ;;  %2251 = vmatmul.f32.gmra.mxu3 %v7116_v12  ;;  %256 = vst [vmem:[#allocation2 + $0xd8] sm:$0x1] %v5700_v40 }
 0x1a2   : > { %257 = vst [vmem:[#allocation2 + $0xf0] sm:$0x1] %v5700_v40 }
 0x1a3   : > { %258 = vst [vmem:[#allocation2 + $0x108] sm:$0x1] %v5700_v40 }
 0x1a4   : > { %v1311_v29 = vpop.f32.mrf.mxu2  ;;  %v1376_v10 = vpop.f32.mrf.mxu3  ;;  %259 = vst [vmem:[#allocation2 + $0x120] sm:$0x1] %v5700_v40 }
 0x1a5   : > { %v1312_v17 = vadd.f32 %v1311_v29, %v1247_v62  ;;  %v1184_v38 = vpop.f32.mrf.mxu0  ;;  %v1249_v43 = vpop.f32.mrf.mxu1  ;;  %v2060_v62 = vld [vmem:[%s8371_s1 + $0x470] sm:$0xff]  ;;  %v2043_v29 = vld [vmem:[%s8371_s1 + $0x3e8] sm:$0xff]  ;;  %260 = vst [vmem:[#allocation2 + $0x138] sm:$0x1] %v5700_v40 }
 0x1a6   : > { %v1185_v7 = vadd.f32 %v1184_v38, %v6759_v2  ;;  %2587 = vmatpush.msra.mxu1 %v2060_v62  ;;  %v3130_v2 = vld [vmem:[#allocation4 + $0x68] sm:$0xff]  ;;  %2523 = vmatpush.msra.mxu0 %v2043_v29  ;;  %261 = vst [vmem:[#allocation2 + $0x150] sm:$0x1] %v5700_v40 }
 0x1a7   : > { %v7149_v37 = vadd.f32 %v1376_v10, %v1312_v17  ;;  %v3146_v10 = vld [vmem:[#allocation4 + $0xe8] sm:$0xff]  ;;  %3283 = vmatpush.msra.mxu2 %v3130_v2  ;;  %262 = vst [vmem:[#allocation2 + $0x168] sm:$0x1] %v5700_v40 }
 0x1a8   : > { %v1250_v4 = vadd.f32 %v1249_v43, %v1185_v7  ;;  %1443 = vmatmul.f32.gmra.mxu0 %v6818_v32  ;;  %2124 = vmatmul.f32.gmra.mxu1 %v7138_v54  ;;  %v7176_v2 = vld [vmem:[%s6041_s6 + $0x172] sm:$0xff]  ;;  %263 = vst [vmem:[#allocation2 + $0x180] sm:$0x1] %v5700_v40 }
 0x1a9   : > { %8383 = vst [vmem:[#allocation12_spill] sm:$0xff] %v7149_v37  ;;  %2189 = vmatmul.f32.gmra.mxu2 %v7143_v19  ;;  %2254 = vmatmul.f32.gmra.mxu3 %v7146_v21  ;;  %v7168_v37 = vld [vmem:[%s6041_s6 + $0x170] sm:$0xff] }
 0x1aa   : > { %3348 = vmatpush.msra.mxu3 %v3146_v10  ;;  %v7173_v19 = vld [vmem:[%s6041_s6 + $0x171] sm:$0xff]  ;;  %266 = vst [vmem:[#allocation2 + $0x29] sm:$0x1] %v5700_v40 }
 0x1ab   : > { %267 = vst [vmem:[#allocation2 + $0x41] sm:$0x1] %v5700_v40 }
 0x1ac   : > { %v1314_v17 = vpop.f32.mrf.mxu2  ;;  %v1379_v38 = vpop.f32.mrf.mxu3  ;;  %268 = vst [vmem:[#allocation2 + $0x59] sm:$0x1] %v5700_v40 }
 0x1ad   : > { %v1315_v43 = vadd.f32 %v1314_v17, %v1250_v4  ;;  %v1187_v7 = vpop.f32.mrf.mxu0  ;;  %v1252_v62 = vpop.f32.mrf.mxu1  ;;  %v2059_v4 = vld [vmem:[%s8371_s1 + $0x468] sm:$0xff]  ;;  %v2042_v17 = vld [vmem:[%s8371_s1 + $0x3e0] sm:$0xff]  ;;  %269 = vst [vmem:[#allocation2 + $0x71] sm:$0x1] %v5700_v40 }
 0x1ae   : > { %v1188_v21 = vadd.f32 %v1187_v7, %v6779_v3  ;;  %2588 = vmatpush.msra.mxu1 %v2059_v4  ;;  %v3129_v3 = vld [vmem:[#allocation4 + $0x60] sm:$0xff]  ;;  %2524 = vmatpush.msra.mxu0 %v2042_v17  ;;  %v7200_v4 = vld [vmem:[%s8372_s2] ss:$0 sm:$0xff]  ;;  %270 = vst [vmem:[#allocation2 + $0x89] sm:$0x1] %v5700_v40 }
 0x1af   : > { %v7179_v29 = vadd.f32 %v1379_v38, %v1315_v43  ;;  %v3145_v38 = vld [vmem:[#allocation4 + $0xe0] sm:$0xff]  ;;  %3284 = vmatpush.msra.mxu2 %v3129_v3  ;;  %271 = vst [vmem:[#allocation2 + $0xa1] sm:$0x1] %v5700_v40 }
 0x1b0   : > { %v1253_v10 = vadd.f32 %v1252_v62, %v1188_v21  ;;  %1446 = vmatmul.f32.gmra.mxu0 %v6840_v42  ;;  %2127 = vmatmul.f32.gmra.mxu1 %v7168_v37  ;;  %272 = vst [vmem:[#allocation2 + $0xb9] sm:$0x1] %v5700_v40 }
 0x1b1   : > { %8384 = vst [vmem:[#allocation13_spill] sm:$0xff] %v7179_v29  ;;  %2192 = vmatmul.f32.gmra.mxu2 %v7173_v19  ;;  %2257 = vmatmul.f32.gmra.mxu3 %v7176_v2 }
 0x1b2   : > { %3349 = vmatpush.msra.mxu3 %v3145_v38  ;;  %v2058_v38 = vld [vmem:[%s8371_s1 + $0x460] sm:$0xff]  ;;  %273 = vst [vmem:[#allocation2 + $0xd1] sm:$0x1] %v5700_v40 }
 0x1b3   : > { %2589 = vmatpush.msra.mxu1 %v2058_v38  ;;  %274 = vst [vmem:[#allocation2 + $0xe9] sm:$0x1] %v5700_v40 }
 0x1b4   : > { %v1317_v21 = vpop.f32.mrf.mxu2  ;;  %v1382_v43 = vpop.f32.mrf.mxu3  ;;  %275 = vst [vmem:[#allocation2 + $0x101] sm:$0x1] %v5700_v40 }
 0x1b5   : > { %v1318_v7 = vadd.f32 %v1317_v21, %v1253_v10  ;;  %v1402_v62 = vpop.f32.mrf.mxu0  ;;  %v2083_v29 = vpop.f32.mrf.mxu1  ;;  %276 = vst [vmem:[#allocation2 + $0x119] sm:$0x1] %v5700_v40 }
 0x1b6   : > { %v1403_v3 = vadd.f32 %v1402_v62, %v6798_v13  ;;  %v2084_v21 = vadd.f32 %v7200_v4, %v2083_v29  ;;  %v3128_v13 = vld [vmem:[#allocation4 + $0x58] sm:$0xff]  ;;  %277 = vst [vmem:[#allocation2 + $0x131] sm:$0x1] %v5700_v40 }
 0x1b7   : > { %v7205_v17 = vadd.f32 %v1382_v43, %v1318_v7  ;;  %v2041_v43 = vld [vmem:[%s8371_s1 + $0x3d8] sm:$0xff]  ;;  %3285 = vmatpush.msra.mxu2 %v3128_v13  ;;  %278 = vst [vmem:[#allocation2 + $0x149] sm:$0x1] %v5700_v40 }
 0x1b8   : > { %v1450_v10 = vmax.f32 %v1403_v3, 0.0  ;;  %2277 = vmatmul.f32.vlgmr.msrb.gmra.mxu0 %v6726_v20  ;;  %2342 = vmatmul.f32.vlgmr.msrb.gmra.mxu1 %v6729_v27  ;;  %v3144_v20 = vld [vmem:[#allocation4 + $0xd8] sm:$0xff]  ;;  %279 = vst [vmem:[#allocation2 + $0x161] sm:$0x1] %v5700_v40 }
 0x1b9   : > { %2407 = vmatmul.f32.vlgmr.msrb.gmra.mxu2 %v6818_v32  ;;  %2472 = vmatmul.f32.vlgmr.msrb.gmra.mxu3 %v6861_v55  ;;  %280 = vst [vmem:[#allocation2 + $0x179] sm:$0x1] %v5700_v40 }
 0x1ba   : > { %1467 = vst [vmem:[#allocation2 + $0x19] sm:$0xff] %v1450_v10  ;;  %2525 = vmatpush.msra.mxu0 %v2041_v43  ;;  %3350 = vmatpush.msra.mxu3 %v3144_v20  ;;  %v2057_v10 = vld [vmem:[%s8371_s1 + $0x458] sm:$0xff] }
 0x1bb   : > { %2590 = vmatpush.msra.mxu1 %v2057_v10  ;;  %281 = vst [vmem:[#allocation2 + $0x191] sm:$0x1] %v5700_v40 }
 0x1bc   : > { %v2148_v27 = vpop.f32.mrf.mxu2  ;;  %v2213_v29 = vpop.f32.mrf.mxu3  ;;  %264 = vst [vmem:[#allocation2 + $0x198] sm:$0x1] %v5700_v40 }
 0x1bd   : > { %v2149_v32 = vadd.f32 %v2148_v27, %v2084_v21  ;;  %v1405_v7 = vpop.f32.mrf.mxu0  ;;  %v2086_v62 = vpop.f32.mrf.mxu1  ;;  %v3127_v21 = vld [vmem:[#allocation4 + $0x50] sm:$0xff]  ;;  %265 = vst [vmem:[#allocation2 + $0x11] sm:$0x1] %v5700_v40 }
 0x1be   : > { %v7225_v3 = vadd.f32 %v1405_v7, %v6820_v36  ;;  %v2087_v36 = vadd.f32 %v7200_v4, %v2086_v62  ;;  %3286 = vmatpush.msra.mxu2 %v3127_v21  ;;  %282 = vst [vmem:[#allocation2 + $0x1a9] sm:$0x1] %v5700_v40  ;;  %v2056_v62 = vld [vmem:[%s8371_s1 + $0x450] sm:$0xff]  ;;  %v2039_v21 = vld [vmem:[%s8371_s1 + $0x3c8] sm:$0xff] }
 0x1bf   : > { %v7228_v38 = vadd.f32 %v2213_v29, %v2149_v32  ;;  %2591 = vmatpush.msra.mxu1 %v2056_v62 }
 0x1c0   : > { %v1451_v13 = vmax.f32 %v7225_v3, 0.0  ;;  %2280 = vmatmul.f32.gmra.mxu0 %v6754_v44  ;;  %2345 = vmatmul.f32.gmra.mxu1 %v6757_v1  ;;  %v2040_v44 = vld [vmem:[%s8371_s1 + $0x3d0] sm:$0xff]  ;;  %v3143_v1 = vld [vmem:[#allocation4 + $0xd0] sm:$0xff] }
 0x1c1   : > { %2410 = vmatmul.f32.gmra.mxu2 %v6840_v42  ;;  %2475 = vmatmul.f32.gmra.mxu3 %v6889_v58  ;;  %v3173_v3 = vld [vmem:[#allocation4 + $0x1c0] sm:$0xff] }
 0x1c2   : > { %1468 = vst [vmem:[#allocation2 + $0x21] sm:$0xff] %v1451_v13  ;;  %2526 = vmatpush.msra.mxu0 %v2040_v44  ;;  %3351 = vmatpush.msra.mxu3 %v3143_v1  ;;  %v3142_v44 = vld [vmem:[#allocation4 + $0xc8] sm:$0xff] }
 0x1c4   : > { %v2151_v43 = vpop.f32.mrf.mxu2  ;;  %v2216_v42 = vpop.f32.mrf.mxu3  ;;  %2527 = vmatpush.msra.mxu0 %v2039_v21  ;;  %3352 = vmatpush.msra.mxu3 %v3142_v44 }
 0x1c5   : > { %v2152_v20 = vadd.f32 %v2151_v43, %v2087_v36  ;;  %v1408_v27 = vpop.f32.mrf.mxu0  ;;  %v2089_v29 = vpop.f32.mrf.mxu1 }
 0x1c6   : > { %v7251_v32 = vadd.f32 %v1408_v27, %v6842_v56  ;;  %v2090_v36 = vadd.f32 %v7200_v4, %v2089_v29  ;;  %v3126_v56 = vld [vmem:[#allocation4 + $0x48] sm:$0xff]  ;;  %v2055_v27 = vld [vmem:[%s8371_s1 + $0x448] sm:$0xff] }
 0x1c7   : > { %v7254_v7 = vadd.f32 %v2216_v42, %v2152_v20  ;;  %3287 = vmatpush.msra.mxu2 %v3126_v56  ;;  %2592 = vmatpush.msra.mxu1 %v2055_v27  ;;  %v3141_v56 = vld [vmem:[#allocation4 + $0xc0] sm:$0xff]  ;;  %v2037_v27 = vld [vmem:[%s8371_s1 + $0x3b8] sm:$0xff] }
 0x1c8   : > { %v1452_v10 = vmax.f32 %v7251_v32, 0.0  ;;  %2283 = vmatmul.f32.gmra.mxu0 %v6861_v55  ;;  %2348 = vmatmul.f32.gmra.mxu1 %v6865_v48  ;;  %v3172_v32 = vld [vmem:[#allocation4 + $0x1b8] sm:$0xff] }
 0x1c9   : > { %2413 = vmatmul.f32.gmra.mxu2 %v6868_v49  ;;  %2478 = vmatmul.f32.gmra.mxu3 %v6917_v46 }
 0x1ca   : > { %1469 = vst [vmem:[#allocation2 + $0x31] sm:$0xff] %v1452_v10  ;;  %3353 = vmatpush.msra.mxu3 %v3141_v56 }
 0x1cc   : > { %v2154_v55 = vpop.f32.mrf.mxu2  ;;  %v2219_v48 = vpop.f32.mrf.mxu3 }
 0x1cd   : > { %v2155_v1 = vadd.f32 %v2154_v55, %v2090_v36  ;;  %v1411_v43 = vpop.f32.mrf.mxu0  ;;  %v2092_v49 = vpop.f32.mrf.mxu1  ;;  %v2038_v36 = vld [vmem:[%s8371_s1 + $0x3c0] sm:$0xff] }
 0x1ce   : > { %v7271_v42 = vadd.f32 %v1411_v43, %v6870_v0  ;;  %v2093_v62 = vadd.f32 %v7200_v4, %v2092_v49  ;;  %v3125_v0 = vld [vmem:[#allocation4 + $0x40] sm:$0xff]  ;;  %2528 = vmatpush.msra.mxu0 %v2038_v36 }
 0x1cf   : > { %v7273_v20 = vadd.f32 %v2219_v48, %v2155_v1  ;;  %3288 = vmatpush.msra.mxu2 %v3125_v0  ;;  %v2054_v1 = vld [vmem:[%s8371_s1 + $0x440] sm:$0xff] }
 0x1d0   : > { %v1453_v29 = vmax.f32 %v7271_v42, 0.0  ;;  %2286 = vmatmul.f32.gmra.mxu0 %v6889_v58  ;;  %2351 = vmatmul.f32.gmra.mxu1 %v6893_v31  ;;  %v3171_v42 = vld [vmem:[#allocation4 + $0x1b0] sm:$0xff] }
 0x1d1   : > { %2416 = vmatmul.f32.gmra.mxu2 %v6896_v22  ;;  %2481 = vmatmul.f32.gmra.mxu3 %v6945_v51 }
 0x1d2   : > { %1470 = vst [vmem:[#allocation2 + $0x39] sm:$0xff] %v1453_v29  ;;  %2593 = vmatpush.msra.mxu1 %v2054_v1  ;;  %2529 = vmatpush.msra.mxu0 %v2037_v27  ;;  %v3139_v1 = vld [vmem:[#allocation4 + $0xb0] sm:$0xff] }
 0x1d4   : > { %v2157_v58 = vpop.f32.mrf.mxu2  ;;  %v2222_v31 = vpop.f32.mrf.mxu3 }
 0x1d5   : > { %v2158_v21 = vadd.f32 %v2157_v58, %v2093_v62  ;;  %v1414_v44 = vpop.f32.mrf.mxu0  ;;  %v2095_v22 = vpop.f32.mrf.mxu1  ;;  %v3140_v62 = vld [vmem:[#allocation4 + $0xb8] sm:$0xff] }
 0x1d6   : > { %v7290_v55 = vadd.f32 %v1414_v44, %v6898_v24  ;;  %v2096_v49 = vadd.f32 %v7200_v4, %v2095_v22  ;;  %v3124_v24 = vld [vmem:[#allocation4 + $0x38] sm:$0xff]  ;;  %3354 = vmatpush.msra.mxu3 %v3140_v62  ;;  %v2036_v22 = vld [vmem:[%s8371_s1 + $0x3b0] sm:$0xff] }
 0x1d7   : > { %v7292_v48 = vadd.f32 %v2222_v31, %v2158_v21  ;;  %3289 = vmatpush.msra.mxu2 %v3124_v24  ;;  %v2053_v31 = vld [vmem:[%s8371_s1 + $0x438] sm:$0xff]  ;;  %2530 = vmatpush.msra.mxu0 %v2036_v22 }
 0x1d8   : > { %v1454_v43 = vmax.f32 %v7290_v55, 0.0  ;;  %2289 = vmatmul.f32.gmra.mxu0 %v6917_v46  ;;  %2354 = vmatmul.f32.gmra.mxu1 %v6921_v35  ;;  %v3170_v55 = vld [vmem:[#allocation4 + $0x1a8] sm:$0xff] }
 0x1d9   : > { %2419 = vmatmul.f32.gmra.mxu2 %v6924_v6  ;;  %2484 = vmatmul.f32.gmra.mxu3 %v6973_v15 }
 0x1da   : > { %1471 = vst [vmem:[#allocation2 + $0x49] sm:$0xff] %v1454_v43  ;;  %2594 = vmatpush.msra.mxu1 %v2053_v31  ;;  %3355 = vmatpush.msra.mxu3 %v3139_v1  ;;  %v2051_v1 = vld [vmem:[%s8371_s1 + $0x428] sm:$0xff] }
 0x1dc   : > { %v2160_v46 = vpop.f32.mrf.mxu2  ;;  %v2225_v35 = vpop.f32.mrf.mxu3 }
 0x1dd   : > { %v2161_v0 = vadd.f32 %v2160_v46, %v2096_v49  ;;  %v1417_v36 = vpop.f32.mrf.mxu0  ;;  %v2098_v6 = vpop.f32.mrf.mxu1  ;;  %v2052_v46 = vld [vmem:[%s8371_s1 + $0x430] sm:$0xff] }
 0x1de   : > { %v7309_v56 = vadd.f32 %v1417_v36, %v6926_v8  ;;  %v2099_v44 = vadd.f32 %v7200_v4, %v2098_v6  ;;  %v3123_v8 = vld [vmem:[#allocation4 + $0x30] sm:$0xff]  ;;  %2595 = vmatpush.msra.mxu1 %v2052_v46  ;;  %v2035_v36 = vld [vmem:[%s8371_s1 + $0x3a8] sm:$0xff]  ;;  %v3138_v6 = vld [vmem:[#allocation4 + $0xa8] sm:$0xff] }
 0x1df   : > { %v7311_v58 = vadd.f32 %v2225_v35, %v2161_v0  ;;  %3290 = vmatpush.msra.mxu2 %v3123_v8  ;;  %2531 = vmatpush.msra.mxu0 %v2035_v36  ;;  %v2050_v36 = vld [vmem:[%s8371_s1 + $0x420] sm:$0xff] }
 0x1e0   : > { %v1455_v21 = vmax.f32 %v7309_v56, 0.0  ;;  %2292 = vmatmul.f32.gmra.mxu0 %v6945_v51  ;;  %2357 = vmatmul.f32.gmra.mxu1 %v6949_v52  ;;  %v3169_v56 = vld [vmem:[#allocation4 + $0x1a0] sm:$0xff] }
 0x1e1   : > { %2422 = vmatmul.f32.gmra.mxu2 %v6952_v53  ;;  %2487 = vmatmul.f32.gmra.mxu3 %v7001_v5 }
 0x1e2   : > { %1472 = vst [vmem:[#allocation2 + $0x51] sm:$0xff] %v1455_v21  ;;  %3356 = vmatpush.msra.mxu3 %v3138_v6  ;;  %2596 = vmatpush.msra.mxu1 %v2051_v1 }
 0x1e4   : > { %v2163_v51 = vpop.f32.mrf.mxu2  ;;  %v2228_v52 = vpop.f32.mrf.mxu3  ;;  %2597 = vmatpush.msra.mxu1 %v2050_v36 }
 0x1e5   : > { %v2164_v49 = vadd.f32 %v2163_v51, %v2099_v44  ;;  %v1420_v24 = vpop.f32.mrf.mxu0  ;;  %v2101_v53 = vpop.f32.mrf.mxu1 }
 0x1e6   : > { %v7328_v27 = vadd.f32 %v1420_v24, %v6954_v14  ;;  %v2102_v0 = vadd.f32 %v7200_v4, %v2101_v53  ;;  %v3122_v14 = vld [vmem:[#allocation4 + $0x28] sm:$0xff]  ;;  %v3137_v24 = vld [vmem:[#allocation4 + $0xa0] sm:$0xff] }
 0x1e7   : > { %v7330_v62 = vadd.f32 %v2228_v52, %v2164_v49  ;;  %3291 = vmatpush.msra.mxu2 %v3122_v14  ;;  %v2034_v49 = vld [vmem:[%s8371_s1 + $0x3a0] sm:$0xff]  ;;  %3357 = vmatpush.msra.mxu3 %v3137_v24 }
 0x1e8   : > { %v1456_v35 = vmax.f32 %v7328_v27, 0.0  ;;  %2295 = vmatmul.f32.gmra.mxu0 %v6973_v15  ;;  %2360 = vmatmul.f32.gmra.mxu1 %v6977_v28  ;;  %v3168_v27 = vld [vmem:[#allocation4 + $0x198] sm:$0xff] }
 0x1e9   : > { %2425 = vmatmul.f32.gmra.mxu2 %v6980_v30  ;;  %2490 = vmatmul.f32.gmra.mxu3 %v7029_v50 }
 0x1ea   : > { %1473 = vst [vmem:[#allocation2 + $0x61] sm:$0xff] %v1456_v35  ;;  %2532 = vmatpush.msra.mxu0 %v2034_v49 }
 0x1ec   : > { %v2166_v15 = vpop.f32.mrf.mxu2  ;;  %v2231_v28 = vpop.f32.mrf.mxu3 }
 0x1ed   : > { %v2167_v31 = vadd.f32 %v2166_v15, %v2102_v0  ;;  %v1423_v44 = vpop.f32.mrf.mxu0  ;;  %v2104_v30 = vpop.f32.mrf.mxu1 }
 0x1ee   : > { %v7347_v8 = vadd.f32 %v1423_v44, %v6982_v45  ;;  %v2105_v52 = vadd.f32 %v7200_v4, %v2104_v30  ;;  %v3121_v45 = vld [vmem:[#allocation4 + $0x20] sm:$0xff] }
 0x1ef   : > { %v7349_v22 = vadd.f32 %v2231_v28, %v2167_v31  ;;  %3292 = vmatpush.msra.mxu2 %v3121_v45  ;;  %v2033_v28 = vld [vmem:[%s8371_s1 + $0x398] sm:$0xff]  ;;  %v3136_v31 = vld [vmem:[#allocation4 + $0x98] sm:$0xff] }
 0x1f0   : > { %v1457_v51 = vmax.f32 %v7347_v8, 0.0  ;;  %2298 = vmatmul.f32.gmra.mxu0 %v7001_v5  ;;  %2363 = vmatmul.f32.gmra.mxu1 %v7005_v61  ;;  %v2049_v45 = vld [vmem:[%s8371_s1 + $0x418] sm:$0xff]  ;;  %v3167_v8 = vld [vmem:[#allocation4 + $0x190] sm:$0xff] }
 0x1f1   : > { %2428 = vmatmul.f32.gmra.mxu2 %v7008_v11  ;;  %2493 = vmatmul.f32.gmra.mxu3 %v7057_v59 }
 0x1f2   : > { %1474 = vst [vmem:[#allocation2 + $0x69] sm:$0xff] %v1457_v51  ;;  %2533 = vmatpush.msra.mxu0 %v2033_v28  ;;  %3358 = vmatpush.msra.mxu3 %v3136_v31  ;;  %v2031_v31 = vld [vmem:[%s8371_s1 + $0x388] sm:$0xff] }
 0x1f3   : > { %2598 = vmatpush.msra.mxu1 %v2049_v45  ;;  %v2047_v45 = vld [vmem:[%s8371_s1 + $0x408] sm:$0xff] }
 0x1f4   : > { %v2169_v5 = vpop.f32.mrf.mxu2  ;;  %v2234_v61 = vpop.f32.mrf.mxu3 }
 0x1f5   : > { %v2170_v53 = vadd.f32 %v2169_v5, %v2105_v52  ;;  %v1426_v46 = vpop.f32.mrf.mxu0  ;;  %v2107_v11 = vpop.f32.mrf.mxu1  ;;  %v2032_v5 = vld [vmem:[%s8371_s1 + $0x390] sm:$0xff] }
 0x1f6   : > { %v7366_v0 = vadd.f32 %v1426_v46, %v7010_v18  ;;  %v2108_v15 = vadd.f32 %v7200_v4, %v2107_v11  ;;  %v3120_v18 = vld [vmem:[#allocation4 + $0x18] sm:$0xff]  ;;  %2534 = vmatpush.msra.mxu0 %v2032_v5  ;;  %v2030_v5 = vld [vmem:[%s8371_s1 + $0x380] sm:$0xff] }
 0x1f7   : > { %v7368_v14 = vadd.f32 %v2234_v61, %v2170_v53  ;;  %3293 = vmatpush.msra.mxu2 %v3120_v18  ;;  %v3135_v61 = vld [vmem:[#allocation4 + $0x90] sm:$0xff] }
 0x1f8   : > { %v1458_v6 = vmax.f32 %v7366_v0, 0.0  ;;  %2301 = vmatmul.f32.gmra.mxu0 %v7029_v50  ;;  %2366 = vmatmul.f32.gmra.mxu1 %v7033_v63  ;;  %v3166_v0 = vld [vmem:[#allocation4 + $0x188] sm:$0xff] }
 0x1f9   : > { %2431 = vmatmul.f32.gmra.mxu2 %v7036_v39  ;;  %2496 = vmatmul.f32.gmra.mxu3 %v7084_v47 }
 0x1fa   : > { %1475 = vst [vmem:[#allocation2 + $0x79] sm:$0xff] %v1458_v6  ;;  %3359 = vmatpush.msra.mxu3 %v3135_v61  ;;  %2535 = vmatpush.msra.mxu0 %v2031_v31  ;;  %v3133_v61 = vld [vmem:[#allocation4 + $0x80] sm:$0xff] }
 0x1fc   : > { %v2172_v50 = vpop.f32.mrf.mxu2  ;;  %v2237_v63 = vpop.f32.mrf.mxu3  ;;  %2536 = vmatpush.msra.mxu0 %v2030_v5  ;;  %v5449_v5 = vld [vmem:[%s6041_s6 + $0x188] sm:$0xff] }
 0x1fd   : > { %v2173_v44 = vadd.f32 %v2172_v50, %v2108_v15  ;;  %v1429_v30 = vpop.f32.mrf.mxu0  ;;  %v2110_v39 = vpop.f32.mrf.mxu1  ;;  %v2048_v15 = vld [vmem:[%s8371_s1 + $0x410] sm:$0xff]  ;;  %v3134_v50 = vld [vmem:[#allocation4 + $0x88] sm:$0xff] }
 0x1fe   : > { %v7385_v1 = vadd.f32 %v1429_v30, %v7038_v25  ;;  %v2111_v24 = vadd.f32 %v7200_v4, %v2110_v39  ;;  %v3119_v25 = vld [vmem:[#allocation4 + $0x10] sm:$0xff]  ;;  %2599 = vmatpush.msra.mxu1 %v2048_v15  ;;  %3360 = vmatpush.msra.mxu3 %v3134_v50  ;;  %v8386_v50 = vld [vmem:[#allocation11_spill] sm:$0xff] }
 0x1ff   : > { %v7387_v52 = vadd.f32 %v2237_v63, %v2173_v44  ;;  %3294 = vmatpush.msra.mxu2 %v3119_v25  ;;  %v2046_v15 = vld [vmem:[%s8371_s1 + $0x400] sm:$0xff] }
 0x200   : > { %v1459_v49 = vmax.f32 %v7385_v1, 0.0  ;;  %2304 = vmatmul.f32.gmra.mxu0 %v7057_v59  ;;  %2369 = vmatmul.f32.gmra.mxu1 %v7061_v33 }
 0x201   : > { %2434 = vmatmul.f32.gmra.mxu2 %v7064_v16  ;;  %2499 = vmatmul.f32.gmra.mxu3 %v7108_v34 }
 0x202   : > { %1476 = vst [vmem:[#allocation2 + $0x81] sm:$0xff] %v1459_v49  ;;  %2600 = vmatpush.msra.mxu1 %v2047_v45  ;;  %3361 = vmatpush.msra.mxu3 %v3133_v61 }
 0x204   : > { %v2175_v59 = vpop.f32.mrf.mxu2  ;;  %v2240_v33 = vpop.f32.mrf.mxu3  ;;  %2601 = vmatpush.msra.mxu1 %v2046_v15  ;;  %v3211_v15 = vld [vmem:[#allocation4 + $0x2f0] sm:$0xff] }
 0x205   : > { %v2176_v53 = vadd.f32 %v2175_v59, %v2111_v24  ;;  %v1432_v46 = vpop.f32.mrf.mxu0  ;;  %v2113_v16 = vpop.f32.mrf.mxu1 }
 0x206   : > { %v7404_v11 = vadd.f32 %v1432_v46, %v7066_v26  ;;  %v2114_v28 = vadd.f32 %v7200_v4, %v2113_v16  ;;  %v3118_v26 = vld [vmem:[#allocation4 + $0x8] sm:$0xff]  ;;  %v5448_v46 = vld [vmem:[%s6041_s6 + $0x180] sm:$0xff] }
 0x207   : > { %v7406_v36 = vadd.f32 %v2240_v33, %v2176_v53  ;;  %3295 = vmatpush.msra.mxu2 %v3118_v26  ;;  %v8385_v26 = vld [vmem:[#allocation10_spill] sm:$0xff] }
 0x208   : > { %v1460_v18 = vmax.f32 %v7404_v11, 0.0  ;;  %2307 = vmatmul.f32.gmra.mxu0 %v7084_v47  ;;  %2372 = vmatmul.f32.gmra.mxu1 %v7088_v60 }
 0x209   : > { %2437 = vmatmul.f32.gmra.mxu2 %v7091_v41  ;;  %2502 = vmatmul.f32.gmra.mxu3 %v7138_v54 }
 0x20a   : > { %1477 = vst [vmem:[#allocation2 + $0x91] sm:$0xff] %v1460_v18 }
 0x20c   : > { %v2178_v47 = vpop.f32.mrf.mxu2  ;;  %v2243_v60 = vpop.f32.mrf.mxu3 }
 0x20d   : > { %v2179_v63 = vadd.f32 %v2178_v47, %v2114_v28  ;;  %v1435_v44 = vpop.f32.mrf.mxu0  ;;  %v2116_v41 = vpop.f32.mrf.mxu1  ;;  %v3164_v47 = vld [vmem:[#allocation4 + $0x178] sm:$0xff] }
 0x20e   : > { %v7423_v30 = vadd.f32 %v1435_v44, %v7093_v57  ;;  %v2117_v25 = vadd.f32 %v7200_v4, %v2116_v41  ;;  %v3117_v57 = vld [vmem:[#allocation4] sm:$0xff]  ;;  %3411 = vmatpush.msrb.mxu0 %v3164_v47 }
 0x20f   : > { %v7425_v39 = vadd.f32 %v2243_v60, %v2179_v63  ;;  %3296 = vmatpush.msra.mxu2 %v3117_v57  ;;  %v3212_v60 = vld [vmem:[#allocation4 + $0x2f8] sm:$0xff] }
 0x210   : > { %v1461_v24 = vmax.f32 %v7423_v30, 0.0  ;;  %2310 = vmatmul.f32.gmra.mxu0 %v7108_v34  ;;  %2375 = vmatmul.f32.gmra.mxu1 %v7113_v9  ;;  %v3243_v30 = vld [vmem:[#allocation4 + $0x3f0] sm:$0xff] }
 0x211   : > { %2440 = vmatmul.f32.gmra.mxu2 %v7116_v12  ;;  %2505 = vmatmul.f32.gmra.mxu3 %v7168_v37  ;;  %v7613_v1 = vld [vmem:[#allocation2 + $0x90] sm:$0xff] }
 0x212   : > { %1478 = vst [vmem:[#allocation2 + $0x99] sm:$0xff] %v1461_v24  ;;  %3606 = vmatpush.msrb.mxu3 %v3212_v60  ;;  %v7475_v60 = vld [vmem:[%s6041_s6 + $0x182] sm:$0xff] }
 0x214   : > { %v2181_v34 = vpop.f32.mrf.mxu2  ;;  %v2246_v9 = vpop.f32.mrf.mxu3  ;;  %3607 = vmatpush.msrb.mxu3 %v3211_v15 }
 0x215   : > { %v2182_v59 = vadd.f32 %v2181_v34, %v2117_v25  ;;  %v1438_v12 = vpop.f32.mrf.mxu0  ;;  %v2119_v33 = vpop.f32.mrf.mxu1  ;;  %v8387_v25 = vld [vmem:[#allocation12_spill] sm:$0xff]  ;;  %v3180_v34 = vld [vmem:[#allocation4 + $0x1f8] sm:$0xff] }
 0x216   : > { %v7442_v53 = vadd.f32 %v1438_v12, %v7119_v23  ;;  %v2120_v31 = vadd.f32 %v7200_v4, %v2119_v33  ;;  %v3196_v23 = vld [vmem:[#allocation4 + $0x278] sm:$0xff]  ;;  %v3195_v12 = vld [vmem:[#allocation4 + $0x270] sm:$0xff]  ;;  %3476 = vmatpush.msrb.mxu1 %v3180_v34  ;;  %v3162_v34 = vld [vmem:[#allocation4 + $0x168] sm:$0xff] }
 0x217   : > { %v7445_v16 = vadd.f32 %v2246_v9, %v2182_v59  ;;  %3541 = vmatpush.msrb.mxu2 %v3196_v23  ;;  %v3163_v33 = vld [vmem:[#allocation4 + $0x170] sm:$0xff] }
 0x218   : > { %v1462_v28 = vmax.f32 %v7442_v53, 0.0  ;;  %2313 = vmatmul.f32.gmra.mxu0 %v7138_v54  ;;  %2378 = vmatmul.f32.gmra.mxu1 %v8385_v26  ;;  %v7471_v23 = vld [vmem:[%s6041_s6 + $0x181] sm:$0xff]  ;;  %v3242_v53 = vld [vmem:[#allocation4 + $0x3e8] sm:$0xff] }
 0x219   : > { %2443 = vmatmul.f32.gmra.mxu2 %v8386_v50  ;;  %2508 = vmatmul.f32.gmra.mxu3 %v5448_v46 }
 0x21a   : > { %1479 = vst [vmem:[#allocation2 + $0xa9] sm:$0xff] %v1462_v28  ;;  %3542 = vmatpush.msrb.mxu2 %v3195_v12  ;;  %3412 = vmatpush.msrb.mxu0 %v3163_v33 }
 0x21c   : > { %v2184_v63 = vpop.f32.mrf.mxu2  ;;  %v2249_v54 = vpop.f32.mrf.mxu3  ;;  %3413 = vmatpush.msrb.mxu0 %v3162_v34 }
 0x21d   : > { %v2185_v44 = vadd.f32 %v2184_v63, %v2120_v31  ;;  %v1441_v41 = vpop.f32.mrf.mxu0  ;;  %v2122_v45 = vpop.f32.mrf.mxu1  ;;  %v5450_v63 = vld [vmem:[%s6041_s6 + $0x198] sm:$0xff] }
 0x21e   : > { %v7458_v57 = vadd.f32 %v1441_v41, %v8387_v25  ;;  %v2123_v59 = vadd.f32 %v7200_v4, %v2122_v45  ;;  %v3194_v25 = vld [vmem:[#allocation4 + $0x268] sm:$0xff] }
 0x21f   : > { %v7461_v61 = vadd.f32 %v2249_v54, %v2185_v44  ;;  %v3179_v44 = vld [vmem:[#allocation4 + $0x1f0] sm:$0xff]  ;;  %3543 = vmatpush.msrb.mxu2 %v3194_v25 }
 0x220   : > { %v8378_v9 = vmax.f32 %v7458_v57, 0.0  ;;  %2316 = vmatmul.f32.gmra.mxu0 %v7168_v37  ;;  %2381 = vmatmul.f32.gmra.mxu1 %v7173_v19 }
 0x221   : > { %2446 = vmatmul.f32.gmra.mxu2 %v7176_v2  ;;  %2511 = vmatmul.f32.gmra.mxu3 %v5449_v5  ;;  %v8388_v2 = vld [vmem:[#allocation13_spill] sm:$0xff] }
 0x222   : > { %1480 = vst [vmem:[#allocation2 + $0xb1] sm:$0xff] %v8378_v9  ;;  %3477 = vmatpush.msrb.mxu1 %v3179_v44 }
 0x224   : > { %v2187_v37 = vpop.f32.mrf.mxu2  ;;  %v2252_v19 = vpop.f32.mrf.mxu3 }
 0x225   : > { %v2188_v26 = vadd.f32 %v2187_v37, %v2123_v59  ;;  %v1444_v31 = vpop.f32.mrf.mxu0  ;;  %v2125_v50 = vpop.f32.mrf.mxu1  ;;  %v3210_v59 = vld [vmem:[#allocation4 + $0x2e8] sm:$0xff] }
 0x226   : > { %v1445_v47 = vadd.f32 %v1444_v31, %v8388_v2  ;;  %v2126_v45 = vadd.f32 %v7200_v4, %v2125_v50  ;;  %3608 = vmatpush.msrb.mxu3 %v3210_v59  ;;  %v7488_v31 = vld [vmem:[%s6041_s6 + $0x18a] sm:$0xff]  ;;  %v5451_v50 = vld [vmem:[%s6041_s6 + $0x1a0] sm:$0xff] }
 0x227   : > { %v7478_v54 = vadd.f32 %v2252_v19, %v2188_v26  ;;  %v7484_v19 = vld [vmem:[%s6041_s6 + $0x189] sm:$0xff] }
 0x228   : > { %v1464_v41 = vmax.f32 %v1445_v47, 0.0  ;;  %2319 = vmatmul.f32.gmra.mxu0 %v5448_v46  ;;  %2384 = vmatmul.f32.gmra.mxu1 %v7471_v23  ;;  %v3178_v47 = vld [vmem:[#allocation4 + $0x1e8] sm:$0xff] }
 0x229   : > { %2449 = vmatmul.f32.gmra.mxu2 %v7475_v60  ;;  %2514 = vmatmul.f32.gmra.mxu3 %v5450_v63 }
 0x22a   : > { %1481 = vst [vmem:[#allocation2 + $0xc1] sm:$0xff] %v1464_v41  ;;  %v3193_v41 = vld [vmem:[#allocation4 + $0x260] sm:$0xff]  ;;  %3478 = vmatpush.msrb.mxu1 %v3178_v47  ;;  %v3192_v47 = vld [vmem:[#allocation4 + $0x258] sm:$0xff] }
 0x22b   : > { %3544 = vmatpush.msrb.mxu2 %v3193_v41 }
 0x22c   : > { %v2190_v12 = vpop.f32.mrf.mxu2  ;;  %v2255_v46 = vpop.f32.mrf.mxu3 }
 0x22d   : > { %v2191_v33 = vadd.f32 %v2190_v12, %v2126_v45  ;;  %v1447_v15 = vpop.f32.mrf.mxu0  ;;  %v2128_v37 = vpop.f32.mrf.mxu1  ;;  %v3161_v45 = vld [vmem:[#allocation4 + $0x160] sm:$0xff]  ;;  %3545 = vmatpush.msrb.mxu2 %v3192_v47 }
 0x22e   : > { %v1448_v26 = vadd.f32 %v1447_v15, %v7205_v17  ;;  %v2129_v44 = vadd.f32 %v7200_v4, %v2128_v37  ;;  %v3209_v17 = vld [vmem:[#allocation4 + $0x2e0] sm:$0xff]  ;;  %3414 = vmatpush.msrb.mxu0 %v3161_v45  ;;  %v2684_v15 = vld [vmem:[#allocation2] sm:$0xff] }
 0x22f   : > { %v7491_v2 = vadd.f32 %v2255_v46, %v2191_v33  ;;  %3609 = vmatpush.msrb.mxu3 %v3209_v17  ;;  %v5452_v46 = vld [vmem:[%s6041_s6 + $0xf1] sm:$0xff]  ;;  %v2716_v37 = vld [vmem:[#allocation2 + $0x1] sm:$0xff] }
 0x230   : > { %v1465_v63 = vmax.f32 %v1448_v26, 0.0  ;;  %2322 = vmatmul.f32.gmra.mxu0 %v5449_v5  ;;  %2387 = vmatmul.f32.gmra.mxu1 %v7484_v19  ;;  %v5468_v4 = vld [vmem:[%s6041_s6 + $0xf2] sm:$0xff] }
 0x231   : > { %2452 = vmatmul.f32.gmra.mxu2 %v7488_v31  ;;  %2517 = vmatmul.f32.gmra.mxu3 %v5451_v50  ;;  %v3177_v50 = vld [vmem:[#allocation4 + $0x1e0] sm:$0xff] }
 0x232   : > { %1482 = vst [vmem:[#allocation2 + $0xc9] sm:$0xff] %v1465_v63  ;;  %v3160_v63 = vld [vmem:[#allocation4 + $0x158] sm:$0xff]  ;;  %3479 = vmatpush.msrb.mxu1 %v3177_v50 }
 0x233   : > { %3415 = vmatpush.msrb.mxu0 %v3160_v63 }
 0x234   : > { %v2193_v25 = vpop.f32.mrf.mxu2  ;;  %v2258_v34 = vpop.f32.mrf.mxu3 }
 0x235   : > { %v2194_v5 = vadd.f32 %v2193_v25, %v2129_v44  ;;  %v2278_v59 = vpop.f32.mrf.mxu0  ;;  %v2343_v12 = vpop.f32.mrf.mxu1  ;;  %v3208_v44 = vld [vmem:[#allocation4 + $0x2d8] sm:$0xff] }
 0x236   : > { %v2279_v33 = vadd.f32 %v2278_v59, %v7228_v38  ;;  %3610 = vmatpush.msrb.mxu3 %v3208_v44 }
 0x237   : > { %v7499_v26 = vadd.f32 %v2258_v34, %v2194_v5  ;;  %v5453_v34 = vld [vmem:[%s6041_s6 + $0xf9] sm:$0xff] }
 0x238   : > { %v2344_v9 = vadd.f32 %v2343_v12, %v2279_v33  ;;  %2537 = vmatmul.f32.vlgmr.msra.gmra.mxu0 %v5452_v46  ;;  %2602 = vmatmul.f32.vlgmr.msra.gmra.mxu1 %v5468_v4  ;;  %v5469_v5 = vld [vmem:[%s6041_s6 + $0xfa] sm:$0xff]  ;;  %v2717_v12 = vld [vmem:[#allocation2 + $0x9] sm:$0xff] }
 0x239   : > { %3297 = vmatmul.f32.vlgmr.msra.gmra.mxu2 %v2684_v15  ;;  %3362 = vmatmul.f32.vlgmr.msra.gmra.mxu3 %v2716_v37  ;;  %v3176_v4 = vld [vmem:[#allocation4 + $0x1d8] sm:$0xff]  ;;  %v3191_v15 = vld [vmem:[#allocation4 + $0x250] sm:$0xff] }
 0x23a   : > { %v3207_v37 = vld [vmem:[#allocation4 + $0x2d0] sm:$0xff]  ;;  %3480 = vmatpush.msrb.mxu1 %v3176_v4  ;;  %3546 = vmatpush.msrb.mxu2 %v3191_v15  ;;  %v3206_v4 = vld [vmem:[#allocation4 + $0x2c8] sm:$0xff] }
 0x23b   : > { %3611 = vmatpush.msrb.mxu3 %v3207_v37 }
 0x23c   : > { %v2408_v38 = vpop.f32.mrf.mxu2  ;;  %v2473_v41 = vpop.f32.mrf.mxu3 }
 0x23d   : > { %v2409_v45 = vadd.f32 %v2408_v38, %v2344_v9  ;;  %v2281_v17 = vpop.f32.mrf.mxu0  ;;  %v2346_v25 = vpop.f32.mrf.mxu1  ;;  %v3159_v9 = vld [vmem:[#allocation4 + $0x150] sm:$0xff]  ;;  %v5454_v38 = vld [vmem:[%s6041_s6 + $0x109] sm:$0xff]  ;;  %3612 = vmatpush.msrb.mxu3 %v3206_v4 }
 0x23e   : > { %v2282_v59 = vadd.f32 %v2281_v17, %v7254_v7  ;;  %3416 = vmatpush.msrb.mxu0 %v3159_v9 }
 0x23f   : > { %v7504_v46 = vadd.f32 %v2473_v41, %v2409_v45  ;;  %v5470_v41 = vld [vmem:[%s6041_s6 + $0x10a] sm:$0xff] }
 0x240   : > { %v2347_v33 = vadd.f32 %v2346_v25, %v2282_v59  ;;  %2540 = vmatmul.f32.gmra.mxu0 %v5453_v34  ;;  %2605 = vmatmul.f32.gmra.mxu1 %v5469_v5  ;;  %v7512_v34 = vld [vmem:[#allocation2 + $0x18] sm:$0xff] }
 0x241   : > { %3300 = vmatmul.f32.gmra.mxu2 %v5700_v40  ;;  %3365 = vmatmul.f32.gmra.mxu3 %v2717_v12  ;;  %v3175_v40 = vld [vmem:[#allocation4 + $0x1d0] sm:$0xff]  ;;  %v3190_v59 = vld [vmem:[#allocation4 + $0x248] sm:$0xff] }
 0x242   : > { %v7514_v5 = vld [vmem:[#allocation2 + $0x19] sm:$0xff]  ;;  %3481 = vmatpush.msrb.mxu1 %v3175_v40  ;;  %3547 = vmatpush.msrb.mxu2 %v3190_v59  ;;  %v3157_v40 = vld [vmem:[#allocation4 + $0x140] sm:$0xff] }
 0x243   : > { %v3158_v12 = vld [vmem:[#allocation4 + $0x148] sm:$0xff] }
 0x244   : > { %v2411_v7 = vpop.f32.mrf.mxu2  ;;  %v2476_v50 = vpop.f32.mrf.mxu3  ;;  %3417 = vmatpush.msrb.mxu0 %v3158_v12 }
 0x245   : > { %v2412_v47 = vadd.f32 %v2411_v7, %v2347_v33  ;;  %v2284_v63 = vpop.f32.mrf.mxu0  ;;  %v2349_v44 = vpop.f32.mrf.mxu1  ;;  %v5455_v7 = vld [vmem:[%s6041_s6 + $0x111] sm:$0xff] }
 0x246   : > { %v2285_v45 = vadd.f32 %v2284_v63, %v7273_v20  ;;  %3418 = vmatpush.msrb.mxu0 %v3157_v40 }
 0x247   : > { %v7510_v17 = vadd.f32 %v2476_v50, %v2412_v47  ;;  %v5471_v50 = vld [vmem:[%s6041_s6 + $0x112] sm:$0xff] }
 0x248   : > { %v2350_v25 = vadd.f32 %v2349_v44, %v2285_v45  ;;  %2543 = vmatmul.f32.gmra.mxu0 %v5454_v38  ;;  %2608 = vmatmul.f32.gmra.mxu1 %v5470_v41  ;;  %v3174_v44 = vld [vmem:[#allocation4 + $0x1c8] sm:$0xff]  ;;  %v7523_v41 = vld [vmem:[#allocation2 + $0x20] sm:$0xff]  ;;  %v3189_v45 = vld [vmem:[#allocation4 + $0x240] sm:$0xff] }
 0x249   : > { %3303 = vmatmul.f32.gmra.mxu2 %v7512_v34  ;;  %3368 = vmatmul.f32.gmra.mxu3 %v7514_v5 }
 0x24a   : > { %3482 = vmatpush.msrb.mxu1 %v3174_v44  ;;  %3548 = vmatpush.msrb.mxu2 %v3189_v45  ;;  %v3204_v44 = vld [vmem:[#allocation4 + $0x2b8] sm:$0xff] }
 0x24c   : > { %v2414_v20 = vpop.f32.mrf.mxu2  ;;  %v2479_v33 = vpop.f32.mrf.mxu3  ;;  %3483 = vmatpush.msrb.mxu1 %v3173_v3 }
 0x24d   : > { %v2415_v15 = vadd.f32 %v2414_v20, %v2350_v25  ;;  %v2287_v9 = vpop.f32.mrf.mxu0  ;;  %v2352_v37 = vpop.f32.mrf.mxu1  ;;  %v3205_v25 = vld [vmem:[#allocation4 + $0x2c0] sm:$0xff] }
 0x24e   : > { %v2288_v47 = vadd.f32 %v2287_v9, %v7292_v48  ;;  %3613 = vmatpush.msrb.mxu3 %v3205_v25  ;;  %3484 = vmatpush.msrb.mxu1 %v3172_v32 }
 0x24f   : > { %v7521_v63 = vadd.f32 %v2479_v33, %v2415_v15  ;;  %v5456_v33 = vld [vmem:[%s6041_s6 + $0x121] sm:$0xff] }
 0x250   : > { %v2353_v38 = vadd.f32 %v2352_v37, %v2288_v47  ;;  %2546 = vmatmul.f32.gmra.mxu0 %v5455_v7  ;;  %2611 = vmatmul.f32.gmra.mxu1 %v5471_v50  ;;  %v5472_v15 = vld [vmem:[%s6041_s6 + $0x122] sm:$0xff]  ;;  %v7533_v7 = vld [vmem:[#allocation2 + $0x30] sm:$0xff] }
 0x251   : > { %3306 = vmatmul.f32.gmra.mxu2 %v7523_v41  ;;  %3371 = vmatmul.f32.gmra.mxu3 %v1451_v13  ;;  %v3188_v50 = vld [vmem:[#allocation4 + $0x238] sm:$0xff] }
 0x252   : > { %v3156_v47 = vld [vmem:[#allocation4 + $0x138] sm:$0xff]  ;;  %3549 = vmatpush.msrb.mxu2 %v3188_v50  ;;  %3614 = vmatpush.msrb.mxu3 %v3204_v44  ;;  %v5458_v44 = vld [vmem:[%s6041_s6 + $0x139] sm:$0xff] }
 0x253   : > { %3419 = vmatpush.msrb.mxu0 %v3156_v47  ;;  %3485 = vmatpush.msrb.mxu1 %v3171_v42 }
 0x254   : > { %v2417_v48 = vpop.f32.mrf.mxu2  ;;  %v2482_v59 = vpop.f32.mrf.mxu3 }
 0x255   : > { %v2418_v12 = vadd.f32 %v2417_v48, %v2353_v38  ;;  %v2290_v4 = vpop.f32.mrf.mxu0  ;;  %v2355_v20 = vpop.f32.mrf.mxu1  ;;  %v5457_v48 = vld [vmem:[%s6041_s6 + $0x129] sm:$0xff]  ;;  %3486 = vmatpush.msrb.mxu1 %v3170_v55 }
 0x256   : > { %v2291_v9 = vadd.f32 %v2290_v4, %v7311_v58 }
 0x257   : > { %v7531_v37 = vadd.f32 %v2482_v59, %v2418_v12  ;;  %v5473_v59 = vld [vmem:[%s6041_s6 + $0x12a] sm:$0xff]  ;;  %3487 = vmatpush.msrb.mxu1 %v3169_v56 }
 0x258   : > { %v2356_v13 = vadd.f32 %v2355_v20, %v2291_v9  ;;  %2549 = vmatmul.f32.gmra.mxu0 %v5456_v33  ;;  %2614 = vmatmul.f32.gmra.mxu1 %v5472_v15  ;;  %v7543_v20 = vld [vmem:[#allocation2 + $0x38] sm:$0xff]  ;;  %v3187_v33 = vld [vmem:[#allocation4 + $0x230] sm:$0xff]  ;;  %v5462_v56 = vld [vmem:[%s6041_s6 + $0x169] sm:$0xff] }
 0x259   : > { %3309 = vmatmul.f32.gmra.mxu2 %v7533_v7  ;;  %3374 = vmatmul.f32.gmra.mxu3 %v1452_v10  ;;  %v3155_v15 = vld [vmem:[#allocation4 + $0x130] sm:$0xff] }
 0x25a   : > { %v3203_v9 = vld [vmem:[#allocation4 + $0x2b0] sm:$0xff]  ;;  %3550 = vmatpush.msrb.mxu2 %v3187_v33  ;;  %3420 = vmatpush.msrb.mxu0 %v3155_v15 }
 0x25b   : > { %3615 = vmatpush.msrb.mxu3 %v3203_v9  ;;  %v5459_v15 = vld [vmem:[%s6041_s6 + $0x141] sm:$0xff]  ;;  %3488 = vmatpush.msrb.mxu1 %v3168_v27  ;;  %v5479_v27 = vld [vmem:[%s6041_s6 + $0x172] sm:$0xff] }
 0x25c   : > { %v2420_v58 = vpop.f32.mrf.mxu2  ;;  %v2485_v38 = vpop.f32.mrf.mxu3  ;;  %v5475_v9 = vld [vmem:[%s6041_s6 + $0x142] sm:$0xff] }
 0x25d   : > { %v2421_v45 = vadd.f32 %v2420_v58, %v2356_v13  ;;  %v2293_v40 = vpop.f32.mrf.mxu0  ;;  %v2358_v25 = vpop.f32.mrf.mxu1  ;;  %v5474_v58 = vld [vmem:[%s6041_s6 + $0x13a] sm:$0xff]  ;;  %3489 = vmatpush.msrb.mxu1 %v3167_v8  ;;  %v3165_v8 = vld [vmem:[#allocation4 + $0x180] sm:$0xff] }
 0x25e   : > { %v2294_v12 = vadd.f32 %v2293_v40, %v7330_v62  ;;  %v7553_v40 = vld [vmem:[#allocation2 + $0x48] sm:$0xff] }
 0x25f   : > { %v7541_v4 = vadd.f32 %v2485_v38, %v2421_v45  ;;  %3490 = vmatpush.msrb.mxu1 %v3166_v0 }
 0x260   : > { %v2359_v10 = vadd.f32 %v2358_v25, %v2294_v12  ;;  %2552 = vmatmul.f32.gmra.mxu0 %v5457_v48  ;;  %2617 = vmatmul.f32.gmra.mxu1 %v5473_v59  ;;  %v3186_v25 = vld [vmem:[#allocation4 + $0x228] sm:$0xff] }
 0x261   : > { %3312 = vmatmul.f32.gmra.mxu2 %v7543_v20  ;;  %3377 = vmatmul.f32.gmra.mxu3 %v1453_v29  ;;  %v3154_v48 = vld [vmem:[#allocation4 + $0x128] sm:$0xff] }
 0x262   : > { %v3202_v59 = vld [vmem:[#allocation4 + $0x2a8] sm:$0xff]  ;;  %3551 = vmatpush.msrb.mxu2 %v3186_v25  ;;  %3421 = vmatpush.msrb.mxu0 %v3154_v48 }
 0x263   : > { %3616 = vmatpush.msrb.mxu3 %v3202_v59  ;;  %v5460_v25 = vld [vmem:[%s6041_s6 + $0x151] sm:$0xff]  ;;  %3491 = vmatpush.msrb.mxu1 %v3165_v8 }
 0x264   : > { %v2423_v62 = vpop.f32.mrf.mxu2  ;;  %v2488_v3 = vpop.f32.mrf.mxu3  ;;  %v5476_v48 = vld [vmem:[%s6041_s6 + $0x152] sm:$0xff] }
 0x265   : > { %v2424_v13 = vadd.f32 %v2423_v62, %v2359_v10  ;;  %v2296_v50 = vpop.f32.mrf.mxu0  ;;  %v2361_v47 = vpop.f32.mrf.mxu1 }
 0x266   : > { %v2297_v38 = vadd.f32 %v2296_v50, %v7349_v22  ;;  %v3185_v50 = vld [vmem:[#allocation4 + $0x220] sm:$0xff] }
 0x267   : > { %v7551_v45 = vadd.f32 %v2488_v3, %v2424_v13  ;;  %v7563_v13 = vld [vmem:[#allocation2 + $0x50] sm:$0xff]  ;;  %3552 = vmatpush.msrb.mxu2 %v3185_v50  ;;  %v5477_v50 = vld [vmem:[%s6041_s6 + $0x15a] sm:$0xff] }
 0x268   : > { %v2362_v29 = vadd.f32 %v2361_v47, %v2297_v38  ;;  %2555 = vmatmul.f32.gmra.mxu0 %v5458_v44  ;;  %2620 = vmatmul.f32.gmra.mxu1 %v5474_v58  ;;  %v3153_v47 = vld [vmem:[#allocation4 + $0x120] sm:$0xff] }
 0x269   : > { %3315 = vmatmul.f32.gmra.mxu2 %v7553_v40  ;;  %3380 = vmatmul.f32.gmra.mxu3 %v1454_v43  ;;  %v3201_v44 = vld [vmem:[#allocation4 + $0x2a0] sm:$0xff] }
 0x26a   : > { %3422 = vmatpush.msrb.mxu0 %v3153_v47  ;;  %3617 = vmatpush.msrb.mxu3 %v3201_v44 }
 0x26c   : > { %v2426_v22 = vpop.f32.mrf.mxu2  ;;  %v2491_v12 = vpop.f32.mrf.mxu3 }
 0x26d   : > { %v2427_v32 = vadd.f32 %v2426_v22, %v2362_v29  ;;  %v2299_v10 = vpop.f32.mrf.mxu0  ;;  %v2364_v33 = vpop.f32.mrf.mxu1 }
 0x26e   : > { %v2300_v62 = vadd.f32 %v2299_v10, %v7368_v14  ;;  %v3152_v10 = vld [vmem:[#allocation4 + $0x118] sm:$0xff] }
 0x26f   : > { %v7561_v3 = vadd.f32 %v2491_v12, %v2427_v32  ;;  %v7573_v12 = vld [vmem:[#allocation2 + $0x60] sm:$0xff]  ;;  %v3184_v32 = vld [vmem:[#allocation4 + $0x218] sm:$0xff]  ;;  %3423 = vmatpush.msrb.mxu0 %v3152_v10 }
 0x270   : > { %v2365_v43 = vadd.f32 %v2364_v33, %v2300_v62  ;;  %2558 = vmatmul.f32.gmra.mxu0 %v5459_v15  ;;  %2623 = vmatmul.f32.gmra.mxu1 %v5475_v9  ;;  %v3200_v33 = vld [vmem:[#allocation4 + $0x298] sm:$0xff] }
 0x271   : > { %3318 = vmatmul.f32.gmra.mxu2 %v7563_v13  ;;  %3383 = vmatmul.f32.gmra.mxu3 %v1455_v21 }
 0x272   : > { %3553 = vmatpush.msrb.mxu2 %v3184_v32  ;;  %3618 = vmatpush.msrb.mxu3 %v3200_v33  ;;  %v7593_v33 = vld [vmem:[#allocation2 + $0x78] sm:$0xff] }
 0x274   : > { %v2429_v14 = vpop.f32.mrf.mxu2  ;;  %v2494_v58 = vpop.f32.mrf.mxu3 }
 0x275   : > { %v2430_v38 = vadd.f32 %v2429_v14, %v2365_v43  ;;  %v2302_v42 = vpop.f32.mrf.mxu0  ;;  %v2367_v29 = vpop.f32.mrf.mxu1  ;;  %v5461_v43 = vld [vmem:[%s6041_s6 + $0x159] sm:$0xff]  ;;  %v7583_v14 = vld [vmem:[#allocation2 + $0x68] sm:$0xff] }
 0x276   : > { %v2303_v59 = vadd.f32 %v2302_v42, %v7387_v52  ;;  %v3199_v42 = vld [vmem:[#allocation4 + $0x290] sm:$0xff] }
 0x277   : > { %v7571_v22 = vadd.f32 %v2494_v58, %v2430_v38  ;;  %v3183_v58 = vld [vmem:[#allocation4 + $0x210] sm:$0xff]  ;;  %3619 = vmatpush.msrb.mxu3 %v3199_v42  ;;  %v3181_v42 = vld [vmem:[#allocation4 + $0x200] sm:$0xff] }
 0x278   : > { %v2368_v21 = vadd.f32 %v2367_v29, %v2303_v59  ;;  %2561 = vmatmul.f32.gmra.mxu0 %v5460_v25  ;;  %2626 = vmatmul.f32.gmra.mxu1 %v5476_v48  ;;  %v3151_v38 = vld [vmem:[#allocation4 + $0x110] sm:$0xff] }
 0x279   : > { %3321 = vmatmul.f32.gmra.mxu2 %v7573_v12  ;;  %3386 = vmatmul.f32.gmra.mxu3 %v1456_v35 }
 0x27a   : > { %3554 = vmatpush.msrb.mxu2 %v3183_v58  ;;  %3424 = vmatpush.msrb.mxu0 %v3151_v38  ;;  %v7603_v38 = vld [vmem:[#allocation2 + $0x80] sm:$0xff] }
 0x27c   : > { %v2432_v52 = vpop.f32.mrf.mxu2  ;;  %v2497_v15 = vpop.f32.mrf.mxu3 }
 0x27d   : > { %v2433_v9 = vadd.f32 %v2432_v52, %v2368_v21  ;;  %v2305_v62 = vpop.f32.mrf.mxu0  ;;  %v2370_v55 = vpop.f32.mrf.mxu1  ;;  %v5478_v21 = vld [vmem:[%s6041_s6 + $0x16a] sm:$0xff]  ;;  %v3182_v52 = vld [vmem:[#allocation4 + $0x208] sm:$0xff] }
 0x27e   : > { %v2306_v47 = vadd.f32 %v2305_v62, %v7406_v36  ;;  %3555 = vmatpush.msrb.mxu2 %v3182_v52 }
 0x27f   : > { %v7581_v44 = vadd.f32 %v2497_v15, %v2433_v9  ;;  %v3150_v15 = vld [vmem:[#allocation4 + $0x108] sm:$0xff] }
 0x280   : > { %v2371_v35 = vadd.f32 %v2370_v55, %v2306_v47  ;;  %2564 = vmatmul.f32.gmra.mxu0 %v5461_v43  ;;  %2629 = vmatmul.f32.gmra.mxu1 %v5477_v50  ;;  %v3198_v9 = vld [vmem:[#allocation4 + $0x288] sm:$0xff] }
 0x281   : > { %3324 = vmatmul.f32.gmra.mxu2 %v7583_v14  ;;  %3389 = vmatmul.f32.gmra.mxu3 %v1457_v51  ;;  %v5463_v47 = vld [vmem:[%s6041_s6 + $0x171] sm:$0xff] }
 0x282   : > { %3425 = vmatpush.msrb.mxu0 %v3150_v15  ;;  %3620 = vmatpush.msrb.mxu3 %v3198_v9  ;;  %v3260_v15 = vld [vmem:[#allocation4 + $0x478] sm:$0xff] }
 0x283   : > { %3556 = vmatpush.msrb.mxu2 %v3181_v42  ;;  %v4363_v9 = vld [vmem:[#allocation4 + $0x78] sm:$0xff] }
 0x284   : > { %v2435_v36 = vpop.f32.mrf.mxu2  ;;  %v2500_v29 = vpop.f32.mrf.mxu3 }
 0x285   : > { %v2436_v25 = vadd.f32 %v2435_v36, %v2371_v35  ;;  %v2308_v48 = vpop.f32.mrf.mxu0  ;;  %v2373_v59 = vpop.f32.mrf.mxu1  ;;  %v3149_v36 = vld [vmem:[#allocation4 + $0x100] sm:$0xff]  ;;  %3801 = vmatpush.msra.mxu2 %v3260_v15 }
 0x286   : > { %v2309_v32 = vadd.f32 %v2308_v48, %v7425_v39  ;;  %3426 = vmatpush.msrb.mxu0 %v3149_v36  ;;  %v5466_v36 = vld [vmem:[%s6041_s6 + $0x199] sm:$0xff] }
 0x287   : > { %v7591_v10 = vadd.f32 %v2500_v29, %v2436_v25  ;;  %v3197_v29 = vld [vmem:[#allocation4 + $0x280] sm:$0xff] }
 0x288   : > { %v2374_v51 = vadd.f32 %v2373_v59, %v2309_v32  ;;  %2567 = vmatmul.f32.gmra.mxu0 %v5462_v56  ;;  %2632 = vmatmul.f32.gmra.mxu1 %v5478_v21 }
 0x289   : > { %3327 = vmatmul.f32.gmra.mxu2 %v7593_v33  ;;  %3392 = vmatmul.f32.gmra.mxu3 %v1458_v6 }
 0x28a   : > { %3621 = vmatpush.msrb.mxu3 %v3197_v29 }
 0x28c   : > { %v2438_v39 = vpop.f32.mrf.mxu2  ;;  %v2503_v62 = vpop.f32.mrf.mxu3  ;;  %4512 = vmatpush.msra.mxu3 %v4363_v9  ;;  %v7643_v9 = vld [vmem:[#allocation2 + $0xb0] sm:$0xff] }
 0x28d   : > { %v2439_v55 = vadd.f32 %v2438_v39, %v2374_v51  ;;  %v2311_v43 = vpop.f32.mrf.mxu0  ;;  %v2376_v50 = vpop.f32.mrf.mxu1 }
 0x28e   : > { %v2312_v35 = vadd.f32 %v2311_v43, %v7445_v16  ;;  %v3244_v43 = vld [vmem:[#allocation4 + $0x3f8] sm:$0xff] }
 0x28f   : > { %v7601_v58 = vadd.f32 %v2503_v62, %v2439_v55  ;;  %3736 = vmatpush.msra.mxu1 %v3244_v43  ;;  %v3225_v43 = vld [vmem:[#allocation4 + $0x360] sm:$0xff] }
 0x290   : > { %v2377_v6 = vadd.f32 %v2376_v50, %v2312_v35  ;;  %2570 = vmatmul.f32.gmra.mxu0 %v5463_v47  ;;  %2635 = vmatmul.f32.gmra.mxu1 %v5479_v27  ;;  %v3259_v47 = vld [vmem:[#allocation4 + $0x470] sm:$0xff] }
 0x291   : > { %3330 = vmatmul.f32.gmra.mxu2 %v7603_v38  ;;  %3395 = vmatmul.f32.gmra.mxu3 %v1459_v49  ;;  %v3227_v27 = vld [vmem:[#allocation4 + $0x370] sm:$0xff] }
 0x292   : > { %v4362_v35 = vld [vmem:[#allocation4 + $0x70] sm:$0xff]  ;;  %3802 = vmatpush.msra.mxu2 %v3259_v47  ;;  %3737 = vmatpush.msra.mxu1 %v3243_v30  ;;  %v3224_v30 = vld [vmem:[#allocation4 + $0x358] sm:$0xff] }
 0x293   : > { %4513 = vmatpush.msra.mxu3 %v4362_v35  ;;  %v2748_v47 = vld [vmem:[#allocation2 + $0x2] sm:$0xff] }
 0x294   : > { %v2441_v16 = vpop.f32.mrf.mxu2  ;;  %v2506_v25 = vpop.f32.mrf.mxu3  ;;  %3738 = vmatpush.msra.mxu1 %v3242_v53  ;;  %v3255_v53 = vld [vmem:[#allocation4 + $0x450] sm:$0xff] }
 0x295   : > { %v2442_v48 = vadd.f32 %v2441_v16, %v2377_v6  ;;  %v2314_v59 = vpop.f32.mrf.mxu0  ;;  %v2379_v56 = vpop.f32.mrf.mxu1  ;;  %v7633_v16 = vld [vmem:[#allocation2 + $0xa8] sm:$0xff] }
 0x296   : > { %v2315_v21 = vadd.f32 %v2314_v59, %v7461_v61  ;;  %v3228_v61 = vld [vmem:[#allocation4 + $0x378] sm:$0xff]  ;;  %v3226_v59 = vld [vmem:[#allocation4 + $0x368] sm:$0xff] }
 0x297   : > { %v7609_v32 = vadd.f32 %v2506_v25, %v2442_v48  ;;  %3671 = vmatpush.msra.mxu0 %v3228_v61 }
 0x298   : > { %v2380_v51 = vadd.f32 %v2379_v56, %v2315_v21  ;;  %2573 = vmatmul.f32.gmra.mxu0 %v7471_v23  ;;  %2638 = vmatmul.f32.gmra.mxu1 %v7475_v60  ;;  %v4361_v56 = vld [vmem:[#allocation4 + $0x68] sm:$0xff] }
 0x299   : > { %3333 = vmatmul.f32.gmra.mxu2 %v7613_v1  ;;  %3398 = vmatmul.f32.gmra.mxu3 %v1460_v18  ;;  %v7623_v18 = vld [vmem:[#allocation2 + $0x98] sm:$0xff] }
 0x29a   : > { %3672 = vmatpush.msra.mxu0 %v3227_v27  ;;  %4514 = vmatpush.msra.mxu3 %v4361_v56  ;;  %v3240_v56 = vld [vmem:[#allocation4 + $0x3d8] sm:$0xff] }
 0x29c   : > { %v2444_v49 = vpop.f32.mrf.mxu2  ;;  %v2509_v52 = vpop.f32.mrf.mxu3  ;;  %3673 = vmatpush.msra.mxu0 %v3226_v59 }
 0x29d   : > { %v2445_v39 = vadd.f32 %v2444_v49, %v2380_v51  ;;  %v2317_v62 = vpop.f32.mrf.mxu0  ;;  %v2382_v55 = vpop.f32.mrf.mxu1  ;;  %v5467_v49 = vld [vmem:[%s6041_s6 + $0x1a1] sm:$0xff] }
 0x29e   : > { %v2318_v23 = vadd.f32 %v2317_v62, %v7478_v54  ;;  %3674 = vmatpush.msra.mxu0 %v3225_v43  ;;  %v3239_v43 = vld [vmem:[#allocation4 + $0x3d0] sm:$0xff] }
 0x29f   : > { %v7619_v60 = vadd.f32 %v2509_v52, %v2445_v39  ;;  %v5483_v52 = vld [vmem:[%s6041_s6 + $0x1a2] sm:$0xff]  ;;  %v8389_v39 = vmax.f32 %v7458_v57, 0.0 }
 0x2a0   : > { %v2383_v11 = vadd.f32 %v2382_v55, %v2318_v23  ;;  %2576 = vmatmul.f32.gmra.mxu0 %v7484_v19  ;;  %2641 = vmatmul.f32.gmra.mxu1 %v7488_v31  ;;  %v5482_v19 = vld [vmem:[%s6041_s6 + $0x19a] sm:$0xff]  ;;  %v3257_v23 = vld [vmem:[#allocation4 + $0x460] sm:$0xff] }
 0x2a1   : > { %3336 = vmatmul.f32.gmra.mxu2 %v7623_v18  ;;  %3401 = vmatmul.f32.gmra.mxu3 %v1461_v24 }
 0x2a2   : > { %3675 = vmatpush.msra.mxu0 %v3224_v30 }
 0x2a4   : > { %v2447_v54 = vpop.f32.mrf.mxu2  ;;  %v2512_v50 = vpop.f32.mrf.mxu3 }
 0x2a5   : > { %v2448_v0 = vadd.f32 %v2447_v54, %v2383_v11  ;;  %v2320_v6 = vpop.f32.mrf.mxu0  ;;  %v2385_v42 = vpop.f32.mrf.mxu1 }
 0x2a6   : > { %v2321_v31 = vadd.f32 %v2320_v6, %v7491_v2  ;;  %v3258_v2 = vld [vmem:[#allocation4 + $0x468] sm:$0xff] }
 0x2a7   : > { %v7631_v29 = vadd.f32 %v2512_v50, %v2448_v0  ;;  %3803 = vmatpush.msra.mxu2 %v3258_v2  ;;  %v3241_v0 = vld [vmem:[#allocation4 + $0x3e0] sm:$0xff]  ;;  %v2844_v6 = vld [vmem:[#allocation2 + $0x1a] sm:$0xff] }
 0x2a8   : > { %v2386_v24 = vadd.f32 %v2385_v42, %v2321_v31  ;;  %2579 = vmatmul.f32.gmra.mxu0 %v5466_v36  ;;  %2644 = vmatmul.f32.gmra.mxu1 %v5482_v19  ;;  %v7656_v42 = vld [vmem:[%s8374_s4] ss:$0 sm:$0xff]  ;;  %v3256_v31 = vld [vmem:[#allocation4 + $0x458] sm:$0xff] }
 0x2a9   : > { %3339 = vmatmul.f32.gmra.mxu2 %v7633_v16  ;;  %3404 = vmatmul.f32.gmra.mxu3 %v1462_v28  ;;  %v2749_v2 = vld [vmem:[#allocation2 + $0xa] sm:$0xff] }
 0x2aa   : > { %3804 = vmatpush.msra.mxu2 %v3257_v23  ;;  %3739 = vmatpush.msra.mxu1 %v3241_v0  ;;  %v3222_v0 = vld [vmem:[#allocation4 + $0x348] sm:$0xff] }
 0x2ac   : > { %v2450_v25 = vpop.f32.mrf.mxu2  ;;  %v2515_v48 = vpop.f32.mrf.mxu3  ;;  %3805 = vmatpush.msra.mxu2 %v3256_v31  ;;  %3740 = vmatpush.msra.mxu1 %v3240_v56  ;;  %v3238_v31 = vld [vmem:[#allocation4 + $0x3c8] sm:$0xff]  ;;  %v4356_v56 = vld [vmem:[#allocation4 + $0x40] sm:$0xff] }
 0x2ad   : > { %v2451_v21 = vadd.f32 %v2450_v25, %v2386_v24  ;;  %v2323_v8 = vpop.f32.mrf.mxu0  ;;  %v2388_v51 = vpop.f32.mrf.mxu1  ;;  %v4359_v24 = vld [vmem:[#allocation4 + $0x58] sm:$0xff] }
 0x2ae   : > { %v2324_v15 = vadd.f32 %v2323_v8, %v7499_v26  ;;  %v4360_v26 = vld [vmem:[#allocation4 + $0x60] sm:$0xff]  ;;  %v2813_v8 = vld [vmem:[#allocation2 + $0x21] sm:$0xff]  ;;  %3806 = vmatpush.msra.mxu2 %v3255_v53  ;;  %3741 = vmatpush.msra.mxu1 %v3239_v43 }
 0x2af   : > { %v7641_v61 = vadd.f32 %v2515_v48, %v2451_v21  ;;  %4515 = vmatpush.msra.mxu3 %v4360_v26  ;;  %v7691_v53 = vld [vmem:[#allocation2 + $0x49] sm:$0xff] }
 0x2b0   : > { %v2389_v28 = vadd.f32 %v2388_v51, %v2324_v15  ;;  %2582 = vmatmul.f32.gmra.mxu0 %v5467_v49  ;;  %2647 = vmatmul.f32.gmra.mxu1 %v5483_v52  ;;  %v2845_v51 = vld [vmem:[#allocation2 + $0x22] sm:$0xff] }
 0x2b1   : > { %3342 = vmatmul.f32.gmra.mxu2 %v7643_v9  ;;  %3407 = vmatmul.f32.gmra.mxu3 %v8389_v39 }
 0x2b2   : > { %4516 = vmatpush.msra.mxu3 %v4359_v24  ;;  %v7679_v24 = vld [vmem:[#allocation2 + $0x39] sm:$0xff]  ;;  %3742 = vmatpush.msra.mxu1 %v3238_v31 }
 0x2b3   : > { %v4354_v31 = vld [vmem:[#allocation4 + $0x30] sm:$0xff] }
 0x2b4   : > { %v2453_v62 = vpop.f32.mrf.mxu2  ;;  %v2518_v55 = vpop.f32.mrf.mxu3 }
 0x2b5   : > { %v2454_v11 = vadd.f32 %v2453_v62, %v2389_v28  ;;  %v2538_v54 = vpop.f32.mrf.mxu0  ;;  %v2603_v50 = vpop.f32.mrf.mxu1  ;;  %v3223_v28 = vld [vmem:[#allocation4 + $0x350] sm:$0xff] }
 0x2b6   : > { %v2539_v27 = vadd.f32 %v2538_v54, %v7504_v46  ;;  %3676 = vmatpush.msra.mxu0 %v3223_v28  ;;  %v7670_v54 = vld [vmem:[#allocation2 + $0x32] sm:$0xff]  ;;  %v7693_v28 = vld [vmem:[#allocation2 + $0x4a] sm:$0xff] }
 0x2b7   : > { %v7649_v35 = vadd.f32 %v2518_v55, %v2454_v11  ;;  %v7668_v11 = vld [vmem:[#allocation2 + $0x31] sm:$0xff] }
 0x2b8   : > { %v2604_v57 = vadd.f32 %v2603_v50, %v2539_v27  ;;  %3427 = vmatmul.f32.vlgmr.msrb.gmra.mxu0 %v2748_v47  ;;  %3492 = vmatmul.f32.vlgmr.msrb.gmra.mxu1 %v7512_v34  ;;  %v3254_v27 = vld [vmem:[#allocation4 + $0x448] sm:$0xff] }
 0x2b9   : > { %3557 = vmatmul.f32.vlgmr.msrb.gmra.mxu2 %v7514_v5  ;;  %3622 = vmatmul.f32.vlgmr.msrb.gmra.mxu3 %v2844_v6 }
 0x2ba   : > { %v2651_v36 = vmax.f32 %v2604_v57, 0.0  ;;  %v4357_v57 = vld [vmem:[#allocation4 + $0x48] sm:$0xff]  ;;  %3807 = vmatpush.msra.mxu2 %v3254_v27  ;;  %3677 = vmatpush.msra.mxu0 %v3222_v0 }
 0x2bb   : > { %v7703_v0 = vld [vmem:[#allocation2 + $0x51] sm:$0xff] }
 0x2bc   : > { %2668 = vst [vmem:[#allocation2 + $0xd9] sm:$0xff] %v2651_v36  ;;  %v3298_v46 = vpop.f32.mrf.mxu2  ;;  %v3363_v19 = vpop.f32.mrf.mxu3 }
 0x2bd   : > { %v3299_v25 = vadd.f32 %v7656_v42, %v3298_v46  ;;  %v2541_v34 = vpop.f32.mrf.mxu0  ;;  %v2606_v48 = vpop.f32.mrf.mxu1 }
 0x2be   : > { %v2542_v5 = vadd.f32 %v2541_v34, %v7510_v17  ;;  %v4358_v17 = vld [vmem:[#allocation4 + $0x50] sm:$0xff] }
 0x2bf   : > { %v7660_v59 = vadd.f32 %v3363_v19, %v3299_v25  ;;  %4517 = vmatpush.msra.mxu3 %v4358_v17  ;;  %v7681_v25 = vld [vmem:[#allocation2 + $0x3a] sm:$0xff] }
 0x2c0   : > { %v2607_v21 = vadd.f32 %v2606_v48, %v2542_v5  ;;  %3430 = vmatmul.f32.gmra.mxu0 %v2749_v2  ;;  %3495 = vmatmul.f32.gmra.mxu1 %v7523_v41  ;;  %v3253_v2 = vld [vmem:[#allocation4 + $0x440] sm:$0xff] }
 0x2c1   : > { %3560 = vmatmul.f32.gmra.mxu2 %v2813_v8  ;;  %3625 = vmatmul.f32.gmra.mxu3 %v2845_v51  ;;  %v3221_v5 = vld [vmem:[#allocation4 + $0x340] sm:$0xff] }
 0x2c2   : > { %v2652_v49 = vmax.f32 %v2607_v21, 0.0  ;;  %4518 = vmatpush.msra.mxu3 %v4357_v57  ;;  %3808 = vmatpush.msra.mxu2 %v3253_v2  ;;  %v7705_v57 = vld [vmem:[#allocation2 + $0x52] sm:$0xff]  ;;  %v3235_v2 = vld [vmem:[#allocation4 + $0x3b0] sm:$0xff] }
 0x2c3   : > { %3678 = vmatpush.msra.mxu0 %v3221_v5 }
 0x2c4   : > { %2669 = vst [vmem:[#allocation2 + $0xe1] sm:$0xff] %v2652_v49  ;;  %v3301_v52 = vpop.f32.mrf.mxu2  ;;  %v3366_v15 = vpop.f32.mrf.mxu3  ;;  %4519 = vmatpush.msra.mxu3 %v4356_v56  ;;  %v7715_v56 = vld [vmem:[#allocation2 + $0x61] sm:$0xff] }
 0x2c5   : > { %v3302_v39 = vadd.f32 %v7656_v42, %v3301_v52  ;;  %v2544_v62 = vpop.f32.mrf.mxu0  ;;  %v2609_v55 = vpop.f32.mrf.mxu1  ;;  %v3237_v52 = vld [vmem:[#allocation4 + $0x3c0] sm:$0xff] }
 0x2c6   : > { %v2545_v41 = vadd.f32 %v2544_v62, %v7521_v63  ;;  %3743 = vmatpush.msra.mxu1 %v3237_v52  ;;  %v3252_v62 = vld [vmem:[#allocation4 + $0x438] sm:$0xff]  ;;  %v3218_v52 = vld [vmem:[#allocation4 + $0x328] sm:$0xff] }
 0x2c7   : > { %v7665_v23 = vadd.f32 %v3366_v15, %v3302_v39  ;;  %3809 = vmatpush.msra.mxu2 %v3252_v62 }
 0x2c8   : > { %v2610_v26 = vadd.f32 %v2609_v55, %v2545_v41  ;;  %3433 = vmatmul.f32.gmra.mxu0 %v2844_v6  ;;  %3498 = vmatmul.f32.gmra.mxu1 %v7533_v7  ;;  %v3220_v55 = vld [vmem:[#allocation4 + $0x338] sm:$0xff] }
 0x2c9   : > { %3563 = vmatmul.f32.gmra.mxu2 %v7668_v11  ;;  %3628 = vmatmul.f32.gmra.mxu3 %v7670_v54  ;;  %v4355_v41 = vld [vmem:[#allocation4 + $0x38] sm:$0xff] }
 0x2ca   : > { %v2653_v50 = vmax.f32 %v2610_v26, 0.0  ;;  %3679 = vmatpush.msra.mxu0 %v3220_v55  ;;  %4520 = vmatpush.msra.mxu3 %v4355_v41  ;;  %v3234_v55 = vld [vmem:[#allocation4 + $0x3a8] sm:$0xff] }
 0x2cc   : > { %2670 = vst [vmem:[#allocation2 + $0xf1] sm:$0xff] %v2653_v50  ;;  %v3304_v63 = vpop.f32.mrf.mxu2  ;;  %v3369_v47 = vpop.f32.mrf.mxu3  ;;  %4521 = vmatpush.msra.mxu3 %v4354_v31  ;;  %v3233_v31 = vld [vmem:[#allocation4 + $0x3a0] sm:$0xff] }
 0x2cd   : > { %v3305_v6 = vadd.f32 %v7656_v42, %v3304_v63  ;;  %v2547_v36 = vpop.f32.mrf.mxu0  ;;  %v2612_v7 = vpop.f32.mrf.mxu1 }
 0x2ce   : > { %v2548_v46 = vadd.f32 %v2547_v36, %v7531_v37 }
 0x2cf   : > { %v7676_v19 = vadd.f32 %v3369_v47, %v3305_v6  ;;  %v3236_v47 = vld [vmem:[#allocation4 + $0x3b8] sm:$0xff] }
 0x2d0   : > { %v2613_v30 = vadd.f32 %v2612_v7, %v2548_v46  ;;  %3436 = vmatmul.f32.gmra.mxu0 %v2845_v51  ;;  %3501 = vmatmul.f32.gmra.mxu1 %v7543_v20  ;;  %v3251_v7 = vld [vmem:[#allocation4 + $0x430] sm:$0xff] }
 0x2d1   : > { %3566 = vmatmul.f32.gmra.mxu2 %v7679_v24  ;;  %3631 = vmatmul.f32.gmra.mxu3 %v7681_v25  ;;  %v3219_v46 = vld [vmem:[#allocation4 + $0x330] sm:$0xff] }
 0x2d2   : > { %v2654_v34 = vmax.f32 %v2613_v30, 0.0  ;;  %3744 = vmatpush.msra.mxu1 %v3236_v47  ;;  %3810 = vmatpush.msra.mxu2 %v3251_v7  ;;  %v3249_v47 = vld [vmem:[#allocation4 + $0x420] sm:$0xff] }
 0x2d3   : > { %3680 = vmatpush.msra.mxu0 %v3219_v46 }
 0x2d4   : > { %2671 = vst [vmem:[#allocation2 + $0xf9] sm:$0xff] %v2654_v34  ;;  %v3307_v37 = vpop.f32.mrf.mxu2  ;;  %v3372_v48 = vpop.f32.mrf.mxu3  ;;  %3745 = vmatpush.msra.mxu1 %v3235_v2 }
 0x2d5   : > { %v3308_v21 = vadd.f32 %v7656_v42, %v3307_v37  ;;  %v2550_v8 = vpop.f32.mrf.mxu0  ;;  %v2615_v20 = vpop.f32.mrf.mxu1  ;;  %3681 = vmatpush.msra.mxu0 %v3218_v52 }
 0x2d6   : > { %v2551_v51 = vadd.f32 %v2550_v8, %v7541_v4  ;;  %3746 = vmatpush.msra.mxu1 %v3234_v55 }
 0x2d7   : > { %v7687_v49 = vadd.f32 %v3372_v48, %v3308_v21  ;;  %v7717_v21 = vld [vmem:[#allocation2 + $0x62] sm:$0xff] }
 0x2d8   : > { %v2616_v15 = vadd.f32 %v2615_v20, %v2551_v51  ;;  %3439 = vmatmul.f32.gmra.mxu0 %v7670_v54  ;;  %3504 = vmatmul.f32.gmra.mxu1 %v7553_v40  ;;  %v3250_v51 = vld [vmem:[#allocation4 + $0x428] sm:$0xff] }
 0x2d9   : > { %3569 = vmatmul.f32.gmra.mxu2 %v7691_v53  ;;  %3634 = vmatmul.f32.gmra.mxu3 %v7693_v28 }
 0x2da   : > { %v2655_v17 = vmax.f32 %v2616_v15, 0.0  ;;  %v4353_v15 = vld [vmem:[#allocation4 + $0x28] sm:$0xff]  ;;  %3811 = vmatpush.msra.mxu2 %v3250_v51  ;;  %3747 = vmatpush.msra.mxu1 %v3233_v31 }
 0x2db   : > { %4522 = vmatpush.msra.mxu3 %v4353_v15  ;;  %v7765_v31 = vld [vmem:[#allocation2 + $0x92] sm:$0xff] }
 0x2dc   : > { %2672 = vst [vmem:[#allocation2 + $0x109] sm:$0xff] %v2655_v17  ;;  %v3310_v4 = vpop.f32.mrf.mxu2  ;;  %v3375_v39 = vpop.f32.mrf.mxu3  ;;  %3812 = vmatpush.msra.mxu2 %v3249_v47 }
 0x2dd   : > { %v3311_v43 = vadd.f32 %v7656_v42, %v3310_v4  ;;  %v2553_v26 = vpop.f32.mrf.mxu0  ;;  %v2618_v40 = vpop.f32.mrf.mxu1 }
 0x2de   : > { %v2554_v50 = vadd.f32 %v2553_v26, %v7551_v45  ;;  %v7729_v26 = vld [vmem:[#allocation2 + $0x6a] sm:$0xff] }
 0x2df   : > { %v7699_v63 = vadd.f32 %v3375_v39, %v3311_v43  ;;  %v7727_v43 = vld [vmem:[#allocation2 + $0x69] sm:$0xff] }
 0x2e0   : > { %v2619_v27 = vadd.f32 %v2618_v40, %v2554_v50  ;;  %3442 = vmatmul.f32.gmra.mxu0 %v7681_v25  ;;  %3507 = vmatmul.f32.gmra.mxu1 %v7563_v13 }
 0x2e1   : > { %3572 = vmatmul.f32.gmra.mxu2 %v7703_v0  ;;  %3637 = vmatmul.f32.gmra.mxu3 %v7705_v57 }
 0x2e2   : > { %v2656_v6 = vmax.f32 %v2619_v27, 0.0  ;;  %v3217_v27 = vld [vmem:[#allocation4 + $0x320] sm:$0xff] }
 0x2e3   : > { %3682 = vmatpush.msra.mxu0 %v3217_v27 }
 0x2e4   : > { %2673 = vst [vmem:[#allocation2 + $0x111] sm:$0xff] %v2656_v6  ;;  %v3313_v45 = vpop.f32.mrf.mxu2  ;;  %v3378_v36 = vpop.f32.mrf.mxu3  ;;  %v4352_v6 = vld [vmem:[#allocation4 + $0x20] sm:$0xff] }
 0x2e5   : > { %v3314_v30 = vadd.f32 %v7656_v42, %v3313_v45  ;;  %v2556_v34 = vpop.f32.mrf.mxu0  ;;  %v2621_v13 = vpop.f32.mrf.mxu1  ;;  %4523 = vmatpush.msra.mxu3 %v4352_v6 }
 0x2e6   : > { %v2557_v37 = vadd.f32 %v2556_v34, %v7561_v3  ;;  %v7739_v34 = vld [vmem:[#allocation2 + $0x79] sm:$0xff] }
 0x2e7   : > { %v7711_v48 = vadd.f32 %v3378_v36, %v3314_v30 }
 0x2e8   : > { %v2622_v5 = vadd.f32 %v2621_v13, %v2557_v37  ;;  %3445 = vmatmul.f32.gmra.mxu0 %v7693_v28  ;;  %3510 = vmatmul.f32.gmra.mxu1 %v7573_v12  ;;  %v7741_v13 = vld [vmem:[#allocation2 + $0x7a] sm:$0xff] }
 0x2e9   : > { %3575 = vmatmul.f32.gmra.mxu2 %v7715_v56  ;;  %3640 = vmatmul.f32.gmra.mxu3 %v7717_v21 }
 0x2ea   : > { %v2657_v8 = vmax.f32 %v2622_v5, 0.0  ;;  %v3248_v5 = vld [vmem:[#allocation4 + $0x418] sm:$0xff] }
 0x2eb   : > { %3813 = vmatpush.msra.mxu2 %v3248_v5  ;;  %v4349_v5 = vld [vmem:[#allocation4 + $0x8] sm:$0xff] }
 0x2ec   : > { %2674 = vst [vmem:[#allocation2 + $0x121] sm:$0xff] %v2657_v8  ;;  %v3316_v3 = vpop.f32.mrf.mxu2  ;;  %v3381_v20 = vpop.f32.mrf.mxu3  ;;  %v3216_v8 = vld [vmem:[#allocation4 + $0x318] sm:$0xff] }
 0x2ed   : > { %v3317_v17 = vadd.f32 %v7656_v42, %v3316_v3  ;;  %v2559_v4 = vpop.f32.mrf.mxu0  ;;  %v2624_v12 = vpop.f32.mrf.mxu1  ;;  %v4351_v3 = vld [vmem:[#allocation4 + $0x18] sm:$0xff]  ;;  %3683 = vmatpush.msra.mxu0 %v3216_v8 }
 0x2ee   : > { %v2560_v39 = vadd.f32 %v2559_v4, %v7571_v22  ;;  %4524 = vmatpush.msra.mxu3 %v4351_v3 }
 0x2ef   : > { %v7723_v62 = vadd.f32 %v3381_v20, %v3317_v17  ;;  %v3232_v17 = vld [vmem:[#allocation4 + $0x398] sm:$0xff] }
 0x2f0   : > { %v2625_v41 = vadd.f32 %v2624_v12, %v2560_v39  ;;  %3448 = vmatmul.f32.gmra.mxu0 %v7705_v57  ;;  %3513 = vmatmul.f32.gmra.mxu1 %v7583_v14  ;;  %v7751_v12 = vld [vmem:[#allocation2 + $0x81] sm:$0xff] }
 0x2f1   : > { %3578 = vmatmul.f32.gmra.mxu2 %v7727_v43  ;;  %3643 = vmatmul.f32.gmra.mxu3 %v7729_v26  ;;  %v7753_v39 = vld [vmem:[#allocation2 + $0x82] sm:$0xff] }
 0x2f2   : > { %v2658_v40 = vmax.f32 %v2625_v41, 0.0  ;;  %3748 = vmatpush.msra.mxu1 %v3232_v17  ;;  %v7775_v17 = vld [vmem:[#allocation2 + $0x99] sm:$0xff] }
 0x2f4   : > { %2675 = vst [vmem:[#allocation2 + $0x129] sm:$0xff] %v2658_v40  ;;  %v3319_v22 = vpop.f32.mrf.mxu2  ;;  %v3384_v50 = vpop.f32.mrf.mxu3  ;;  %v3247_v40 = vld [vmem:[#allocation4 + $0x410] sm:$0xff] }
 0x2f5   : > { %v3320_v45 = vadd.f32 %v7656_v42, %v3319_v22  ;;  %v2562_v36 = vpop.f32.mrf.mxu0  ;;  %v2627_v14 = vpop.f32.mrf.mxu1  ;;  %v3215_v22 = vld [vmem:[#allocation4 + $0x310] sm:$0xff]  ;;  %3814 = vmatpush.msra.mxu2 %v3247_v40  ;;  %v3213_v40 = vld [vmem:[#allocation4 + $0x300] sm:$0xff] }
 0x2f6   : > { %v2563_v7 = vadd.f32 %v2562_v36, %v7581_v44  ;;  %3684 = vmatpush.msra.mxu0 %v3215_v22  ;;  %v3231_v36 = vld [vmem:[#allocation4 + $0x390] sm:$0xff]  ;;  %v4348_v22 = vld [vmem:[#allocation4] sm:$0xff] }
 0x2f7   : > { %v7735_v46 = vadd.f32 %v3384_v50, %v3320_v45  ;;  %v4350_v50 = vld [vmem:[#allocation4 + $0x10] sm:$0xff]  ;;  %3749 = vmatpush.msra.mxu1 %v3231_v36 }
 0x2f8   : > { %v2628_v30 = vadd.f32 %v2627_v14, %v2563_v7  ;;  %3451 = vmatmul.f32.gmra.mxu0 %v7717_v21  ;;  %3516 = vmatmul.f32.gmra.mxu1 %v7593_v33  ;;  %v7763_v7 = vld [vmem:[#allocation2 + $0x91] sm:$0xff] }
 0x2f9   : > { %3581 = vmatmul.f32.gmra.mxu2 %v7739_v34  ;;  %3646 = vmatmul.f32.gmra.mxu3 %v7741_v13 }
 0x2fa   : > { %v2659_v37 = vmax.f32 %v2628_v30, 0.0  ;;  %4525 = vmatpush.msra.mxu3 %v4350_v50 }
 0x2fc   : > { %2676 = vst [vmem:[#allocation2 + $0x139] sm:$0xff] %v2659_v37  ;;  %v3322_v44 = vpop.f32.mrf.mxu2  ;;  %v3387_v2 = vpop.f32.mrf.mxu3  ;;  %4526 = vmatpush.msra.mxu3 %v4349_v5 }
 0x2fd   : > { %v3323_v20 = vadd.f32 %v7656_v42, %v3322_v44  ;;  %v2565_v51 = vpop.f32.mrf.mxu0  ;;  %v2630_v33 = vpop.f32.mrf.mxu1  ;;  %v3246_v44 = vld [vmem:[#allocation4 + $0x408] sm:$0xff] }
 0x2fe   : > { %v2566_v52 = vadd.f32 %v2565_v51, %v7591_v10  ;;  %3815 = vmatpush.msra.mxu2 %v3246_v44  ;;  %4527 = vmatpush.msra.mxu3 %v4348_v22 }
 0x2ff   : > { %v7747_v15 = vadd.f32 %v3387_v2, %v3323_v20  ;;  %v3214_v2 = vld [vmem:[#allocation4 + $0x308] sm:$0xff] }
 0x300   : > { %v2631_v4 = vadd.f32 %v2630_v33, %v2566_v52  ;;  %3454 = vmatmul.f32.gmra.mxu0 %v7729_v26  ;;  %3519 = vmatmul.f32.gmra.mxu1 %v7603_v38  ;;  %v3230_v33 = vld [vmem:[#allocation4 + $0x388] sm:$0xff] }
 0x301   : > { %3584 = vmatmul.f32.gmra.mxu2 %v7751_v12  ;;  %3649 = vmatmul.f32.gmra.mxu3 %v7753_v39 }
 0x302   : > { %v2660_v55 = vmax.f32 %v2631_v4, 0.0  ;;  %3685 = vmatpush.msra.mxu0 %v3214_v2  ;;  %v7777_v4 = vld [vmem:[#allocation2 + $0x9a] sm:$0xff]  ;;  %3750 = vmatpush.msra.mxu1 %v3230_v33  ;;  %v4395_v33 = vld [vmem:[#allocation4 + $0x178] sm:$0xff] }
 0x304   : > { %2677 = vst [vmem:[#allocation2 + $0x141] sm:$0xff] %v2660_v55  ;;  %v3325_v10 = vpop.f32.mrf.mxu2  ;;  %v3390_v41 = vpop.f32.mrf.mxu3  ;;  %3686 = vmatpush.msra.mxu0 %v3213_v40  ;;  %v4426_v40 = vld [vmem:[#allocation4 + $0x270] sm:$0xff] }
 0x305   : > { %v3326_v47 = vadd.f32 %v7656_v42, %v3325_v10  ;;  %v2568_v27 = vpop.f32.mrf.mxu0  ;;  %v2633_v38 = vpop.f32.mrf.mxu1 }
 0x306   : > { %v2569_v6 = vadd.f32 %v2568_v27, %v7601_v58 }
 0x307   : > { %v7759_v45 = vadd.f32 %v3390_v41, %v3326_v47  ;;  %v3245_v41 = vld [vmem:[#allocation4 + $0x400] sm:$0xff] }
 0x308   : > { %v2634_v14 = vadd.f32 %v2633_v38, %v2569_v6  ;;  %3457 = vmatmul.f32.gmra.mxu0 %v7741_v13  ;;  %3522 = vmatmul.f32.gmra.mxu1 %v7613_v1  ;;  %v3229_v6 = vld [vmem:[#allocation4 + $0x380] sm:$0xff] }
 0x309   : > { %3587 = vmatmul.f32.gmra.mxu2 %v7763_v7  ;;  %3652 = vmatmul.f32.gmra.mxu3 %v7765_v31 }
 0x30a   : > { %v2661_v30 = vmax.f32 %v2634_v14, 0.0  ;;  %3816 = vmatpush.msra.mxu2 %v3245_v41  ;;  %v7787_v14 = vld [vmem:[#allocation2 + $0xa9] sm:$0xff]  ;;  %3751 = vmatpush.msra.mxu1 %v3229_v6  ;;  %v4378_v41 = vld [vmem:[#allocation4 + $0xf0] sm:$0xff] }
 0x30c   : > { %2678 = vst [vmem:[#allocation2 + $0x151] sm:$0xff] %v2661_v30  ;;  %v3328_v58 = vpop.f32.mrf.mxu2  ;;  %v3393_v37 = vpop.f32.mrf.mxu3  ;;  %v7789_v30 = vld [vmem:[#allocation2 + $0xaa] sm:$0xff]  ;;  %4642 = vmatpush.msrb.mxu1 %v4395_v33 }
 0x30d   : > { %v3329_v8 = vadd.f32 %v7656_v42, %v3328_v58  ;;  %v2571_v3 = vpop.f32.mrf.mxu0  ;;  %v2636_v1 = vpop.f32.mrf.mxu1  ;;  %v4411_v58 = vld [vmem:[#allocation4 + $0x1f8] sm:$0xff] }
 0x30e   : > { %v2572_v20 = vadd.f32 %v2571_v3, %v7609_v32  ;;  %4707 = vmatpush.msrb.mxu2 %v4411_v58  ;;  %v4394_v58 = vld [vmem:[#allocation4 + $0x170] sm:$0xff] }
 0x30f   : > { %v7771_v51 = vadd.f32 %v3393_v37, %v3329_v8  ;;  %v4379_v37 = vld [vmem:[#allocation4 + $0xf8] sm:$0xff]  ;;  %4643 = vmatpush.msrb.mxu1 %v4394_v58 }
 0x310   : > { %v2637_v52 = vadd.f32 %v2636_v1, %v2572_v20  ;;  %3460 = vmatmul.f32.gmra.mxu0 %v7753_v39  ;;  %3525 = vmatmul.f32.gmra.mxu1 %v7623_v18 }
 0x311   : > { %3590 = vmatmul.f32.gmra.mxu2 %v7775_v17  ;;  %3655 = vmatmul.f32.gmra.mxu3 %v7777_v4 }
 0x312   : > { %v2662_v55 = vmax.f32 %v2637_v52, 0.0  ;;  %4577 = vmatpush.msrb.mxu0 %v4379_v37 }
 0x314   : > { %2679 = vst [vmem:[#allocation2 + $0x159] sm:$0xff] %v2662_v55  ;;  %v3331_v32 = vpop.f32.mrf.mxu2  ;;  %v3396_v10 = vpop.f32.mrf.mxu3  ;;  %v7799_v55 = vld [vmem:[#allocation2 + $0xb1] sm:$0xff]  ;;  %4578 = vmatpush.msrb.mxu0 %v4378_v41 }
 0x315   : > { %v3332_v50 = vadd.f32 %v7656_v42, %v3331_v32  ;;  %v2574_v47 = vpop.f32.mrf.mxu0  ;;  %v2639_v18 = vpop.f32.mrf.mxu1  ;;  %v7801_v32 = vld [vmem:[#allocation2 + $0xb2] sm:$0xff] }
 0x316   : > { %v2575_v27 = vadd.f32 %v2574_v47, %v7619_v60  ;;  %v4427_v60 = vld [vmem:[#allocation4 + $0x278] sm:$0xff] }
 0x317   : > { %v7783_v38 = vadd.f32 %v3396_v10, %v3332_v50  ;;  %4772 = vmatpush.msrb.mxu3 %v4427_v60  ;;  %v4410_v10 = vld [vmem:[#allocation4 + $0x1f0] sm:$0xff] }
 0x318   : > { %v2640_v36 = vadd.f32 %v2639_v18, %v2575_v27  ;;  %3463 = vmatmul.f32.gmra.mxu0 %v7765_v31  ;;  %3528 = vmatmul.f32.gmra.mxu1 %v7633_v16  ;;  %v7813_v60 = vld [vmem:[#allocation2 + $0xc1] sm:$0xff] }
 0x319   : > { %3593 = vmatmul.f32.gmra.mxu2 %v7787_v14  ;;  %3658 = vmatmul.f32.gmra.mxu3 %v7789_v30 }
 0x31a   : > { %v2663_v44 = vmax.f32 %v2640_v36, 0.0  ;;  %4708 = vmatpush.msrb.mxu2 %v4410_v10  ;;  %4773 = vmatpush.msrb.mxu3 %v4426_v40  ;;  %v7809_v36 = vld [vmem:[#allocation2 + $0xc0] sm:$0xff]  ;;  %v7823_v40 = vld [vmem:[#allocation2 + $0xc8] sm:$0xff] }
 0x31c   : > { %2680 = vst [vmem:[#allocation2 + $0x169] sm:$0xff] %v2663_v44  ;;  %v3334_v2 = vpop.f32.mrf.mxu2  ;;  %v3399_v5 = vpop.f32.mrf.mxu3  ;;  %v7815_v44 = vld [vmem:[#allocation2 + $0xc2] sm:$0xff] }
 0x31d   : > { %v3335_v16 = vadd.f32 %v7656_v42, %v3334_v2  ;;  %v2577_v8 = vpop.f32.mrf.mxu0  ;;  %v2642_v3 = vpop.f32.mrf.mxu1  ;;  %v4409_v2 = vld [vmem:[#allocation4 + $0x1e8] sm:$0xff] }
 0x31e   : > { %v2578_v1 = vadd.f32 %v2577_v8, %v7631_v29  ;;  %4709 = vmatpush.msrb.mxu2 %v4409_v2 }
 0x31f   : > { %v7795_v20 = vadd.f32 %v3399_v5, %v3335_v16  ;;  %v4425_v5 = vld [vmem:[#allocation4 + $0x268] sm:$0xff] }
 0x320   : > { %v2643_v52 = vadd.f32 %v2642_v3, %v2578_v1  ;;  %3466 = vmatmul.f32.gmra.mxu0 %v7777_v4  ;;  %3531 = vmatmul.f32.gmra.mxu1 %v7643_v9 }
 0x321   : > { %3596 = vmatmul.f32.gmra.mxu2 %v7799_v55  ;;  %3661 = vmatmul.f32.gmra.mxu3 %v7801_v32 }
 0x322   : > { %v2664_v29 = vmax.f32 %v2643_v52, 0.0  ;;  %4774 = vmatpush.msrb.mxu3 %v4425_v5 }
 0x324   : > { %2681 = vst [vmem:[#allocation2 + $0x171] sm:$0xff] %v2664_v29  ;;  %v3337_v22 = vpop.f32.mrf.mxu2  ;;  %v3402_v50 = vpop.f32.mrf.mxu3  ;;  %v4393_v29 = vld [vmem:[#allocation4 + $0x168] sm:$0xff] }
 0x325   : > { %v3338_v9 = vadd.f32 %v7656_v42, %v3337_v22  ;;  %v2580_v47 = vpop.f32.mrf.mxu0  ;;  %v2645_v18 = vpop.f32.mrf.mxu1  ;;  %4644 = vmatpush.msrb.mxu1 %v4393_v29  ;;  %v4423_v29 = vld [vmem:[#allocation4 + $0x258] sm:$0xff] }
 0x326   : > { %v2581_v27 = vadd.f32 %v2580_v47, %v7641_v61  ;;  %v4377_v61 = vld [vmem:[#allocation4 + $0xe8] sm:$0xff]  ;;  %v4408_v47 = vld [vmem:[#allocation4 + $0x1e0] sm:$0xff] }
 0x327   : > { %v7807_v6 = vadd.f32 %v3402_v50, %v3338_v9  ;;  %4579 = vmatpush.msrb.mxu0 %v4377_v61  ;;  %v7827_v50 = vld [vmem:[#allocation2 + $0xc9] sm:$0xff]  ;;  %4710 = vmatpush.msrb.mxu2 %v4408_v47 }
 0x328   : > { %v2646_v37 = vadd.f32 %v2645_v18, %v2581_v27  ;;  %3469 = vmatmul.f32.gmra.mxu0 %v7789_v30  ;;  %3534 = vmatmul.f32.gmra.mxu1 %v7809_v36  ;;  %v7829_v9 = vld [vmem:[#allocation2 + $0xca] sm:$0xff] }
 0x329   : > { %3599 = vmatmul.f32.gmra.mxu2 %v7813_v60  ;;  %3664 = vmatmul.f32.gmra.mxu3 %v7815_v44  ;;  %v4424_v18 = vld [vmem:[#allocation4 + $0x260] sm:$0xff] }
 0x32a   : > { %v2665_v16 = vmax.f32 %v2646_v37, 0.0  ;;  %4775 = vmatpush.msrb.mxu3 %v4424_v18 }
 0x32c   : > { %2682 = vst [vmem:[#allocation2 + $0x181] sm:$0xff] %v2665_v16  ;;  %v3340_v8 = vpop.f32.mrf.mxu2  ;;  %v3405_v3 = vpop.f32.mrf.mxu3  ;;  %4776 = vmatpush.msrb.mxu3 %v4423_v29  ;;  %v7850_v29 = vld [vmem:[#allocation2 + $0xd8] sm:$0xff] }
 0x32d   : > { %v3341_v1 = vadd.f32 %v7656_v42, %v3340_v8  ;;  %v2583_v33 = vpop.f32.mrf.mxu0  ;;  %v2648_v52 = vpop.f32.mrf.mxu1 }
 0x32e   : > { %v2584_v10 = vadd.f32 %v2583_v33, %v7649_v35  ;;  %v4376_v35 = vld [vmem:[#allocation4 + $0xe0] sm:$0xff] }
 0x32f   : > { %v7821_v41 = vadd.f32 %v3405_v3, %v3341_v1  ;;  %4580 = vmatpush.msrb.mxu0 %v4376_v35  ;;  %v2877_v3 = vld [vmem:[#allocation2 + $0x30] sm:$0xff] }
 0x330   : > { %v2649_v22 = vadd.f32 %v2648_v52, %v2584_v10  ;;  %3472 = vmatmul.f32.gmra.mxu0 %v7801_v32  ;;  %3537 = vmatmul.f32.gmra.mxu1 %v7823_v40  ;;  %v4392_v1 = vld [vmem:[#allocation4 + $0x160] sm:$0xff]  ;;  %v4407_v52 = vld [vmem:[#allocation4 + $0x1d8] sm:$0xff] }
 0x331   : > { %3602 = vmatmul.f32.gmra.mxu2 %v7827_v50  ;;  %3667 = vmatmul.f32.gmra.mxu3 %v7829_v9  ;;  %v4375_v10 = vld [vmem:[#allocation4 + $0xd8] sm:$0xff] }
 0x332   : > { %v2666_v27 = vmax.f32 %v2649_v22, 0.0  ;;  %4645 = vmatpush.msrb.mxu1 %v4392_v1  ;;  %4711 = vmatpush.msrb.mxu2 %v4407_v52 }
 0x333   : > { %4581 = vmatpush.msrb.mxu0 %v4375_v10 }
 0x334   : > { %2683 = vst [vmem:[#allocation2 + $0x189] sm:$0xff] %v2666_v27  ;;  %v3343_v58 = vpop.f32.mrf.mxu2  ;;  %v3408_v37 = vpop.f32.mrf.mxu3 }
 0x335   : > { %v3344_v2 = vadd.f32 %v7656_v42, %v3343_v58  ;;  %v3428_v61 = vpop.f32.mrf.mxu0  ;;  %v3493_v5 = vpop.f32.mrf.mxu1 }
 0x336   : > { %v3429_v16 = vadd.f32 %v3428_v61, %v7660_v59  ;;  %v4422_v61 = vld [vmem:[#allocation4 + $0x250] sm:$0xff] }
 0x337   : > { %v7835_v8 = vadd.f32 %v3408_v37, %v3344_v2  ;;  %v4406_v37 = vld [vmem:[#allocation4 + $0x1d0] sm:$0xff]  ;;  %4777 = vmatpush.msrb.mxu3 %v4422_v61  ;;  %v4404_v61 = vld [vmem:[#allocation4 + $0x1c0] sm:$0xff] }
 0x338   : > { %v3494_v33 = vadd.f32 %v3493_v5, %v3429_v16  ;;  %3687 = vmatmul.f32.vlgmr.msra.gmra.mxu0 %v2877_v3  ;;  %3752 = vmatmul.f32.vlgmr.msra.gmra.mxu1 %v7668_v11  ;;  %v2878_v11 = vld [vmem:[#allocation2 + $0x38] sm:$0xff]  ;;  %v4374_v2 = vld [vmem:[#allocation4 + $0xd0] sm:$0xff] }
 0x339   : > { %3817 = vmatmul.f32.vlgmr.msra.gmra.mxu2 %v7670_v54  ;;  %4528 = vmatmul.f32.vlgmr.msra.gmra.mxu3 %v7809_v36  ;;  %v4391_v54 = vld [vmem:[#allocation4 + $0x158] sm:$0xff] }
 0x33a   : > { %4646 = vmatpush.msrb.mxu1 %v4391_v54  ;;  %4712 = vmatpush.msrb.mxu2 %v4406_v37 }
 0x33b   : > { %4582 = vmatpush.msrb.mxu0 %v4374_v2  ;;  %v7858_v2 = vld [vmem:[#allocation2 + $0xe0] sm:$0xff] }
 0x33c   : > { %v3558_v42 = vpop.f32.mrf.mxu2  ;;  %v3623_v59 = vpop.f32.mrf.mxu3 }
 0x33d   : > { %v3559_v22 = vadd.f32 %v3558_v42, %v3494_v33  ;;  %v3431_v47 = vpop.f32.mrf.mxu0  ;;  %v3496_v35 = vpop.f32.mrf.mxu1  ;;  %v4405_v42 = vld [vmem:[#allocation4 + $0x1c8] sm:$0xff] }
 0x33e   : > { %v3432_v18 = vadd.f32 %v3431_v47, %v7665_v23  ;;  %4713 = vmatpush.msrb.mxu2 %v4405_v42  ;;  %v7866_v42 = vld [vmem:[#allocation2 + $0xf0] sm:$0xff] }
 0x33f   : > { %v7841_v27 = vadd.f32 %v3623_v59, %v3559_v22  ;;  %v4373_v59 = vld [vmem:[#allocation4 + $0xc8] sm:$0xff] }
 0x340   : > { %v3497_v58 = vadd.f32 %v3496_v35, %v3432_v18  ;;  %3690 = vmatmul.f32.gmra.mxu0 %v2878_v11  ;;  %3755 = vmatmul.f32.gmra.mxu1 %v7679_v24  ;;  %v2879_v24 = vld [vmem:[#allocation2 + $0x48] sm:$0xff]  ;;  %v4421_v22 = vld [vmem:[#allocation4 + $0x248] sm:$0xff] }
 0x341   : > { %3820 = vmatmul.f32.gmra.mxu2 %v7681_v25  ;;  %4531 = vmatmul.f32.gmra.mxu3 %v7823_v40  ;;  %v4390_v25 = vld [vmem:[#allocation4 + $0x150] sm:$0xff] }
 0x342   : > { %4647 = vmatpush.msrb.mxu1 %v4390_v25  ;;  %4583 = vmatpush.msrb.mxu0 %v4373_v59  ;;  %v2881_v25 = vld [vmem:[#allocation2 + $0x60] sm:$0xff]  ;;  %v4403_v59 = vld [vmem:[#allocation4 + $0x1b8] sm:$0xff] }
 0x343   : > { %4778 = vmatpush.msrb.mxu3 %v4421_v22  ;;  %4714 = vmatpush.msrb.mxu2 %v4404_v61  ;;  %v4371_v22 = vld [vmem:[#allocation4 + $0xb8] sm:$0xff]  ;;  %v4402_v61 = vld [vmem:[#allocation4 + $0x1b0] sm:$0xff] }
 0x344   : > { %v3561_v23 = vpop.f32.mrf.mxu2  ;;  %v3626_v5 = vpop.f32.mrf.mxu3 }
 0x345   : > { %v3562_v16 = vadd.f32 %v3561_v23, %v3497_v58  ;;  %v3434_v3 = vpop.f32.mrf.mxu0  ;;  %v3499_v1 = vpop.f32.mrf.mxu1  ;;  %v2880_v58 = vld [vmem:[#allocation2 + $0x50] sm:$0xff]  ;;  %4715 = vmatpush.msrb.mxu2 %v4403_v59  ;;  %v4369_v59 = vld [vmem:[#allocation4 + $0xa8] sm:$0xff] }
 0x346   : > { %v3435_v33 = vadd.f32 %v3434_v3, %v7676_v19  ;;  %v4372_v23 = vld [vmem:[#allocation4 + $0xc0] sm:$0xff] }
 0x347   : > { %v7847_v52 = vadd.f32 %v3626_v5, %v3562_v16  ;;  %v4420_v5 = vld [vmem:[#allocation4 + $0x240] sm:$0xff]  ;;  %4584 = vmatpush.msrb.mxu0 %v4372_v23  ;;  %v4370_v23 = vld [vmem:[#allocation4 + $0xb0] sm:$0xff]  ;;  %4716 = vmatpush.msrb.mxu2 %v4402_v61 }
 0x348   : > { %v3500_v10 = vadd.f32 %v3499_v1, %v3435_v33  ;;  %3693 = vmatmul.f32.gmra.mxu0 %v2879_v24  ;;  %3758 = vmatmul.f32.gmra.mxu1 %v7691_v53  ;;  %v4416_v61 = vld [vmem:[#allocation4 + $0x220] sm:$0xff] }
 0x349   : > { %3823 = vmatmul.f32.gmra.mxu2 %v7693_v28  ;;  %4534 = vmatmul.f32.gmra.mxu3 %v7850_v29  ;;  %v4389_v28 = vld [vmem:[#allocation4 + $0x148] sm:$0xff] }
 0x34a   : > { %4648 = vmatpush.msrb.mxu1 %v4389_v28  ;;  %4779 = vmatpush.msrb.mxu3 %v4420_v5  ;;  %v4418_v5 = vld [vmem:[#allocation4 + $0x230] sm:$0xff] }
 0x34b   : > { %4585 = vmatpush.msrb.mxu0 %v4371_v22  ;;  %v4417_v22 = vld [vmem:[#allocation4 + $0x228] sm:$0xff] }
 0x34c   : > { %v3564_v19 = vpop.f32.mrf.mxu2  ;;  %v3629_v47 = vpop.f32.mrf.mxu3 }
 0x34d   : > { %v3565_v35 = vadd.f32 %v3564_v19, %v3500_v10  ;;  %v3437_v18 = vpop.f32.mrf.mxu0  ;;  %v3502_v11 = vpop.f32.mrf.mxu1  ;;  %v4419_v19 = vld [vmem:[#allocation4 + $0x238] sm:$0xff]  ;;  %4586 = vmatpush.msrb.mxu0 %v4370_v23 }
 0x34e   : > { %v3438_v53 = vadd.f32 %v3437_v18, %v7687_v49  ;;  %4780 = vmatpush.msrb.mxu3 %v4419_v19 }
 0x34f   : > { %v7855_v54 = vadd.f32 %v3629_v47, %v3565_v35  ;;  %4587 = vmatpush.msrb.mxu0 %v4369_v59 }
 0x350   : > { %v3503_v37 = vadd.f32 %v3502_v11, %v3438_v53  ;;  %3696 = vmatmul.f32.gmra.mxu0 %v2880_v58  ;;  %3761 = vmatmul.f32.gmra.mxu1 %v7703_v0  ;;  %v2882_v58 = vld [vmem:[#allocation2 + $0x68] sm:$0xff] }
 0x351   : > { %3826 = vmatmul.f32.gmra.mxu2 %v7705_v57  ;;  %4537 = vmatmul.f32.gmra.mxu3 %v7858_v2  ;;  %v4388_v57 = vld [vmem:[#allocation4 + $0x140] sm:$0xff] }
 0x352   : > { %4649 = vmatpush.msrb.mxu1 %v4388_v57  ;;  %4781 = vmatpush.msrb.mxu3 %v4418_v5  ;;  %v7882_v57 = vld [vmem:[#allocation2 + $0x108] sm:$0xff] }
 0x354   : > { %v3567_v49 = vpop.f32.mrf.mxu2  ;;  %v3632_v16 = vpop.f32.mrf.mxu3  ;;  %4782 = vmatpush.msrb.mxu3 %v4417_v22 }
 0x355   : > { %v3568_v3 = vadd.f32 %v3567_v49, %v3503_v37  ;;  %v3440_v1 = vpop.f32.mrf.mxu0  ;;  %v3505_v33 = vpop.f32.mrf.mxu1  ;;  %v7874_v37 = vld [vmem:[#allocation2 + $0xf8] sm:$0xff] }
 0x356   : > { %v3441_v0 = vadd.f32 %v3440_v1, %v7699_v63  ;;  %4783 = vmatpush.msrb.mxu3 %v4416_v61 }
 0x357   : > { %v7863_v24 = vadd.f32 %v3632_v16, %v3568_v3 }
 0x358   : > { %v3506_v10 = vadd.f32 %v3505_v33, %v3441_v0  ;;  %3699 = vmatmul.f32.gmra.mxu0 %v2881_v25  ;;  %3764 = vmatmul.f32.gmra.mxu1 %v7715_v56  ;;  %v2883_v0 = vld [vmem:[#allocation2 + $0x78] sm:$0xff] }
 0x359   : > { %3829 = vmatmul.f32.gmra.mxu2 %v7717_v21  ;;  %4540 = vmatmul.f32.gmra.mxu3 %v7866_v42  ;;  %v4387_v21 = vld [vmem:[#allocation4 + $0x138] sm:$0xff] }
 0x35a   : > { %4650 = vmatpush.msrb.mxu1 %v4387_v21  ;;  %v4400_v21 = vld [vmem:[#allocation4 + $0x1a0] sm:$0xff] }
 0x35c   : > { %v3570_v63 = vpop.f32.mrf.mxu2  ;;  %v3635_v47 = vpop.f32.mrf.mxu3 }
 0x35d   : > { %v3571_v35 = vadd.f32 %v3570_v63, %v3506_v10  ;;  %v3443_v18 = vpop.f32.mrf.mxu0  ;;  %v3508_v11 = vpop.f32.mrf.mxu1  ;;  %v4401_v10 = vld [vmem:[#allocation4 + $0x1a8] sm:$0xff] }
 0x35e   : > { %v3444_v56 = vadd.f32 %v3443_v18, %v7711_v48  ;;  %4717 = vmatpush.msrb.mxu2 %v4401_v10 }
 0x35f   : > { %v7871_v53 = vadd.f32 %v3635_v47, %v3571_v35 }
 0x360   : > { %v3509_v28 = vadd.f32 %v3508_v11, %v3444_v56  ;;  %3702 = vmatmul.f32.gmra.mxu0 %v2882_v58  ;;  %3767 = vmatmul.f32.gmra.mxu1 %v7727_v43  ;;  %v2884_v11 = vld [vmem:[#allocation2 + $0x80] sm:$0xff]  ;;  %v7890_v58 = vld [vmem:[#allocation2 + $0x110] sm:$0xff] }
 0x361   : > { %3832 = vmatmul.f32.gmra.mxu2 %v7729_v26  ;;  %4543 = vmatmul.f32.gmra.mxu3 %v7874_v37  ;;  %v4386_v26 = vld [vmem:[#allocation4 + $0x130] sm:$0xff] }
 0x362   : > { %4651 = vmatpush.msrb.mxu1 %v4386_v26  ;;  %4718 = vmatpush.msrb.mxu2 %v4400_v21  ;;  %v4367_v26 = vld [vmem:[#allocation4 + $0x98] sm:$0xff] }
 0x364   : > { %v3573_v48 = vpop.f32.mrf.mxu2  ;;  %v3638_v49 = vpop.f32.mrf.mxu3 }
 0x365   : > { %v3574_v16 = vadd.f32 %v3573_v48, %v3509_v28  ;;  %v3446_v3 = vpop.f32.mrf.mxu0  ;;  %v3511_v1 = vpop.f32.mrf.mxu1  ;;  %v4368_v28 = vld [vmem:[#allocation4 + $0xa0] sm:$0xff] }
 0x366   : > { %v3447_v43 = vadd.f32 %v3446_v3, %v7723_v62  ;;  %4588 = vmatpush.msrb.mxu0 %v4368_v28  ;;  %v2885_v3 = vld [vmem:[#allocation2 + $0x90] sm:$0xff] }
 0x367   : > { %v7879_v33 = vadd.f32 %v3638_v49, %v3574_v16 }
 0x368   : > { %v3512_v25 = vadd.f32 %v3511_v1, %v3447_v43  ;;  %3705 = vmatmul.f32.gmra.mxu0 %v2883_v0  ;;  %3770 = vmatmul.f32.gmra.mxu1 %v7739_v34  ;;  %v7898_v43 = vld [vmem:[#allocation2 + $0x120] sm:$0xff]  ;;  %v4399_v0 = vld [vmem:[#allocation4 + $0x198] sm:$0xff] }
 0x369   : > { %3835 = vmatmul.f32.gmra.mxu2 %v7741_v13  ;;  %4546 = vmatmul.f32.gmra.mxu3 %v7882_v57  ;;  %v4385_v13 = vld [vmem:[#allocation4 + $0x128] sm:$0xff] }
 0x36a   : > { %4652 = vmatpush.msrb.mxu1 %v4385_v13  ;;  %4719 = vmatpush.msrb.mxu2 %v4399_v0  ;;  %v4414_v13 = vld [vmem:[#allocation4 + $0x210] sm:$0xff] }
 0x36b   : > { %4589 = vmatpush.msrb.mxu0 %v4367_v26 }
 0x36c   : > { %v3576_v62 = vpop.f32.mrf.mxu2  ;;  %v3641_v19 = vpop.f32.mrf.mxu3 }
 0x36d   : > { %v3577_v63 = vadd.f32 %v3576_v62, %v3512_v25  ;;  %v3449_v47 = vpop.f32.mrf.mxu0  ;;  %v3514_v35 = vpop.f32.mrf.mxu1  ;;  %v4415_v25 = vld [vmem:[#allocation4 + $0x218] sm:$0xff] }
 0x36e   : > { %v3450_v34 = vadd.f32 %v3449_v47, %v7735_v46  ;;  %4784 = vmatpush.msrb.mxu3 %v4415_v25 }
 0x36f   : > { %v7887_v18 = vadd.f32 %v3641_v19, %v3577_v63  ;;  %v2886_v63 = vld [vmem:[#allocation2 + $0x98] sm:$0xff] }
 0x370   : > { %v3515_v56 = vadd.f32 %v3514_v35, %v3450_v34  ;;  %3708 = vmatmul.f32.gmra.mxu0 %v2884_v11  ;;  %3773 = vmatmul.f32.gmra.mxu1 %v7751_v12  ;;  %v7906_v35 = vld [vmem:[#allocation2 + $0x128] sm:$0xff]  ;;  %v4398_v34 = vld [vmem:[#allocation4 + $0x190] sm:$0xff] }
 0x371   : > { %3838 = vmatmul.f32.gmra.mxu2 %v7753_v39  ;;  %4549 = vmatmul.f32.gmra.mxu3 %v7890_v58  ;;  %v4384_v39 = vld [vmem:[#allocation4 + $0x120] sm:$0xff]  ;;  %v4366_v11 = vld [vmem:[#allocation4 + $0x90] sm:$0xff] }
 0x372   : > { %4653 = vmatpush.msrb.mxu1 %v4384_v39  ;;  %4720 = vmatpush.msrb.mxu2 %v4398_v34 }
 0x373   : > { %4590 = vmatpush.msrb.mxu0 %v4366_v11  ;;  %4785 = vmatpush.msrb.mxu3 %v4414_v13  ;;  %v4380_v13 = vld [vmem:[#allocation4 + $0x100] sm:$0xff] }
 0x374   : > { %v3579_v46 = vpop.f32.mrf.mxu2  ;;  %v3644_v23 = vpop.f32.mrf.mxu3 }
 0x375   : > { %v3580_v5 = vadd.f32 %v3579_v46, %v3515_v56  ;;  %v3452_v48 = vpop.f32.mrf.mxu0  ;;  %v3517_v49 = vpop.f32.mrf.mxu1 }
 0x376   : > { %v3453_v12 = vadd.f32 %v3452_v48, %v7747_v15  ;;  %v7914_v48 = vld [vmem:[#allocation2 + $0x138] sm:$0xff] }
 0x377   : > { %v7895_v16 = vadd.f32 %v3644_v23, %v3580_v5  ;;  %v2887_v23 = vld [vmem:[#allocation2 + $0xa8] sm:$0xff] }
 0x378   : > { %v3518_v1 = vadd.f32 %v3517_v49, %v3453_v12  ;;  %3711 = vmatmul.f32.gmra.mxu0 %v2885_v3  ;;  %3776 = vmatmul.f32.gmra.mxu1 %v7763_v7  ;;  %v4397_v49 = vld [vmem:[#allocation4 + $0x188] sm:$0xff] }
 0x379   : > { %3841 = vmatmul.f32.gmra.mxu2 %v7765_v31  ;;  %4552 = vmatmul.f32.gmra.mxu3 %v7898_v43  ;;  %v4383_v31 = vld [vmem:[#allocation4 + $0x118] sm:$0xff]  ;;  %v4365_v12 = vld [vmem:[#allocation4 + $0x88] sm:$0xff] }
 0x37a   : > { %4654 = vmatpush.msrb.mxu1 %v4383_v31  ;;  %v4413_v3 = vld [vmem:[#allocation4 + $0x208] sm:$0xff]  ;;  %4721 = vmatpush.msrb.mxu2 %v4397_v49 }
 0x37b   : > { %4591 = vmatpush.msrb.mxu0 %v4365_v12  ;;  %4786 = vmatpush.msrb.mxu3 %v4413_v3  ;;  %v7940_v12 = vld [vmem:[#allocation2 + $0x158] sm:$0xff]  ;;  %v4459_v3 = vld [vmem:[#allocation4 + $0x378] sm:$0xff] }
 0x37c   : > { %v3582_v15 = vpop.f32.mrf.mxu2  ;;  %v3647_v10 = vpop.f32.mrf.mxu3 }
 0x37d   : > { %v3583_v59 = vadd.f32 %v3582_v15, %v3518_v1  ;;  %v3455_v22 = vpop.f32.mrf.mxu0  ;;  %v3520_v62 = vpop.f32.mrf.mxu1  ;;  %v2888_v15 = vld [vmem:[#allocation2 + $0xb0] sm:$0xff] }
 0x37e   : > { %v3456_v7 = vadd.f32 %v3455_v22, %v7759_v45  ;;  %v4396_v22 = vld [vmem:[#allocation4 + $0x180] sm:$0xff] }
 0x37f   : > { %v7903_v19 = vadd.f32 %v3647_v10, %v3583_v59  ;;  %v7922_v59 = vld [vmem:[#allocation2 + $0x140] sm:$0xff]  ;;  %4722 = vmatpush.msrb.mxu2 %v4396_v22 }
 0x380   : > { %v3521_v47 = vadd.f32 %v3520_v62, %v3456_v7  ;;  %3714 = vmatmul.f32.gmra.mxu0 %v2886_v63  ;;  %3779 = vmatmul.f32.gmra.mxu1 %v7775_v17  ;;  %v4364_v62 = vld [vmem:[#allocation4 + $0x80] sm:$0xff] }
 0x381   : > { %3844 = vmatmul.f32.gmra.mxu2 %v7777_v4  ;;  %4555 = vmatmul.f32.gmra.mxu3 %v7906_v35  ;;  %v4382_v4 = vld [vmem:[#allocation4 + $0x110] sm:$0xff]  ;;  %v4412_v7 = vld [vmem:[#allocation4 + $0x200] sm:$0xff] }
 0x382   : > { %4655 = vmatpush.msrb.mxu1 %v4382_v4  ;;  %4592 = vmatpush.msrb.mxu0 %v4364_v62  ;;  %v7951_v62 = vld [vmem:[#allocation2 + $0xda] sm:$0xff] }
 0x383   : > { %4787 = vmatpush.msrb.mxu3 %v4412_v7  ;;  %v7953_v7 = vld [vmem:[#allocation2 + $0x168] sm:$0xff] }
 0x384   : > { %v3585_v45 = vpop.f32.mrf.mxu2  ;;  %v3650_v56 = vpop.f32.mrf.mxu3 }
 0x385   : > { %v3586_v21 = vadd.f32 %v3585_v45, %v3521_v47  ;;  %v3458_v28 = vpop.f32.mrf.mxu0  ;;  %v3523_v61 = vpop.f32.mrf.mxu1  ;;  %v7931_v45 = vld [vmem:[#allocation2 + $0x150] sm:$0xff] }
 0x386   : > { %v3459_v17 = vadd.f32 %v3458_v28, %v7771_v51  ;;  %v4491_v28 = vld [vmem:[#allocation4 + $0x478] sm:$0xff] }
 0x387   : > { %v7911_v46 = vadd.f32 %v3650_v56, %v3586_v21  ;;  %v4475_v56 = vld [vmem:[#allocation4 + $0x3f8] sm:$0xff]  ;;  %5032 = vmatpush.msra.mxu3 %v4491_v28 }
 0x388   : > { %v3524_v5 = vadd.f32 %v3523_v61, %v3459_v17  ;;  %3717 = vmatmul.f32.gmra.mxu0 %v2887_v23  ;;  %3782 = vmatmul.f32.gmra.mxu1 %v7787_v14  ;;  %v4443_v21 = vld [vmem:[#allocation4 + $0x2f8] sm:$0xff] }
 0x389   : > { %3847 = vmatmul.f32.gmra.mxu2 %v7789_v30  ;;  %4558 = vmatmul.f32.gmra.mxu3 %v7914_v48  ;;  %v4381_v30 = vld [vmem:[#allocation4 + $0x108] sm:$0xff]  ;;  %v7960_v28 = vld [vmem:[#allocation2 + $0xe1] sm:$0xff] }
 0x38a   : > { %4656 = vmatpush.msrb.mxu1 %v4381_v30  ;;  %4967 = vmatpush.msra.mxu2 %v4475_v56 }
 0x38b   : > { %4837 = vmatpush.msra.mxu0 %v4443_v21 }
 0x38c   : > { %v3588_v51 = vpop.f32.mrf.mxu2  ;;  %v3653_v39 = vpop.f32.mrf.mxu3  ;;  %4657 = vmatpush.msrb.mxu1 %v4380_v13 }
 0x38d   : > { %v3589_v1 = vadd.f32 %v3588_v51, %v3524_v5  ;;  %v3461_v0 = vpop.f32.mrf.mxu0  ;;  %v3526_v26 = vpop.f32.mrf.mxu1  ;;  %v4474_v51 = vld [vmem:[#allocation4 + $0x3f0] sm:$0xff] }
 0x38e   : > { %v3462_v14 = vadd.f32 %v3461_v0, %v7783_v38  ;;  %4902 = vmatpush.msra.mxu1 %v4459_v3  ;;  %4968 = vmatpush.msra.mxu2 %v4474_v51  ;;  %v4488_v3 = vld [vmem:[#allocation4 + $0x460] sm:$0xff] }
 0x38f   : > { %v7919_v25 = vadd.f32 %v3653_v39, %v3589_v1  ;;  %v4442_v39 = vld [vmem:[#allocation4 + $0x2f0] sm:$0xff] }
 0x390   : > { %v3527_v10 = vadd.f32 %v3526_v26, %v3462_v14  ;;  %3720 = vmatmul.f32.gmra.mxu0 %v2888_v15  ;;  %3785 = vmatmul.f32.gmra.mxu1 %v7799_v55 }
 0x391   : > { %3850 = vmatmul.f32.gmra.mxu2 %v7801_v32  ;;  %4561 = vmatmul.f32.gmra.mxu3 %v7922_v59 }
 0x392   : > { %4838 = vmatpush.msra.mxu0 %v4442_v39 }
 0x394   : > { %v3591_v38 = vpop.f32.mrf.mxu2  ;;  %v3656_v63 = vpop.f32.mrf.mxu3 }
 0x395   : > { %v3592_v31 = vadd.f32 %v3591_v38, %v3527_v10  ;;  %v3464_v47 = vpop.f32.mrf.mxu0  ;;  %v3529_v34 = vpop.f32.mrf.mxu1  ;;  %v7947_v10 = vld [vmem:[#allocation2 + $0xd9] sm:$0xff] }
 0x396   : > { %v3465_v55 = vadd.f32 %v3464_v47, %v7795_v20  ;;  %v4458_v38 = vld [vmem:[#allocation4 + $0x370] sm:$0xff] }
 0x397   : > { %v7927_v11 = vadd.f32 %v3656_v63, %v3592_v31  ;;  %v4473_v63 = vld [vmem:[#allocation4 + $0x3e8] sm:$0xff]  ;;  %4903 = vmatpush.msra.mxu1 %v4458_v38 }
 0x398   : > { %v3530_v32 = vadd.f32 %v3529_v34, %v3465_v55  ;;  %3723 = vmatmul.f32.gmra.mxu0 %v7809_v36  ;;  %3788 = vmatmul.f32.gmra.mxu1 %v7813_v60  ;;  %v4489_v34 = vld [vmem:[#allocation4 + $0x468] sm:$0xff] }
 0x399   : > { %3853 = vmatmul.f32.gmra.mxu2 %v7815_v44  ;;  %4564 = vmatmul.f32.gmra.mxu3 %v7931_v45 }
 0x39a   : > { %4969 = vmatpush.msra.mxu2 %v4473_v63 }
 0x39c   : > { %v3594_v20 = vpop.f32.mrf.mxu2  ;;  %v3659_v61 = vpop.f32.mrf.mxu3 }
 0x39d   : > { %v3595_v17 = vadd.f32 %v3594_v20, %v3530_v32  ;;  %v3467_v23 = vpop.f32.mrf.mxu0  ;;  %v3532_v36 = vpop.f32.mrf.mxu1 }
 0x39e   : > { %v3468_v4 = vadd.f32 %v3467_v23, %v7807_v6  ;;  %v4490_v6 = vld [vmem:[#allocation4 + $0x470] sm:$0xff]  ;;  %v4457_v23 = vld [vmem:[#allocation4 + $0x368] sm:$0xff] }
 0x39f   : > { %v7936_v5 = vadd.f32 %v3659_v61, %v3595_v17  ;;  %5033 = vmatpush.msra.mxu3 %v4490_v6  ;;  %v7964_v61 = vld [vmem:[#allocation2 + $0xe2] sm:$0xff]  ;;  %v7966_v17 = vld [vmem:[#allocation2 + $0x170] sm:$0xff]  ;;  %4904 = vmatpush.msra.mxu1 %v4457_v23 }
 0x3a0   : > { %v3533_v49 = vadd.f32 %v3532_v36, %v3468_v4  ;;  %3726 = vmatmul.f32.gmra.mxu0 %v7823_v40  ;;  %3791 = vmatmul.f32.gmra.mxu1 %v7827_v50  ;;  %v4472_v36 = vld [vmem:[#allocation4 + $0x3e0] sm:$0xff] }
 0x3a1   : > { %3856 = vmatmul.f32.gmra.mxu2 %v7829_v9  ;;  %4567 = vmatmul.f32.gmra.mxu3 %v7940_v12 }
 0x3a2   : > { %5034 = vmatpush.msra.mxu3 %v4489_v34  ;;  %4970 = vmatpush.msra.mxu2 %v4472_v36 }
 0x3a4   : > { %v3597_v1 = vpop.f32.mrf.mxu2  ;;  %v3662_v0 = vpop.f32.mrf.mxu3  ;;  %5035 = vmatpush.msra.mxu3 %v4488_v3 }
 0x3a5   : > { %v3598_v26 = vadd.f32 %v3597_v1, %v3533_v49  ;;  %v3470_v14 = vpop.f32.mrf.mxu0  ;;  %v3535_v15 = vpop.f32.mrf.mxu1 }
 0x3a6   : > { %v3471_v40 = vadd.f32 %v3470_v14, %v7821_v41  ;;  %v4441_v41 = vld [vmem:[#allocation4 + $0x2e8] sm:$0xff]  ;;  %v4456_v14 = vld [vmem:[#allocation4 + $0x360] sm:$0xff] }
 0x3a7   : > { %v7945_v30 = vadd.f32 %v3662_v0, %v3598_v26  ;;  %4839 = vmatpush.msra.mxu0 %v4441_v41  ;;  %4905 = vmatpush.msra.mxu1 %v4456_v14 }
 0x3a8   : > { %v3536_v22 = vadd.f32 %v3535_v15, %v3471_v40  ;;  %3729 = vmatmul.f32.gmra.mxu0 %v7850_v29  ;;  %3794 = vmatmul.f32.gmra.mxu1 %v7947_v10  ;;  %v4471_v15 = vld [vmem:[#allocation4 + $0x3d8] sm:$0xff] }
 0x3a9   : > { %3859 = vmatmul.f32.gmra.mxu2 %v7951_v62  ;;  %4570 = vmatmul.f32.gmra.mxu3 %v7953_v7  ;;  %v4439_v40 = vld [vmem:[#allocation4 + $0x2d8] sm:$0xff] }
 0x3aa   : > { %4971 = vmatpush.msra.mxu2 %v4471_v15 }
 0x3ac   : > { %v3600_v31 = vpop.f32.mrf.mxu2  ;;  %v3665_v47 = vpop.f32.mrf.mxu3 }
 0x3ad   : > { %v3601_v55 = vadd.f32 %v3600_v31, %v3536_v22  ;;  %v3473_v13 = vpop.f32.mrf.mxu0  ;;  %v3538_v32 = vpop.f32.mrf.mxu1  ;;  %v5484_v22 = vld [vmem:[%s6041_s6 + $0x19] sm:$0xff] }
 0x3ae   : > { %v3474_v56 = vadd.f32 %v3473_v13, %v7835_v8  ;;  %v4440_v8 = vld [vmem:[#allocation4 + $0x2e0] sm:$0xff]  ;;  %v4470_v13 = vld [vmem:[#allocation4 + $0x3d0] sm:$0xff] }
 0x3af   : > { %v7958_v21 = vadd.f32 %v3665_v47, %v3601_v55  ;;  %4840 = vmatpush.msra.mxu0 %v4440_v8  ;;  %v4455_v55 = vld [vmem:[#allocation4 + $0x358] sm:$0xff]  ;;  %4972 = vmatpush.msra.mxu2 %v4470_v13 }
 0x3b0   : > { %v3539_v20 = vadd.f32 %v3538_v32, %v3474_v56  ;;  %3732 = vmatmul.f32.gmra.mxu0 %v7858_v2  ;;  %3797 = vmatmul.f32.gmra.mxu1 %v7960_v28  ;;  %v4438_v32 = vld [vmem:[#allocation4 + $0x2d0] sm:$0xff] }
 0x3b1   : > { %3862 = vmatmul.f32.gmra.mxu2 %v7964_v61  ;;  %4573 = vmatmul.f32.gmra.mxu3 %v7966_v17  ;;  %v5485_v56 = vld [vmem:[%s6041_s6 + $0x21] sm:$0xff] }
 0x3b2   : > { %4841 = vmatpush.msra.mxu0 %v4439_v40  ;;  %4906 = vmatpush.msra.mxu1 %v4455_v55 }
 0x3b4   : > { %v3603_v4 = vpop.f32.mrf.mxu2  ;;  %v3668_v49 = vpop.f32.mrf.mxu3  ;;  %4842 = vmatpush.msra.mxu0 %v4438_v32 }
 0x3b5   : > { %v3604_v51 = vadd.f32 %v3603_v4, %v3539_v20  ;;  %v3688_v39 = vpop.f32.mrf.mxu0  ;;  %v3753_v1 = vpop.f32.mrf.mxu1  ;;  %v7997_v4 = vld [vmem:[#allocation2 + $0xf1] sm:$0xff] }
 0x3b6   : > { %v3689_v6 = vadd.f32 %v3688_v39, %v7841_v27  ;;  %v4487_v27 = vld [vmem:[#allocation4 + $0x458] sm:$0xff]  ;;  %v4469_v39 = vld [vmem:[#allocation4 + $0x3c8] sm:$0xff] }
 0x3b7   : > { %v7970_v0 = vadd.f32 %v3668_v49, %v3604_v51  ;;  %5036 = vmatpush.msra.mxu3 %v4487_v27  ;;  %v4454_v51 = vld [vmem:[#allocation4 + $0x350] sm:$0xff]  ;;  %4973 = vmatpush.msra.mxu2 %v4469_v39 }
 0x3b8   : > { %4593 = vmatmul.f32.vlgmr.msrb.gmra.mxu0 %v7813_v60  ;;  %4658 = vmatmul.f32.vlgmr.msrb.gmra.mxu1 %v7815_v44  ;;  %v3754_v26 = vadd.f32 %v3753_v1, %v3689_v6  ;;  %v4437_v1 = vld [vmem:[#allocation4 + $0x2c8] sm:$0xff] }
 0x3b9   : > { %4723 = vmatmul.f32.vlgmr.msrb.gmra.mxu2 %v7850_v29  ;;  %4788 = vmatmul.f32.vlgmr.msrb.gmra.mxu3 %v7947_v10  ;;  %v5486_v6 = vld [vmem:[%s6041_s6 + $0x31] sm:$0xff] }
 0x3ba   : > { %4907 = vmatpush.msra.mxu1 %v4454_v51  ;;  %4843 = vmatpush.msra.mxu0 %v4437_v1 }
 0x3bc   : > { %v3818_v38 = vpop.f32.mrf.mxu2  ;;  %v7979_v63 = vpop.f32.mrf.mxu3 }
 0x3bd   : > { %v3819_v60 = vadd.f32 %v3818_v38, %v3754_v26  ;;  %v3691_v44 = vpop.f32.mrf.mxu0  ;;  %v3756_v41 = vpop.f32.mrf.mxu1  ;;  %v8008_v38 = vld [vmem:[#allocation2 + $0xf9] sm:$0xff] }
 0x3be   : > { %v3692_v31 = vadd.f32 %v3691_v44, %v7847_v52  ;;  %v4453_v44 = vld [vmem:[#allocation4 + $0x348] sm:$0xff] }
 0x3bf   : > { %v3866_v29 = vadd.f32 %v5484_v22, %v3819_v60  ;;  %4908 = vmatpush.msra.mxu1 %v4453_v44  ;;  %v4482_v44 = vld [vmem:[#allocation4 + $0x430] sm:$0xff] }
 0x3c0   : > { %4596 = vmatmul.f32.gmra.mxu0 %v7827_v50  ;;  %4661 = vmatmul.f32.gmra.mxu1 %v7829_v9  ;;  %v3757_v34 = vadd.f32 %v3756_v41, %v3692_v31  ;;  %v4486_v50 = vld [vmem:[#allocation4 + $0x450] sm:$0xff]  ;;  %v4468_v41 = vld [vmem:[#allocation4 + $0x3c0] sm:$0xff] }
 0x3c1   : > { %v3882_v47 = vmax.f32 %v3866_v29, 0.0  ;;  %4726 = vmatmul.f32.gmra.mxu2 %v7858_v2  ;;  %4791 = vmatmul.f32.gmra.mxu3 %v7960_v28  ;;  %v4436_v29 = vld [vmem:[#allocation4 + $0x2c0] sm:$0xff]  ;;  %v5487_v31 = vld [vmem:[%s6041_s6 + $0x39] sm:$0xff] }
 0x3c2   : > { %5037 = vmatpush.msra.mxu3 %v4486_v50  ;;  %4974 = vmatpush.msra.mxu2 %v4468_v41 }
 0x3c3   : > { %3898 = vst [vmem:[%s7988_s16] sm:$0xff] %v3882_v47  ;;  %4844 = vmatpush.msra.mxu0 %v4436_v29 }
 0x3c4   : > { %v3821_v20 = vpop.f32.mrf.mxu2  ;;  %v7992_v52 = vpop.f32.mrf.mxu3 }
 0x3c5   : > { %v3822_v9 = vadd.f32 %v3821_v20, %v3757_v34  ;;  %v3694_v2 = vpop.f32.mrf.mxu0  ;;  %v3759_v23 = vpop.f32.mrf.mxu1  ;;  %v8021_v20 = vld [vmem:[#allocation2 + $0x109] sm:$0xff] }
 0x3c6   : > { %v3695_v8 = vadd.f32 %v3694_v2, %v7855_v54  ;;  %v4485_v54 = vld [vmem:[#allocation4 + $0x448] sm:$0xff]  ;;  %v4452_v2 = vld [vmem:[#allocation4 + $0x340] sm:$0xff] }
 0x3c7   : > { %v3867_v36 = vadd.f32 %v5485_v56, %v3822_v9  ;;  %5038 = vmatpush.msra.mxu3 %v4485_v54  ;;  %v8017_v56 = vld [vmem:[#allocation2 + $0xf2] sm:$0xff]  ;;  %4909 = vmatpush.msra.mxu1 %v4452_v2 }
 0x3c8   : > { %4599 = vmatmul.f32.gmra.mxu0 %v7947_v10  ;;  %4664 = vmatmul.f32.gmra.mxu1 %v7951_v62  ;;  %v3760_v3 = vadd.f32 %v3759_v23, %v3695_v8  ;;  %v4467_v23 = vld [vmem:[#allocation4 + $0x3b8] sm:$0xff]  ;;  %v8034_v54 = vld [vmem:[#allocation2 + $0x111] sm:$0xff] }
 0x3c9   : > { %v3883_v49 = vmax.f32 %v3867_v36, 0.0  ;;  %4729 = vmatmul.f32.gmra.mxu2 %v7866_v42  ;;  %4794 = vmatmul.f32.gmra.mxu3 %v7997_v4  ;;  %v4435_v36 = vld [vmem:[#allocation4 + $0x2b8] sm:$0xff] }
 0x3ca   : > { %v5488_v8 = vld [vmem:[%s6041_s6 + $0x49] sm:$0xff]  ;;  %4975 = vmatpush.msra.mxu2 %v4467_v23  ;;  %4845 = vmatpush.msra.mxu0 %v4435_v36  ;;  %v4481_v23 = vld [vmem:[#allocation4 + $0x428] sm:$0xff] }
 0x3cb   : > { %3899 = vst [vmem:[%s7988_s16 + $0x8] sm:$0xff] %v3883_v49 }
 0x3cc   : > { %v3824_v26 = vpop.f32.mrf.mxu2  ;;  %v8003_v14 = vpop.f32.mrf.mxu3 }
 0x3cd   : > { %v3825_v10 = vadd.f32 %v3824_v26, %v3760_v3  ;;  %v3697_v15 = vpop.f32.mrf.mxu0  ;;  %v3762_v40 = vpop.f32.mrf.mxu1  ;;  %v4483_v3 = vld [vmem:[#allocation4 + $0x438] sm:$0xff]  ;;  %v8030_v26 = vld [vmem:[#allocation2 + $0xfa] sm:$0xff] }
 0x3ce   : > { %v3698_v22 = vadd.f32 %v3697_v15, %v7863_v24  ;;  %v4484_v24 = vld [vmem:[#allocation4 + $0x440] sm:$0xff] }
 0x3cf   : > { %v3868_v42 = vadd.f32 %v5486_v6, %v3825_v10  ;;  %5039 = vmatpush.msra.mxu3 %v4484_v24  ;;  %v8043_v24 = vld [vmem:[#allocation2 + $0x10a] sm:$0xff] }
 0x3d0   : > { %4602 = vmatmul.f32.gmra.mxu0 %v7960_v28  ;;  %4667 = vmatmul.f32.gmra.mxu1 %v7964_v61  ;;  %v3763_v60 = vadd.f32 %v3762_v40, %v3698_v22  ;;  %v4451_v40 = vld [vmem:[#allocation4 + $0x338] sm:$0xff]  ;;  %v4434_v22 = vld [vmem:[#allocation4 + $0x2b0] sm:$0xff] }
 0x3d1   : > { %v3884_v27 = vmax.f32 %v3868_v42, 0.0  ;;  %4732 = vmatmul.f32.gmra.mxu2 %v7874_v37  ;;  %4797 = vmatmul.f32.gmra.mxu3 %v8008_v38  ;;  %v4466_v42 = vld [vmem:[#allocation4 + $0x3b0] sm:$0xff] }
 0x3d2   : > { %5040 = vmatpush.msra.mxu3 %v4483_v3  ;;  %4910 = vmatpush.msra.mxu1 %v4451_v40  ;;  %v5491_v40 = vld [vmem:[%s6041_s6 + $0x69] sm:$0xff] }
 0x3d3   : > { %3900 = vst [vmem:[%s7988_s16 + $0x10] sm:$0xff] %v3884_v27  ;;  %v5489_v27 = vld [vmem:[%s6041_s6 + $0x51] sm:$0xff]  ;;  %4976 = vmatpush.msra.mxu2 %v4466_v42  ;;  %4846 = vmatpush.msra.mxu0 %v4434_v22 }
 0x3d4   : > { %v3827_v47 = vpop.f32.mrf.mxu2  ;;  %v8014_v34 = vpop.f32.mrf.mxu3  ;;  %5041 = vmatpush.msra.mxu3 %v4482_v44  ;;  %v4480_v22 = vld [vmem:[#allocation4 + $0x420] sm:$0xff] }
 0x3d5   : > { %v3828_v28 = vadd.f32 %v3827_v47, %v3763_v60  ;;  %v3700_v55 = vpop.f32.mrf.mxu0  ;;  %v3765_v13 = vpop.f32.mrf.mxu1 }
 0x3d6   : > { %v3701_v32 = vadd.f32 %v3700_v55, %v7871_v53  ;;  %5042 = vmatpush.msra.mxu3 %v4481_v23 }
 0x3d7   : > { %v3869_v37 = vadd.f32 %v5487_v31, %v3828_v28  ;;  %v8047_v28 = vld [vmem:[#allocation2 + $0x121] sm:$0xff] }
 0x3d8   : > { %4605 = vmatmul.f32.gmra.mxu0 %v7997_v4  ;;  %4670 = vmatmul.f32.gmra.mxu1 %v8017_v56  ;;  %v3766_v9 = vadd.f32 %v3765_v13, %v3701_v32  ;;  %v4465_v32 = vld [vmem:[#allocation4 + $0x3a8] sm:$0xff] }
 0x3d9   : > { %v3885_v50 = vmax.f32 %v3869_v37, 0.0  ;;  %4735 = vmatmul.f32.gmra.mxu2 %v7882_v57  ;;  %4800 = vmatmul.f32.gmra.mxu3 %v8021_v20  ;;  %v4450_v37 = vld [vmem:[#allocation4 + $0x330] sm:$0xff] }
 0x3da   : > { %4911 = vmatpush.msra.mxu1 %v4450_v37  ;;  %4977 = vmatpush.msra.mxu2 %v4465_v32  ;;  %v4431_v37 = vld [vmem:[#allocation4 + $0x298] sm:$0xff]  ;;  %v5492_v32 = vld [vmem:[%s6041_s6 + $0x79] sm:$0xff] }
 0x3db   : > { %3901 = vst [vmem:[%s7988_s16 + $0x18] sm:$0xff] %v3885_v50  ;;  %v4433_v50 = vld [vmem:[#allocation4 + $0x2a8] sm:$0xff]  ;;  %5043 = vmatpush.msra.mxu3 %v4480_v22 }
 0x3dc   : > { %v3830_v53 = vpop.f32.mrf.mxu2  ;;  %v8027_v49 = vpop.f32.mrf.mxu3  ;;  %4847 = vmatpush.msra.mxu0 %v4433_v50 }
 0x3dd   : > { %v3831_v51 = vadd.f32 %v3830_v53, %v3766_v9  ;;  %v3703_v39 = vpop.f32.mrf.mxu0  ;;  %v3768_v1 = vpop.f32.mrf.mxu1  ;;  %v5490_v9 = vld [vmem:[%s6041_s6 + $0x61] sm:$0xff] }
 0x3de   : > { %v3704_v6 = vadd.f32 %v3703_v39, %v7879_v33  ;;  %v8060_v39 = vld [vmem:[#allocation2 + $0x129] sm:$0xff] }
 0x3df   : > { %v3870_v57 = vadd.f32 %v5488_v8, %v3831_v51  ;;  %v8056_v51 = vld [vmem:[#allocation2 + $0x112] sm:$0xff] }
 0x3e0   : > { %4608 = vmatmul.f32.gmra.mxu0 %v8008_v38  ;;  %4673 = vmatmul.f32.gmra.mxu1 %v8030_v26  ;;  %v3769_v15 = vadd.f32 %v3768_v1, %v3704_v6  ;;  %v4449_v6 = vld [vmem:[#allocation4 + $0x328] sm:$0xff] }
 0x3e1   : > { %v3886_v10 = vmax.f32 %v3870_v57, 0.0  ;;  %4738 = vmatmul.f32.gmra.mxu2 %v7890_v58  ;;  %4803 = vmatmul.f32.gmra.mxu3 %v8034_v54 }
 0x3e2   : > { %4912 = vmatpush.msra.mxu1 %v4449_v6  ;;  %v4462_v6 = vld [vmem:[#allocation4 + $0x390] sm:$0xff] }
 0x3e3   : > { %3902 = vst [vmem:[%s7988_s16 + $0x20] sm:$0xff] %v3886_v10  ;;  %v4464_v10 = vld [vmem:[#allocation4 + $0x3a0] sm:$0xff] }
 0x3e4   : > { %v3833_v33 = vpop.f32.mrf.mxu2  ;;  %v8040_v60 = vpop.f32.mrf.mxu3  ;;  %4978 = vmatpush.msra.mxu2 %v4464_v10  ;;  %v4430_v10 = vld [vmem:[#allocation4 + $0x290] sm:$0xff] }
 0x3e5   : > { %v3834_v41 = vadd.f32 %v3833_v33, %v3769_v15  ;;  %v3706_v29 = vpop.f32.mrf.mxu0  ;;  %v3771_v31 = vpop.f32.mrf.mxu1  ;;  %v4432_v15 = vld [vmem:[#allocation4 + $0x2a0] sm:$0xff] }
 0x3e6   : > { %v3707_v47 = vadd.f32 %v3706_v29, %v7887_v18  ;;  %4848 = vmatpush.msra.mxu0 %v4432_v15  ;;  %v8069_v29 = vld [vmem:[#allocation2 + $0x122] sm:$0xff] }
 0x3e7   : > { %v3871_v58 = vadd.f32 %v5489_v27, %v3834_v41  ;;  %v5493_v15 = vld [vmem:[%s6041_s6 + $0x81] sm:$0xff] }
 0x3e8   : > { %4611 = vmatmul.f32.gmra.mxu0 %v8021_v20  ;;  %4676 = vmatmul.f32.gmra.mxu1 %v8043_v24  ;;  %v3772_v13 = vadd.f32 %v3771_v31, %v3707_v47  ;;  %v8073_v31 = vld [vmem:[#allocation2 + $0x139] sm:$0xff] }
 0x3e9   : > { %v3887_v55 = vmax.f32 %v3871_v58, 0.0  ;;  %4741 = vmatmul.f32.gmra.mxu2 %v7898_v43  ;;  %4806 = vmatmul.f32.gmra.mxu3 %v8047_v28 }
 0x3ea   : > { %4849 = vmatpush.msra.mxu0 %v4431_v37  ;;  %v4429_v37 = vld [vmem:[#allocation4 + $0x288] sm:$0xff] }
 0x3eb   : > { %3903 = vst [vmem:[%s7988_s16 + $0x28] sm:$0xff] %v3887_v55  ;;  %v4448_v55 = vld [vmem:[#allocation4 + $0x320] sm:$0xff] }
 0x3ec   : > { %v3836_v18 = vpop.f32.mrf.mxu2  ;;  %v8053_v2 = vpop.f32.mrf.mxu3  ;;  %4913 = vmatpush.msra.mxu1 %v4448_v55  ;;  %4850 = vmatpush.msra.mxu0 %v4430_v10  ;;  %v4446_v55 = vld [vmem:[#allocation4 + $0x310] sm:$0xff]  ;;  %v4460_v10 = vld [vmem:[#allocation4 + $0x380] sm:$0xff] }
 0x3ed   : > { %v3837_v36 = vadd.f32 %v3836_v18, %v3772_v13  ;;  %v3709_v8 = vpop.f32.mrf.mxu0  ;;  %v3774_v53 = vpop.f32.mrf.mxu1  ;;  %v4463_v13 = vld [vmem:[#allocation4 + $0x398] sm:$0xff] }
 0x3ee   : > { %v3710_v3 = vadd.f32 %v3709_v8, %v7895_v16  ;;  %4979 = vmatpush.msra.mxu2 %v4463_v13  ;;  %v4461_v13 = vld [vmem:[#allocation4 + $0x388] sm:$0xff]  ;;  %4851 = vmatpush.msra.mxu0 %v4429_v37 }
 0x3ef   : > { %v3872_v43 = vadd.f32 %v5490_v9, %v3837_v36  ;;  %v4479_v9 = vld [vmem:[#allocation4 + $0x418] sm:$0xff] }
 0x3f0   : > { %4614 = vmatmul.f32.gmra.mxu0 %v8034_v54  ;;  %4679 = vmatmul.f32.gmra.mxu1 %v8056_v51  ;;  %v3775_v57 = vadd.f32 %v3774_v53, %v3710_v3  ;;  %v8082_v53 = vld [vmem:[#allocation2 + $0x12a] sm:$0xff] }
 0x3f1   : > { %v3888_v1 = vmax.f32 %v3872_v43, 0.0  ;;  %4744 = vmatmul.f32.gmra.mxu2 %v7906_v35  ;;  %4809 = vmatmul.f32.gmra.mxu3 %v8060_v39  ;;  %v8086_v43 = vld [vmem:[#allocation2 + $0x141] sm:$0xff] }
 0x3f2   : > { %5044 = vmatpush.msra.mxu3 %v4479_v9  ;;  %4980 = vmatpush.msra.mxu2 %v4462_v6  ;;  %v4477_v9 = vld [vmem:[#allocation4 + $0x408] sm:$0xff] }
 0x3f3   : > { %3904 = vst [vmem:[%s7988_s16 + $0x30] sm:$0xff] %v3888_v1  ;;  %v4445_v6 = vld [vmem:[#allocation4 + $0x308] sm:$0xff] }
 0x3f4   : > { %v3839_v16 = vpop.f32.mrf.mxu2  ;;  %v8066_v42 = vpop.f32.mrf.mxu3  ;;  %4981 = vmatpush.msra.mxu2 %v4461_v13 }
 0x3f5   : > { %v3840_v27 = vadd.f32 %v3839_v16, %v3775_v57  ;;  %v3712_v33 = vpop.f32.mrf.mxu0  ;;  %v3777_v44 = vpop.f32.mrf.mxu1  ;;  %v4447_v57 = vld [vmem:[#allocation4 + $0x318] sm:$0xff]  ;;  %v4478_v16 = vld [vmem:[#allocation4 + $0x410] sm:$0xff] }
 0x3f6   : > { %v3713_v41 = vadd.f32 %v3712_v33, %v7903_v19  ;;  %4914 = vmatpush.msra.mxu1 %v4447_v57  ;;  %5045 = vmatpush.msra.mxu3 %v4478_v16 }
 0x3f7   : > { %v3873_v35 = vadd.f32 %v5491_v40, %v3840_v27  ;;  %4982 = vmatpush.msra.mxu2 %v4460_v10 }
 0x3f8   : > { %4617 = vmatmul.f32.gmra.mxu0 %v8047_v28  ;;  %4682 = vmatmul.f32.gmra.mxu1 %v8069_v29  ;;  %v3778_v47 = vadd.f32 %v3777_v44, %v3713_v41  ;;  %v8099_v41 = vld [vmem:[#allocation2 + $0x151] sm:$0xff] }
 0x3f9   : > { %v3889_v58 = vmax.f32 %v3873_v35, 0.0  ;;  %4747 = vmatmul.f32.gmra.mxu2 %v7914_v48  ;;  %4812 = vmatmul.f32.gmra.mxu3 %v8073_v31  ;;  %v8095_v35 = vld [vmem:[#allocation2 + $0x13a] sm:$0xff] }
 0x3fa   : > { %4915 = vmatpush.msra.mxu1 %v4446_v55  ;;  %5046 = vmatpush.msra.mxu3 %v4477_v9  ;;  %v4444_v55 = vld [vmem:[#allocation4 + $0x300] sm:$0xff] }
 0x3fb   : > { %3905 = vst [vmem:[%s7988_s16 + $0x38] sm:$0xff] %v3889_v58 }
 0x3fc   : > { %v3842_v19 = vpop.f32.mrf.mxu2  ;;  %v8079_v50 = vpop.f32.mrf.mxu3  ;;  %4916 = vmatpush.msra.mxu1 %v4445_v6  ;;  %v5497_v6 = vld [vmem:[%s6041_s6 + $0xb1] sm:$0xff] }
 0x3fd   : > { %v3843_v18 = vadd.f32 %v3842_v19, %v3778_v47  ;;  %v3715_v23 = vpop.f32.mrf.mxu0  ;;  %v3780_v36 = vpop.f32.mrf.mxu1 }
 0x3fe   : > { %v3716_v8 = vadd.f32 %v3715_v23, %v7911_v46  ;;  %4917 = vmatpush.msra.mxu1 %v4444_v55  ;;  %v5498_v55 = vld [vmem:[%s6041_s6 + $0xc1] sm:$0xff] }
 0x3ff   : > { %v3874_v48 = vadd.f32 %v5492_v32, %v3843_v18  ;;  %v5494_v32 = vld [vmem:[%s6041_s6 + $0x91] sm:$0xff] }
 0x400   : > { %4620 = vmatmul.f32.gmra.mxu0 %v8060_v39  ;;  %4685 = vmatmul.f32.gmra.mxu1 %v8082_v53  ;;  %v3781_v1 = vadd.f32 %v3780_v36, %v3716_v8  ;;  %v8108_v8 = vld [vmem:[#allocation2 + $0x142] sm:$0xff] }
 0x401   : > { %v3890_v3 = vmax.f32 %v3874_v48, 0.0  ;;  %4750 = vmatmul.f32.gmra.mxu2 %v7922_v59  ;;  %4815 = vmatmul.f32.gmra.mxu3 %v8086_v43 }
 0x403   : > { %3906 = vst [vmem:[%s7988_s16 + $0x40] sm:$0xff] %v3890_v3  ;;  %v8112_v3 = vld [vmem:[#allocation2 + $0x159] sm:$0xff] }
 0x404   : > { %v3845_v46 = vpop.f32.mrf.mxu2  ;;  %v8092_v40 = vpop.f32.mrf.mxu3 }
 0x405   : > { %v3846_v22 = vadd.f32 %v3845_v46, %v3781_v1  ;;  %v3718_v27 = vpop.f32.mrf.mxu0  ;;  %v3783_v33 = vpop.f32.mrf.mxu1  ;;  %v5495_v46 = vld [vmem:[%s6041_s6 + $0x99] sm:$0xff] }
 0x406   : > { %v3719_v44 = vadd.f32 %v3718_v27, %v7919_v25 }
 0x407   : > { %v3875_v59 = vadd.f32 %v5493_v15, %v3846_v22  ;;  %v4428_v15 = vld [vmem:[#allocation4 + $0x280] sm:$0xff] }
 0x408   : > { %4623 = vmatmul.f32.gmra.mxu0 %v8073_v31  ;;  %4688 = vmatmul.f32.gmra.mxu1 %v8095_v35  ;;  %v3784_v47 = vadd.f32 %v3783_v33, %v3719_v44  ;;  %v4476_v22 = vld [vmem:[#allocation4 + $0x400] sm:$0xff] }
 0x409   : > { %v3891_v58 = vmax.f32 %v3875_v59, 0.0  ;;  %4753 = vmatmul.f32.gmra.mxu2 %v7931_v45  ;;  %4818 = vmatmul.f32.gmra.mxu3 %v8099_v41 }
 0x40a   : > { %4852 = vmatpush.msra.mxu0 %v4428_v15  ;;  %5047 = vmatpush.msra.mxu3 %v4476_v22 }
 0x40b   : > { %3907 = vst [vmem:[%s7988_s16 + $0x48] sm:$0xff] %v3891_v58  ;;  %v8121_v58 = vld [vmem:[#allocation2 + $0x152] sm:$0xff] }
 0x40c   : > { %v3848_v25 = vpop.f32.mrf.mxu2  ;;  %v8105_v19 = vpop.f32.mrf.mxu3 }
 0x40d   : > { %v3849_v18 = vadd.f32 %v3848_v25, %v3784_v47  ;;  %v3721_v23 = vpop.f32.mrf.mxu0  ;;  %v3786_v36 = vpop.f32.mrf.mxu1  ;;  %v8125_v47 = vld [vmem:[#allocation2 + $0x169] sm:$0xff] }
 0x40e   : > { %v3722_v48 = vadd.f32 %v3721_v23, %v7927_v11 }
 0x40f   : > { %v3876_v45 = vadd.f32 %v5494_v32, %v3849_v18  ;;  %v5496_v32 = vld [vmem:[%s6041_s6 + $0xa9] sm:$0xff] }
 0x410   : > { %4626 = vmatmul.f32.gmra.mxu0 %v8086_v43  ;;  %4691 = vmatmul.f32.gmra.mxu1 %v8108_v8  ;;  %v3787_v57 = vadd.f32 %v3786_v36, %v3722_v48  ;;  %v8134_v48 = vld [vmem:[#allocation2 + $0x15a] sm:$0xff] }
 0x411   : > { %v3892_v1 = vmax.f32 %v3876_v45, 0.0  ;;  %4756 = vmatmul.f32.gmra.mxu2 %v7940_v12  ;;  %4821 = vmatmul.f32.gmra.mxu3 %v8112_v3 }
 0x413   : > { %3908 = vst [vmem:[%s7988_s16 + $0x50] sm:$0xff] %v3892_v1 }
 0x414   : > { %v3851_v11 = vpop.f32.mrf.mxu2  ;;  %v8118_v16 = vpop.f32.mrf.mxu3 }
 0x415   : > { %v3852_v27 = vadd.f32 %v3851_v11, %v3787_v57  ;;  %v3724_v33 = vpop.f32.mrf.mxu0  ;;  %v3789_v59 = vpop.f32.mrf.mxu1 }
 0x416   : > { %v3725_v44 = vadd.f32 %v3724_v33, %v7936_v5  ;;  %v8147_v33 = vld [vmem:[#allocation2 + $0x16a] sm:$0xff] }
 0x417   : > { %v3877_v12 = vadd.f32 %v5495_v46, %v3852_v27 }
 0x418   : > { %4629 = vmatmul.f32.gmra.mxu0 %v8099_v41  ;;  %4694 = vmatmul.f32.gmra.mxu1 %v8121_v58  ;;  %v3790_v37 = vadd.f32 %v3789_v59, %v3725_v44  ;;  %v8153_v59 = vld [vmem:[#allocation2 + $0x181] sm:$0xff] }
 0x419   : > { %v3893_v13 = vmax.f32 %v3877_v12, 0.0  ;;  %4759 = vmatmul.f32.gmra.mxu2 %v7953_v7  ;;  %4824 = vmatmul.f32.gmra.mxu3 %v8125_v47  ;;  %v8138_v7 = vld [vmem:[#allocation2 + $0x171] sm:$0xff] }
 0x41b   : > { %3909 = vst [vmem:[%s7988_s16 + $0x58] sm:$0xff] %v3893_v13 }
 0x41c   : > { %v3854_v5 = vpop.f32.mrf.mxu2  ;;  %v8131_v25 = vpop.f32.mrf.mxu3 }
 0x41d   : > { %v3855_v9 = vadd.f32 %v3854_v5, %v3790_v37  ;;  %v3727_v18 = vpop.f32.mrf.mxu0  ;;  %v3792_v23 = vpop.f32.mrf.mxu1 }
 0x41e   : > { %v3728_v45 = vadd.f32 %v3727_v18, %v7945_v30 }
 0x41f   : > { %v3878_v36 = vadd.f32 %v5496_v32, %v3855_v9 }
 0x420   : > { %4632 = vmatmul.f32.gmra.mxu0 %v8112_v3  ;;  %4697 = vmatmul.f32.gmra.mxu1 %v8134_v48  ;;  %v3793_v57 = vadd.f32 %v3792_v23, %v3728_v45  ;;  %v8162_v23 = vld [vmem:[#allocation2 + $0x172] sm:$0xff]  ;;  %v8171_v45 = vld [vmem:[#allocation2 + $0x188] sm:$0xff] }
 0x421   : > { %v3894_v1 = vmax.f32 %v3878_v36, 0.0  ;;  %4762 = vmatmul.f32.gmra.mxu2 %v7966_v17  ;;  %4827 = vmatmul.f32.gmra.mxu3 %v8138_v7  ;;  %v8151_v17 = vld [vmem:[#allocation2 + $0x180] sm:$0xff] }
 0x422   : > { %v8167_v36 = vld [vmem:[%s8374_s4] ss:$0 sm:$0xff] }
 0x423   : > { %3910 = vst [vmem:[%s7988_s16 + $0x60] sm:$0xff] %v3894_v1  ;;  %v8173_v1 = vld [vmem:[#allocation2 + $0x189] sm:$0xff] }
 0x424   : > { %v3857_v10 = vpop.f32.mrf.mxu2  ;;  %v8144_v15 = vpop.f32.mrf.mxu3 }
 0x425   : > { %v3858_v30 = vadd.f32 %v3857_v10, %v3793_v57  ;;  %v3730_v46 = vpop.f32.mrf.mxu0  ;;  %v3795_v11 = vpop.f32.mrf.mxu1  ;;  %v5499_v10 = vld [vmem:[%s6041_s6 + $0xc9] sm:$0xff] }
 0x426   : > { %v3731_v27 = vadd.f32 %v3730_v46, %v7958_v21 }
 0x427   : > { %v3879_v22 = vadd.f32 %v5497_v6, %v3858_v30  ;;  %v4530_v6 = vadd.f32 %v8167_v36, %v7979_v63  ;;  %v4533_v63 = vadd.f32 %v8167_v36, %v7992_v52  ;;  %v4536_v52 = vadd.f32 %v8167_v36, %v8003_v14 }
 0x428   : > { %4635 = vmatmul.f32.gmra.mxu0 %v8125_v47  ;;  %4700 = vmatmul.f32.gmra.mxu1 %v8147_v33  ;;  %v3796_v44 = vadd.f32 %v3795_v11, %v3731_v27 }
 0x429   : > { %v3895_v12 = vmax.f32 %v3879_v22, 0.0  ;;  %4765 = vmatmul.f32.gmra.mxu2 %v8151_v17  ;;  %4830 = vmatmul.f32.gmra.mxu3 %v8153_v59 }
 0x42b   : > { %3911 = vst [vmem:[%s7988_s16 + $0x68] sm:$0xff] %v3895_v12 }
 0x42c   : > { %v3860_v13 = vpop.f32.mrf.mxu2  ;;  %v8159_v21 = vpop.f32.mrf.mxu3 }
 0x42d   : > { %v3861_v37 = vadd.f32 %v3860_v13, %v3796_v44  ;;  %v3733_v32 = vpop.f32.mrf.mxu0  ;;  %v3798_v5 = vpop.f32.mrf.mxu1 }
 0x42e   : > { %v3734_v18 = vadd.f32 %v3733_v32, %v7970_v0 }
 0x42f   : > { %v3880_v9 = vadd.f32 %v5498_v55, %v3861_v37  ;;  %v4108_v55 = vld [vmem:[#allocation2 + $0xf0] sm:$0xff] }
 0x430   : > { %4638 = vmatmul.f32.gmra.mxu0 %v8138_v7  ;;  %4703 = vmatmul.f32.gmra.mxu1 %v8162_v23  ;;  %v3799_v0 = vadd.f32 %v3798_v5, %v3734_v18 }
 0x431   : > { %v3896_v57 = vmax.f32 %v3880_v9, 0.0  ;;  %4768 = vmatmul.f32.gmra.mxu2 %v8171_v45  ;;  %4833 = vmatmul.f32.gmra.mxu3 %v8173_v1 }
 0x433   : > { %3912 = vst [vmem:[%s7988_s16 + $0x70] sm:$0xff] %v3896_v57 }
 0x434   : > { %v3863_v30 = vpop.f32.mrf.mxu2  ;;  %v8181_v46 = vpop.f32.mrf.mxu3 }
 0x435   : > { %v3864_v11 = vadd.f32 %v3863_v30, %v3799_v0  ;;  %v4594_v22 = vpop.f32.mrf.mxu0  ;;  %v4659_v27 = vpop.f32.mrf.mxu1 }
 0x436   : > { %v4595_v12 = vadd.f32 %v4594_v22, %v4530_v6 }
 0x437   : > { %v3881_v44 = vadd.f32 %v5499_v10, %v3864_v11  ;;  %v4109_v10 = vld [vmem:[#allocation2 + $0xf8] sm:$0xff] }
 0x438   : > { %v4660_v13 = vadd.f32 %v4659_v27, %v4595_v12  ;;  %4853 = vmatmul.f32.vlgmr.msra.gmra.mxu0 %v7951_v62  ;;  %4918 = vmatmul.f32.vlgmr.msra.gmra.mxu1 %v4108_v55  ;;  %v4110_v55 = vld [vmem:[#allocation2 + $0x108] sm:$0xff] }
 0x439   : > { %v3897_v37 = vmax.f32 %v3881_v44, 0.0  ;;  %4983 = vmatmul.f32.vlgmr.msra.gmra.mxu2 %v7997_v4  ;;  %5048 = vmatmul.f32.vlgmr.msra.gmra.mxu3 %v8017_v56 }
 0x43b   : > { %3913 = vst [vmem:[%s7988_s16 + $0x78] sm:$0xff] %v3897_v37 }
 0x43c   : > { %v4724_v32 = vpop.f32.mrf.mxu2  ;;  %v4789_v5 = vpop.f32.mrf.mxu3 }
 0x43d   : > { %v4725_v9 = vadd.f32 %v4724_v32, %v4660_v13  ;;  %v4597_v18 = vpop.f32.mrf.mxu0  ;;  %v4662_v57 = vpop.f32.mrf.mxu1 }
 0x43e   : > { %v4598_v0 = vadd.f32 %v4597_v18, %v4533_v63  ;;  %v4111_v18 = vld [vmem:[#allocation2 + $0x110] sm:$0xff] }
 0x43f   : > { %v8189_v6 = vadd.f32 %v4789_v5, %v4725_v9 }
 0x440   : > { %v4663_v62 = vadd.f32 %v4662_v57, %v4598_v0  ;;  %4856 = vmatmul.f32.gmra.mxu0 %v7964_v61  ;;  %4921 = vmatmul.f32.gmra.mxu1 %v4109_v10  ;;  %v4539_v61 = vadd.f32 %v8167_v36, %v8014_v34  ;;  %v4542_v34 = vadd.f32 %v8167_v36, %v8027_v49 }
 0x441   : > { %4986 = vmatmul.f32.gmra.mxu2 %v8008_v38  ;;  %5051 = vmatmul.f32.gmra.mxu3 %v8030_v26  ;;  %v4545_v49 = vadd.f32 %v8167_v36, %v8040_v60  ;;  %v4548_v60 = vadd.f32 %v8167_v36, %v8053_v2  ;;  %v4551_v2 = vadd.f32 %v8167_v36, %v8066_v42 }
 0x442   : > { %v4554_v42 = vadd.f32 %v8167_v36, %v8079_v50  ;;  %v4557_v50 = vadd.f32 %v8167_v36, %v8092_v40  ;;  %v4560_v40 = vadd.f32 %v8167_v36, %v8105_v19  ;;  %v4563_v19 = vadd.f32 %v8167_v36, %v8118_v16 }
 0x443   : > { %v4566_v16 = vadd.f32 %v8167_v36, %v8131_v25  ;;  %v4569_v25 = vadd.f32 %v8167_v36, %v8144_v15  ;;  %v4572_v15 = vadd.f32 %v8167_v36, %v8159_v21 }
 0x444   : > { %v4727_v4 = vpop.f32.mrf.mxu2  ;;  %v4792_v30 = vpop.f32.mrf.mxu3 }
 0x445   : > { %v4728_v11 = vadd.f32 %v4727_v4, %v4663_v62  ;;  %v4600_v22 = vpop.f32.mrf.mxu0  ;;  %v4665_v27 = vpop.f32.mrf.mxu1 }
 0x446   : > { %v4601_v12 = vadd.f32 %v4600_v22, %v4536_v52 }
 0x447   : > { %v8196_v44 = vadd.f32 %v4792_v30, %v4728_v11  ;;  %v4112_v30 = vld [vmem:[#allocation2 + $0x120] sm:$0xff] }
 0x448   : > { %v4666_v13 = vadd.f32 %v4665_v27, %v4601_v12  ;;  %4859 = vmatmul.f32.gmra.mxu0 %v8017_v56  ;;  %4924 = vmatmul.f32.gmra.mxu1 %v4110_v55 }
 0x449   : > { %4989 = vmatmul.f32.gmra.mxu2 %v8021_v20  ;;  %5054 = vmatmul.f32.gmra.mxu3 %v8043_v24 }
 0x44c   : > { %v4730_v14 = vpop.f32.mrf.mxu2  ;;  %v4795_v38 = vpop.f32.mrf.mxu3 }
 0x44d   : > { %v4731_v37 = vadd.f32 %v4730_v14, %v4666_v13  ;;  %v4603_v63 = vpop.f32.mrf.mxu0  ;;  %v4668_v32 = vpop.f32.mrf.mxu1 }
 0x44e   : > { %v4604_v5 = vadd.f32 %v4603_v63, %v4539_v61  ;;  %v4113_v61 = vld [vmem:[#allocation2 + $0x128] sm:$0xff] }
 0x44f   : > { %v8203_v9 = vadd.f32 %v4795_v38, %v4731_v37 }
 0x450   : > { %v4669_v57 = vadd.f32 %v4668_v32, %v4604_v5  ;;  %4862 = vmatmul.f32.gmra.mxu0 %v8030_v26  ;;  %4927 = vmatmul.f32.gmra.mxu1 %v4111_v18  ;;  %v4114_v18 = vld [vmem:[#allocation2 + $0x138] sm:$0xff] }
 0x451   : > { %4992 = vmatmul.f32.gmra.mxu2 %v8034_v54  ;;  %5057 = vmatmul.f32.gmra.mxu3 %v8056_v51 }
 0x454   : > { %v4733_v56 = vpop.f32.mrf.mxu2  ;;  %v4798_v20 = vpop.f32.mrf.mxu3 }
 0x455   : > { %v4734_v0 = vadd.f32 %v4733_v56, %v4669_v57  ;;  %v4606_v10 = vpop.f32.mrf.mxu0  ;;  %v4671_v62 = vpop.f32.mrf.mxu1 }
 0x456   : > { %v4607_v52 = vadd.f32 %v4606_v10, %v4542_v34 }
 0x457   : > { %v8210_v4 = vadd.f32 %v4798_v20, %v4734_v0 }
 0x458   : > { %v4672_v11 = vadd.f32 %v4671_v62, %v4607_v52  ;;  %4865 = vmatmul.f32.gmra.mxu0 %v8043_v24  ;;  %4930 = vmatmul.f32.gmra.mxu1 %v4112_v30  ;;  %v4115_v62 = vld [vmem:[#allocation2 + $0x140] sm:$0xff] }
 0x459   : > { %4995 = vmatmul.f32.gmra.mxu2 %v8047_v28  ;;  %5060 = vmatmul.f32.gmra.mxu3 %v8069_v29 }
 0x45c   : > { %v4736_v26 = vpop.f32.mrf.mxu2  ;;  %v4801_v54 = vpop.f32.mrf.mxu3 }
 0x45d   : > { %v4737_v22 = vadd.f32 %v4736_v26, %v4672_v11  ;;  %v4609_v27 = vpop.f32.mrf.mxu0  ;;  %v4674_v12 = vpop.f32.mrf.mxu1 }
 0x45e   : > { %v4610_v55 = vadd.f32 %v4609_v27, %v4545_v49 }
 0x45f   : > { %v8217_v13 = vadd.f32 %v4801_v54, %v4737_v22  ;;  %v4116_v22 = vld [vmem:[#allocation2 + $0x150] sm:$0xff] }
 0x460   : > { %v4675_v14 = vadd.f32 %v4674_v12, %v4610_v55  ;;  %4868 = vmatmul.f32.gmra.mxu0 %v8056_v51  ;;  %4933 = vmatmul.f32.gmra.mxu1 %v4113_v61 }
 0x461   : > { %4998 = vmatmul.f32.gmra.mxu2 %v8060_v39  ;;  %5063 = vmatmul.f32.gmra.mxu3 %v8082_v53 }
 0x464   : > { %v4739_v24 = vpop.f32.mrf.mxu2  ;;  %v4804_v28 = vpop.f32.mrf.mxu3 }
 0x465   : > { %v4740_v38 = vadd.f32 %v4739_v24, %v4675_v14  ;;  %v4612_v37 = vpop.f32.mrf.mxu0  ;;  %v4677_v63 = vpop.f32.mrf.mxu1  ;;  %v4117_v24 = vld [vmem:[#allocation2 + $0x158] sm:$0xff] }
 0x466   : > { %v4613_v32 = vadd.f32 %v4612_v37, %v4548_v60 }
 0x467   : > { %v8224_v5 = vadd.f32 %v4804_v28, %v4740_v38 }
 0x468   : > { %v4678_v57 = vadd.f32 %v4677_v63, %v4613_v32  ;;  %4871 = vmatmul.f32.gmra.mxu0 %v8069_v29  ;;  %4936 = vmatmul.f32.gmra.mxu1 %v4114_v18 }
 0x469   : > { %5001 = vmatmul.f32.gmra.mxu2 %v8073_v31  ;;  %5066 = vmatmul.f32.gmra.mxu3 %v8095_v35 }
 0x46c   : > { %v4742_v51 = vpop.f32.mrf.mxu2  ;;  %v4807_v39 = vpop.f32.mrf.mxu3 }
 0x46d   : > { %v4743_v34 = vadd.f32 %v4742_v51, %v4678_v57  ;;  %v4615_v56 = vpop.f32.mrf.mxu0  ;;  %v4680_v20 = vpop.f32.mrf.mxu1  ;;  %v4118_v57 = vld [vmem:[#allocation2 + $0x168] sm:$0xff] }
 0x46e   : > { %v4616_v0 = vadd.f32 %v4615_v56, %v4551_v2 }
 0x46f   : > { %v8231_v10 = vadd.f32 %v4807_v39, %v4743_v34 }
 0x470   : > { %v4681_v52 = vadd.f32 %v4680_v20, %v4616_v0  ;;  %4874 = vmatmul.f32.gmra.mxu0 %v8082_v53  ;;  %4939 = vmatmul.f32.gmra.mxu1 %v4115_v62  ;;  %v4119_v0 = vld [vmem:[#allocation2 + $0x170] sm:$0xff] }
 0x471   : > { %5004 = vmatmul.f32.gmra.mxu2 %v8086_v43  ;;  %5069 = vmatmul.f32.gmra.mxu3 %v8108_v8 }
 0x474   : > { %v4745_v29 = vpop.f32.mrf.mxu2  ;;  %v4810_v31 = vpop.f32.mrf.mxu3 }
 0x475   : > { %v4746_v30 = vadd.f32 %v4745_v29, %v4681_v52  ;;  %v4618_v11 = vpop.f32.mrf.mxu0  ;;  %v4683_v49 = vpop.f32.mrf.mxu1 }
 0x476   : > { %v4619_v26 = vadd.f32 %v4618_v11, %v4554_v42 }
 0x477   : > { %v8238_v54 = vadd.f32 %v4810_v31, %v4746_v30 }
 0x478   : > { %v4684_v27 = vadd.f32 %v4683_v49, %v4619_v26  ;;  %4877 = vmatmul.f32.gmra.mxu0 %v8095_v35  ;;  %4942 = vmatmul.f32.gmra.mxu1 %v4116_v22 }
 0x479   : > { %5007 = vmatmul.f32.gmra.mxu2 %v8099_v41  ;;  %5072 = vmatmul.f32.gmra.mxu3 %v8121_v58 }
 0x47c   : > { %v4748_v53 = vpop.f32.mrf.mxu2  ;;  %v4813_v43 = vpop.f32.mrf.mxu3 }
 0x47d   : > { %v4749_v12 = vadd.f32 %v4748_v53, %v4684_v27  ;;  %v4621_v55 = vpop.f32.mrf.mxu0  ;;  %v4686_v61 = vpop.f32.mrf.mxu1 }
 0x47e   : > { %v4622_v14 = vadd.f32 %v4621_v55, %v4557_v50 }
 0x47f   : > { %v8245_v60 = vadd.f32 %v4813_v43, %v4749_v12 }
 0x480   : > { %v4687_v28 = vadd.f32 %v4686_v61, %v4622_v14  ;;  %4880 = vmatmul.f32.gmra.mxu0 %v8108_v8  ;;  %4945 = vmatmul.f32.gmra.mxu1 %v4117_v24  ;;  %v4122_v14 = vld [vmem:[#allocation2 + $0x198] sm:$0xff] }
 0x481   : > { %5010 = vmatmul.f32.gmra.mxu2 %v8112_v3  ;;  %5075 = vmatmul.f32.gmra.mxu3 %v8134_v48 }
 0x484   : > { %v4751_v35 = vpop.f32.mrf.mxu2  ;;  %v4816_v41 = vpop.f32.mrf.mxu3 }
 0x485   : > { %v4752_v38 = vadd.f32 %v4751_v35, %v4687_v28  ;;  %v4624_v37 = vpop.f32.mrf.mxu0  ;;  %v4689_v63 = vpop.f32.mrf.mxu1  ;;  %v4154_v28 = vld [vmem:[#allocation2 + $0x199] sm:$0xff] }
 0x486   : > { %v4625_v32 = vadd.f32 %v4624_v37, %v4560_v40  ;;  %v4186_v40 = vld [vmem:[#allocation2 + $0x19a] sm:$0xff] }
 0x487   : > { %v8252_v18 = vadd.f32 %v4816_v41, %v4752_v38 }
 0x488   : > { %v4690_v2 = vadd.f32 %v4689_v63, %v4625_v32  ;;  %4883 = vmatmul.f32.gmra.mxu0 %v8121_v58  ;;  %4948 = vmatmul.f32.gmra.mxu1 %v4118_v57  ;;  %v4155_v32 = vld [vmem:[#allocation2 + $0x1a1] sm:$0xff] }
 0x489   : > { %5013 = vmatmul.f32.gmra.mxu2 %v8125_v47  ;;  %5078 = vmatmul.f32.gmra.mxu3 %v8147_v33  ;;  %v4187_v57 = vld [vmem:[#allocation2 + $0x1a2] sm:$0xff] }
 0x48c   : > { %v4754_v8 = vpop.f32.mrf.mxu2  ;;  %v4819_v3 = vpop.f32.mrf.mxu3 }
 0x48d   : > { %v4755_v51 = vadd.f32 %v4754_v8, %v4690_v2  ;;  %v4627_v39 = vpop.f32.mrf.mxu0  ;;  %v4692_v34 = vpop.f32.mrf.mxu1  ;;  %v5598_v8 = vld [vmem:[#allocation2 + $0x8] sm:$0xff] }
 0x48e   : > { %v4628_v56 = vadd.f32 %v4627_v39, %v4563_v19 }
 0x48f   : > { %v8259_v20 = vadd.f32 %v4819_v3, %v4755_v51 }
 0x490   : > { %v4693_v62 = vadd.f32 %v4692_v34, %v4628_v56  ;;  %4886 = vmatmul.f32.gmra.mxu0 %v8134_v48  ;;  %4951 = vmatmul.f32.gmra.mxu1 %v4119_v0  ;;  %v4184_v48 = vld [vmem:[#allocation2 + $0x182] sm:$0xff] }
 0x491   : > { %5016 = vmatmul.f32.gmra.mxu2 %v8138_v7  ;;  %5081 = vmatmul.f32.gmra.mxu3 %v8162_v23 }
 0x494   : > { %v4757_v58 = vpop.f32.mrf.mxu2  ;;  %v4822_v47 = vpop.f32.mrf.mxu3 }
 0x495   : > { %v4758_v52 = vadd.f32 %v4757_v58, %v4693_v62  ;;  %v4630_v42 = vpop.f32.mrf.mxu0  ;;  %v4695_v29 = vpop.f32.mrf.mxu1 }
 0x496   : > { %v4631_v31 = vadd.f32 %v4630_v42, %v4566_v16  ;;  %v5500_v42 = vld [vmem:[%s6041_s6 + $0xd9] sm:$0xff] }
 0x497   : > { %v8266_v30 = vadd.f32 %v4822_v47, %v4758_v52 }
 0x498   : > { %v4696_v11 = vadd.f32 %v4695_v29, %v4631_v31  ;;  %4889 = vmatmul.f32.gmra.mxu0 %v8147_v33  ;;  %4954 = vmatmul.f32.gmra.mxu1 %v8151_v17  ;;  %v4185_v33 = vld [vmem:[#allocation2 + $0x18a] sm:$0xff] }
 0x499   : > { %5019 = vmatmul.f32.gmra.mxu2 %v8153_v59  ;;  %5084 = vmatmul.f32.gmra.mxu3 %v4184_v48 }
 0x49c   : > { %v4760_v7 = vpop.f32.mrf.mxu2  ;;  %v4825_v49 = vpop.f32.mrf.mxu3 }
 0x49d   : > { %v4761_v26 = vadd.f32 %v4760_v7, %v4696_v11  ;;  %v4633_v22 = vpop.f32.mrf.mxu0  ;;  %v4698_v27 = vpop.f32.mrf.mxu1 }
 0x49e   : > { %v4634_v50 = vadd.f32 %v4633_v22, %v4569_v25 }
 0x49f   : > { %v8273_v53 = vadd.f32 %v4825_v49, %v4761_v26 }
 0x4a0   : > { %v4699_v43 = vadd.f32 %v4698_v27, %v4634_v50  ;;  %4892 = vmatmul.f32.gmra.mxu0 %v8162_v23  ;;  %4957 = vmatmul.f32.gmra.mxu1 %v8171_v45  ;;  %v4575_v45 = vadd.f32 %v8167_v36, %v8181_v46  ;;  %v5501_v27 = vld [vmem:[%s6041_s6 + $0xe1] sm:$0xff] }
 0x4a1   : > { %5022 = vmatmul.f32.gmra.mxu2 %v8173_v1  ;;  %5087 = vmatmul.f32.gmra.mxu3 %v4185_v33 }
 0x4a4   : > { %v4763_v17 = vpop.f32.mrf.mxu2  ;;  %v4828_v59 = vpop.f32.mrf.mxu3 }
 0x4a5   : > { %v4764_v12 = vadd.f32 %v4763_v17, %v4699_v43  ;;  %v4636_v55 = vpop.f32.mrf.mxu0  ;;  %v4701_v61 = vpop.f32.mrf.mxu1 }
 0x4a6   : > { %v4637_v24 = vadd.f32 %v4636_v55, %v4572_v15 }
 0x4a7   : > { %v8280_v35 = vadd.f32 %v4828_v59, %v4764_v12 }
 0x4a8   : > { %v4702_v23 = vadd.f32 %v4701_v61, %v4637_v24  ;;  %4895 = vmatmul.f32.gmra.mxu0 %v4184_v48  ;;  %4960 = vmatmul.f32.gmra.mxu1 %v4122_v14  ;;  %v5502_v14 = vld [vmem:[%s6041_s6 + $0xf1] sm:$0xff] }
 0x4a9   : > { %5025 = vmatmul.f32.gmra.mxu2 %v4154_v28  ;;  %5090 = vmatmul.f32.gmra.mxu3 %v4186_v40 }
 0x4ac   : > { %v4766_v21 = vpop.f32.mrf.mxu2  ;;  %v4831_v1 = vpop.f32.mrf.mxu3 }
 0x4ad   : > { %v4767_v41 = vadd.f32 %v4766_v21, %v4702_v23  ;;  %v4639_v38 = vpop.f32.mrf.mxu0  ;;  %v4704_v37 = vpop.f32.mrf.mxu1 }
 0x4ae   : > { %v4640_v63 = vadd.f32 %v4639_v38, %v4575_v45 }
 0x4af   : > { %v8284_v2 = vadd.f32 %v4831_v1, %v4767_v41 }
 0x4b0   : > { %v4705_v19 = vadd.f32 %v4704_v37, %v4640_v63  ;;  %4898 = vmatmul.f32.gmra.mxu0 %v4185_v33  ;;  %4963 = vmatmul.f32.gmra.mxu1 %v5598_v8  ;;  %v5503_v37 = vld [vmem:[%s6041_s6 + $0xf9] sm:$0xff] }
 0x4b1   : > { %5028 = vmatmul.f32.gmra.mxu2 %v4155_v32  ;;  %5093 = vmatmul.f32.gmra.mxu3 %v4187_v57 }
 0x4b4   : > { %v4769_v3 = vpop.f32.mrf.mxu2  ;;  %v4834_v51 = vpop.f32.mrf.mxu3 }
 0x4b5   : > { %v4770_v36 = vadd.f32 %v4769_v3, %v4705_v19  ;;  %v4854_v46 = vpop.f32.mrf.mxu0  ;;  %v4919_v39 = vpop.f32.mrf.mxu1 }
 0x4b6   : > { %v4855_v56 = vadd.f32 %v4854_v46, %v8189_v6 }
 0x4b7   : > { %v8286_v34 = vadd.f32 %v4834_v51, %v4770_v36 }
 0x4b8   : > { %v4920_v0 = vadd.f32 %v4919_v39, %v4855_v56  ;;  %v5504_v39 = vld [vmem:[%s6041_s6 + $0x109] sm:$0xff] }
 0x4bc   : > { %v4984_v62 = vpop.f32.mrf.mxu2  ;;  %v5049_v16 = vpop.f32.mrf.mxu3 }
 0x4bd   : > { %v4985_v58 = vadd.f32 %v4984_v62, %v4920_v0  ;;  %v4857_v47 = vpop.f32.mrf.mxu0  ;;  %v4922_v52 = vpop.f32.mrf.mxu1 }
 0x4be   : > { %v4858_v31 = vadd.f32 %v4857_v47, %v8196_v44 }
 0x4bf   : > { %v5050_v29 = vadd.f32 %v5049_v16, %v4985_v58 }
 0x4c0   : > { %v4923_v25 = vadd.f32 %v4922_v52, %v4858_v31  ;;  %v5505_v31 = vld [vmem:[%s6041_s6 + $0x111] sm:$0xff] }
 0x4c1   : > { %v5097_v11 = vadd.f32 %v5500_v42, %v5050_v29 }
 0x4c3   : > { %v5113_v48 = vmax.f32 %v5097_v11, 0.0 }
 0x4c4   : > { %v4987_v7 = vpop.f32.mrf.mxu2  ;;  %v5052_v49 = vpop.f32.mrf.mxu3 }
 0x4c5   : > { %5516 = vst [vmem:[%s7988_s16 + $0x80] sm:$0xff] %v5113_v48  ;;  %v4988_v6 = vadd.f32 %v4987_v7, %v4923_v25  ;;  %v4860_v26 = vpop.f32.mrf.mxu0  ;;  %v4925_v22 = vpop.f32.mrf.mxu1 }
 0x4c6   : > { %v4861_v43 = vadd.f32 %v4860_v26, %v8203_v9 }
 0x4c7   : > { %v5053_v50 = vadd.f32 %v5052_v49, %v4988_v6 }
 0x4c8   : > { %v4926_v17 = vadd.f32 %v4925_v22, %v4861_v43 }
 0x4c9   : > { %v5098_v33 = vadd.f32 %v5501_v27, %v5053_v50  ;;  %v5506_v50 = vld [vmem:[%s6041_s6 + $0x121] sm:$0xff] }
 0x4cb   : > { %v5114_v15 = vmax.f32 %v5098_v33, 0.0 }
 0x4cc   : > { %v4990_v44 = vpop.f32.mrf.mxu2  ;;  %v5055_v59 = vpop.f32.mrf.mxu3 }
 0x4cd   : > { %5517 = vst [vmem:[%s7988_s16 + $0x88] sm:$0xff] %v5114_v15  ;;  %v4991_v12 = vadd.f32 %v4990_v44, %v4926_v17  ;;  %v4863_v55 = vpop.f32.mrf.mxu0  ;;  %v4928_v61 = vpop.f32.mrf.mxu1 }
 0x4ce   : > { %v4864_v28 = vadd.f32 %v4863_v55, %v8210_v4 }
 0x4cf   : > { %v5056_v24 = vadd.f32 %v5055_v59, %v4991_v12 }
 0x4d0   : > { %v4929_v45 = vadd.f32 %v4928_v61, %v4864_v28 }
 0x4d1   : > { %v5099_v40 = vadd.f32 %v5502_v14, %v5056_v24  ;;  %v5507_v14 = vld [vmem:[%s6041_s6 + $0x129] sm:$0xff] }
 0x4d3   : > { %v5115_v23 = vmax.f32 %v5099_v40, 0.0 }
 0x4d4   : > { %v4993_v9 = vpop.f32.mrf.mxu2  ;;  %v5058_v21 = vpop.f32.mrf.mxu3 }
 0x4d5   : > { %5518 = vst [vmem:[%s7988_s16 + $0x90] sm:$0xff] %v5115_v23  ;;  %v4994_v1 = vadd.f32 %v4993_v9, %v4929_v45  ;;  %v4866_v41 = vpop.f32.mrf.mxu0  ;;  %v4931_v38 = vpop.f32.mrf.mxu1 }
 0x4d6   : > { %v4867_v32 = vadd.f32 %v4866_v41, %v8217_v13 }
 0x4d7   : > { %v5059_v63 = vadd.f32 %v5058_v21, %v4994_v1 }
 0x4d8   : > { %v4932_v8 = vadd.f32 %v4931_v38, %v4867_v32  ;;  %v5508_v38 = vld [vmem:[%s6041_s6 + $0x139] sm:$0xff] }
 0x4d9   : > { %v5100_v57 = vadd.f32 %v5503_v37, %v5059_v63 }
 0x4db   : > { %v5116_v19 = vmax.f32 %v5100_v57, 0.0 }
 0x4dc   : > { %v4996_v4 = vpop.f32.mrf.mxu2  ;;  %v5061_v3 = vpop.f32.mrf.mxu3 }
 0x4dd   : > { %5519 = vst [vmem:[%s7988_s16 + $0x98] sm:$0xff] %v5116_v19  ;;  %v4997_v51 = vadd.f32 %v4996_v4, %v4932_v8  ;;  %v4869_v36 = vpop.f32.mrf.mxu0  ;;  %v4934_v46 = vpop.f32.mrf.mxu1 }
 0x4de   : > { %v4870_v0 = vadd.f32 %v4869_v36, %v8224_v5  ;;  %v5509_v36 = vld [vmem:[%s6041_s6 + $0x141] sm:$0xff] }
 0x4df   : > { %v5062_v56 = vadd.f32 %v5061_v3, %v4997_v51 }
 0x4e0   : > { %v4935_v58 = vadd.f32 %v4934_v46, %v4870_v0 }
 0x4e1   : > { %v5101_v62 = vadd.f32 %v5504_v39, %v5062_v56 }
 0x4e3   : > { %v5117_v16 = vmax.f32 %v5101_v62, 0.0 }
 0x4e4   : > { %v4999_v13 = vpop.f32.mrf.mxu2  ;;  %v5064_v47 = vpop.f32.mrf.mxu3 }
 0x4e5   : > { %5520 = vst [vmem:[%s7988_s16 + $0xa0] sm:$0xff] %v5117_v16  ;;  %v5000_v52 = vadd.f32 %v4999_v13, %v4935_v58  ;;  %v4872_v42 = vpop.f32.mrf.mxu0  ;;  %v4937_v29 = vpop.f32.mrf.mxu1 }
 0x4e6   : > { %v4873_v48 = vadd.f32 %v4872_v42, %v8231_v10 }
 0x4e7   : > { %v5065_v11 = vadd.f32 %v5064_v47, %v5000_v52  ;;  %v5510_v52 = vld [vmem:[%s6041_s6 + $0x151] sm:$0xff] }
 0x4e8   : > { %v4938_v49 = vadd.f32 %v4937_v29, %v4873_v48 }
 0x4e9   : > { %v5102_v25 = vadd.f32 %v5505_v31, %v5065_v11 }
 0x4eb   : > { %v5118_v7 = vmax.f32 %v5102_v25, 0.0 }
 0x4ec   : > { %v5002_v5 = vpop.f32.mrf.mxu2  ;;  %v5067_v6 = vpop.f32.mrf.mxu3 }
 0x4ed   : > { %5521 = vst [vmem:[%s7988_s16 + $0xa8] sm:$0xff] %v5118_v7  ;;  %v5003_v26 = vadd.f32 %v5002_v5, %v4938_v49  ;;  %v4875_v22 = vpop.f32.mrf.mxu0  ;;  %v4940_v27 = vpop.f32.mrf.mxu1 }
 0x4ee   : > { %v4876_v33 = vadd.f32 %v4875_v22, %v8238_v54 }
 0x4ef   : > { %v5068_v43 = vadd.f32 %v5067_v6, %v5003_v26  ;;  %v5511_v6 = vld [vmem:[%s6041_s6 + $0x159] sm:$0xff] }
 0x4f0   : > { %v4941_v44 = vadd.f32 %v4940_v27, %v4876_v33 }
 0x4f1   : > { %v5103_v15 = vadd.f32 %v5506_v50, %v5068_v43 }
 0x4f3   : > { %v5119_v17 = vmax.f32 %v5103_v15, 0.0 }
 0x4f4   : > { %v5005_v10 = vpop.f32.mrf.mxu2  ;;  %v5070_v59 = vpop.f32.mrf.mxu3 }
 0x4f5   : > { %5522 = vst [vmem:[%s7988_s16 + $0xb0] sm:$0xff] %v5119_v17  ;;  %v5006_v12 = vadd.f32 %v5005_v10, %v4941_v44  ;;  %v4878_v55 = vpop.f32.mrf.mxu0  ;;  %v4943_v61 = vpop.f32.mrf.mxu1  ;;  %v5512_v44 = vld [vmem:[%s6041_s6 + $0x169] sm:$0xff] }
 0x4f6   : > { %v4879_v28 = vadd.f32 %v4878_v55, %v8245_v60 }
 0x4f7   : > { %v5071_v24 = vadd.f32 %v5070_v59, %v5006_v12 }
 0x4f8   : > { %v4944_v45 = vadd.f32 %v4943_v61, %v4879_v28 }
 0x4f9   : > { %v5104_v40 = vadd.f32 %v5507_v14, %v5071_v24 }
 0x4fb   : > { %v5120_v23 = vmax.f32 %v5104_v40, 0.0 }
 0x4fc   : > { %v5008_v54 = vpop.f32.mrf.mxu2  ;;  %v5073_v9 = vpop.f32.mrf.mxu3 }
 0x4fd   : > { %5523 = vst [vmem:[%s7988_s16 + $0xb8] sm:$0xff] %v5120_v23  ;;  %v5009_v21 = vadd.f32 %v5008_v54, %v4944_v45  ;;  %v4881_v1 = vpop.f32.mrf.mxu0  ;;  %v4946_v41 = vpop.f32.mrf.mxu1  ;;  %v5513_v23 = vld [vmem:[%s6041_s6 + $0x171] sm:$0xff] }
 0x4fe   : > { %v4882_v63 = vadd.f32 %v4881_v1, %v8252_v18 }
 0x4ff   : > { %v5074_v37 = vadd.f32 %v5073_v9, %v5009_v21 }
 0x500   : > { %v4947_v19 = vadd.f32 %v4946_v41, %v4882_v63 }
 0x501   : > { %v5105_v32 = vadd.f32 %v5508_v38, %v5074_v37 }
 0x503   : > { %v5121_v57 = vmax.f32 %v5105_v32, 0.0  ;;  %v5514_v32 = vld [vmem:[%s6041_s6 + $0x181] sm:$0xff] }
 0x504   : > { %v5011_v60 = vpop.f32.mrf.mxu2  ;;  %v5076_v8 = vpop.f32.mrf.mxu3 }
 0x505   : > { %5524 = vst [vmem:[%s7988_s16 + $0xc0] sm:$0xff] %v5121_v57  ;;  %v5012_v4 = vadd.f32 %v5011_v60, %v4947_v19  ;;  %v4884_v3 = vpop.f32.mrf.mxu0  ;;  %v4949_v51 = vpop.f32.mrf.mxu1 }
 0x506   : > { %v4885_v39 = vadd.f32 %v4884_v3, %v8259_v20 }
 0x507   : > { %v5077_v46 = vadd.f32 %v5076_v8, %v5012_v4 }
 0x508   : > { %v4950_v62 = vadd.f32 %v4949_v51, %v4885_v39 }
 0x509   : > { %v5106_v56 = vadd.f32 %v5509_v36, %v5077_v46  ;;  %v5515_v46 = vld [vmem:[%s6041_s6 + $0x189] sm:$0xff]  ;;  %s5649_s6 = scalar_lea.hbm %s8375_s5, 512 }
 0x50a   : > { %p5651_p4 = scmp.lt.s32.totalorder %s5649_s6, %s5645_s30 }
 0x50b   : > { %v5122_v0 = vmax.f32 %v5106_v56, 0.0 }
 0x50c   : > { %v5014_v18 = vpop.f32.mrf.mxu2  ;;  %v5079_v16 = vpop.f32.mrf.mxu3  ;;  %p5652_p7 = por %p5651_p4, %p5650_p3 }
 0x50d   : > { %5525 = vst [vmem:[%s7988_s16 + $0xc8] sm:$0xff] %v5122_v0  ;;  %v5015_v58 = vadd.f32 %v5014_v18, %v4950_v62  ;;  %v4887_v13 = vpop.f32.mrf.mxu0  ;;  %v4952_v47 = vpop.f32.mrf.mxu1 }
 0x50e   : > { %v4888_v29 = vadd.f32 %v4887_v13, %v8266_v30  ;;  %p5653_p8 = pnand %p5652_p7, %p5648_p2 }
 0x50f   : > { %v5080_v42 = vadd.f32 %v5079_v16, %v5015_v58 }
 0x510   : > { %v4953_v48 = vadd.f32 %v4952_v47, %v4888_v29 }
 0x511   : > { %v5107_v31 = vadd.f32 %v5510_v52, %v5080_v42 }
 0x513   : > { %v5123_v11 = vmax.f32 %v5107_v31, 0.0 }
 0x514   : > { %v5017_v20 = vpop.f32.mrf.mxu2  ;;  %v5082_v25 = vpop.f32.mrf.mxu3 }
 0x515   : > { %5526 = vst [vmem:[%s7988_s16 + $0xd0] sm:$0xff] %v5123_v11  ;;  %v5018_v7 = vadd.f32 %v5017_v20, %v4953_v48  ;;  %v4890_v49 = vpop.f32.mrf.mxu0  ;;  %v4955_v5 = vpop.f32.mrf.mxu1 }
 0x516   : > { %v4891_v22 = vadd.f32 %v4890_v49, %v8273_v53 }
 0x517   : > { %v5083_v26 = vadd.f32 %v5082_v25, %v5018_v7 }
 0x518   : > { %v4956_v43 = vadd.f32 %v4955_v5, %v4891_v22 }
 0x519   : > { %v5108_v27 = vadd.f32 %v5511_v6, %v5083_v26 }
 0x51b   : > { %v5124_v50 = vmax.f32 %v5108_v27, 0.0 }
 0x51c   : > { %v5020_v30 = vpop.f32.mrf.mxu2  ;;  %v5085_v33 = vpop.f32.mrf.mxu3 }
 0x51d   : > { %5527 = vst [vmem:[%s7988_s16 + $0xd8] sm:$0xff] %v5124_v50  ;;  %v5021_v15 = vadd.f32 %v5020_v30, %v4956_v43  ;;  %v4893_v17 = vpop.f32.mrf.mxu0  ;;  %v4958_v10 = vpop.f32.mrf.mxu1 }
 0x51e   : > { %v4894_v12 = vadd.f32 %v4893_v17, %v8280_v35 }
 0x51f   : > { %v5086_v59 = vadd.f32 %v5085_v33, %v5021_v15 }
 0x520   : > { %v4959_v14 = vadd.f32 %v4958_v10, %v4894_v12 }
 0x521   : > { %v5109_v55 = vadd.f32 %v5512_v44, %v5086_v59 }
 0x523   : > { %v5125_v61 = vmax.f32 %v5109_v55, 0.0 }
 0x524   : > { %v5023_v53 = vpop.f32.mrf.mxu2  ;;  %v5088_v24 = vpop.f32.mrf.mxu3 }
 0x525   : > { %5528 = vst [vmem:[%s7988_s16 + $0xe0] sm:$0xff] %v5125_v61  ;;  %v5024_v28 = vadd.f32 %v5023_v53, %v4959_v14  ;;  %v4896_v40 = vpop.f32.mrf.mxu0  ;;  %v4961_v45 = vpop.f32.mrf.mxu1 }
 0x526   : > { %v4897_v9 = vadd.f32 %v4896_v40, %v8284_v2 }
 0x527   : > { %v5089_v54 = vadd.f32 %v5088_v24, %v5024_v28 }
 0x528   : > { %v4962_v41 = vadd.f32 %v4961_v45, %v4897_v9 }
 0x529   : > { %v5110_v21 = vadd.f32 %v5513_v23, %v5089_v54 }
 0x52b   : > { %v5126_v1 = vmax.f32 %v5110_v21, 0.0 }
 0x52c   : > { %v5026_v35 = vpop.f32.mrf.mxu2  ;;  %v5091_v38 = vpop.f32.mrf.mxu3 }
 0x52d   : > { %5529 = vst [vmem:[%s7988_s16 + $0xe8] sm:$0xff] %v5126_v1  ;;  %v5027_v37 = vadd.f32 %v5026_v35, %v4962_v41  ;;  %v4899_v63 = vpop.f32.mrf.mxu0  ;;  %v4964_v60 = vpop.f32.mrf.mxu1 }
 0x52e   : > { %v4900_v57 = vadd.f32 %v4899_v63, %v8286_v34 }
 0x52f   : > { %v5092_v19 = vadd.f32 %v5091_v38, %v5027_v37 }
 0x530   : > { %v4965_v4 = vadd.f32 %v4964_v60, %v4900_v57 }
 0x531   : > { %v5111_v8 = vadd.f32 %v5514_v32, %v5092_v19 }
 0x533   : > { %v5127_v2 = vmax.f32 %v5111_v8, 0.0 }
 0x534   : > { %v5029_v3 = vpop.f32.mrf.mxu2  ;;  %v5094_v51 = vpop.f32.mrf.mxu3 }
 0x535   : > { %5530 = vst [vmem:[%s7988_s16 + $0xf0] sm:$0xff] %v5127_v2  ;;  %v5030_v36 = vadd.f32 %v5029_v3, %v4965_v4 }
 0x537   : > { %v5095_v39 = vadd.f32 %v5094_v51, %v5030_v36 }
 0x539   : > { %v5112_v34 = vadd.f32 %v5515_v46, %v5095_v39 }
 0x53b   : > { %v5128_v56 = vmax.f32 %v5112_v34, 0.0 }
 0x53d   : > { %5531 = vst [vmem:[%s7988_s16 + $0xf8] sm:$0xff] %v5128_v56 }
 0x53e   : > { %5656 = shalt.err (!%p5653_p8)
}
 0x53f   : > { %s5701_s9 = smov 128   ;;  %s5702_s16 = smov 8  }
 0x540   : > { %5543 = dma.vmem_to_hbm [thread:$0]  (%p5771_p5), %s5160_s17, 4096, %s5162_s25, %s5147_s22, %s5701_s9, %s5701_s9, %s5702_s16  }
 0x541 PF: > { %p5555_p9 = scmp.ge.s32.totalorder %s5695_s21, 2  ;;  %s5176_s23 = sand.u32 1, %s5683_s18  }
 0x542   : > { %s5177_s12 = scalar_lea.sflag [#allocation6], %s5176_s23 }
 0x543   : > { %p5550_p10 = pnand %p5555_p9, %p5775_p6 }
 0x545   : > { %p5551_p11 = pneg %p5550_p10 }
 0x547   : > { %5678 = dma.done.wait (%p5551_p11), %s5177_s12, 4096  }
 0x548   : > { %5680 = vsyncadd (%p5551_p11), %s5177_s12, 4294963200  ;;  %p16_p12 = scmp.ge.s32.totalorder %s5758_s24, 4   ;;  %s8390_s18 = smov %s5687_s19 }
 0x549   : > { %s8391_s19 = smov %s5691_s20  ;;  %s8392_s20 = smov %s5769_s27 }
 0x54a   : > { %s8393_s21 = smov %s5758_s24  ;;  %18 = sbr.rel (!%p16_p12) target bundleno = 4 (0x4), region = 92 }
 0x54f   :  { %5183 = vsyncpa [#allocation5], 1 }
 0x550   :  { %5185 = vsyncpa [#allocation5 + $0x1], 1 }
 0x551   :  { %5186 = vsyncpa [#allocation6], 1 }
 0x552   :  { %5188 = vsyncpa [#allocation6 + $0x1], 1 }

</bundles_post_ra>
